<compile_context>
chip_gen: v7x
topology: tpu7x:2x2x1
jax: 0.10.0
libtpu: 0.0.40
codegen_flags: <defaults>
</compile_context>

<pallas_src>
import jax
import jax.numpy as jnp
from jax.experimental import pallas as pl
from jax.experimental.pallas import tpu as pltpu


def _fused_mlp_kernel(x_ref, w0_ref, b0_ref, wh_ref, bh_ref, wl_ref, bl_ref,
                      o_ref, act_ref):
    """Grid axis = hidden-layer index (4 steps of 800x800).

    x_ref  : (B, 784)   bf16   (same block every step)
    w0_ref : (784, 800) bf16   (same block every step)
    b0_ref : (1, 800)   f32
    wh_ref : (800, 800) bf16   (streamed per grid step, double-buffered)
    bh_ref : (1, 800)   f32    (streamed per grid step)
    wl_ref : (800, 10)  bf16   (same block every step)
    bl_ref : (1, 10)    f32
    o_ref  : (B, 10)    f32    (written at last step only)
    act_ref: (B, 800)   bf16   persistent VMEM scratch carrying the activation
    """
    l = pl.program_id(0)
    n = pl.num_programs(0)

    # First layer (784 -> 800) + ReLU, only at grid step 0.
    @pl.when(l == 0)
    def _():
        y = jnp.dot(x_ref[...], w0_ref[...], preferred_element_type=jnp.float32)
        y = jnp.maximum(y + b0_ref[...], 0.0)
        act_ref[...] = y.astype(act_ref.dtype)

    # Hidden layer l (800 -> 800) + ReLU. Weight block for step l+1 is DMA'd by
    # the pipeline while this matmul runs.
    y = jnp.dot(act_ref[...], wh_ref[...], preferred_element_type=jnp.float32)
    y = jnp.maximum(y + bh_ref[...], 0.0)
    act_ref[...] = y.astype(act_ref.dtype)

    # Last layer (800 -> 10), no ReLU, only at the final grid step.
    @pl.when(l == n - 1)
    def _():
        y = jnp.dot(act_ref[...], wl_ref[...], preferred_element_type=jnp.float32)
        o_ref[...] = (y + bl_ref[...]).astype(o_ref.dtype)


def mlp_fused(x2d, w0, b0, wh, bh, wl, bl):
    """Single fused forward pass: x2d (B, 784) bf16 -> (B, 10) f32."""
    batch, d_in = x2d.shape
    n_hidden, hidden, _ = wh.shape
    d_out = wl.shape[1]

    return pl.pallas_call(
        _fused_mlp_kernel,
        out_shape=jax.ShapeDtypeStruct((batch, d_out), jnp.float32),
        grid_spec=pltpu.PrefetchScalarGridSpec(
            num_scalar_prefetch=0,
            grid=(n_hidden,),
            in_specs=[
                pl.BlockSpec((batch, d_in), lambda l: (0, 0)),        # x
                pl.BlockSpec((d_in, hidden), lambda l: (0, 0)),       # w0
                pl.BlockSpec((1, hidden), lambda l: (0, 0)),          # b0
                pl.BlockSpec((None, hidden, hidden), lambda l: (l, 0, 0)),  # wh[l]
                pl.BlockSpec((None, 1, hidden), lambda l: (l, 0, 0)),       # bh[l]
                pl.BlockSpec((hidden, d_out), lambda l: (0, 0)),      # wl
                pl.BlockSpec((1, d_out), lambda l: (0, 0)),           # bl
            ],
            out_specs=pl.BlockSpec((batch, d_out), lambda l: (0, 0)),
            scratch_shapes=[pltpu.VMEM((batch, hidden), jnp.bfloat16)],
        ),
        compiler_params=pltpu.CompilerParams(
            dimension_semantics=("arbitrary",),  # sequential chain over layers
        ),
    )(x2d, w0, b0, wh, bh, wl, bl)


def init_params(key):
    """PyTorch-like nn.Linear init (uniform +/- 1/sqrt(fan_in)).

    Weights are stored (in_features, out_features) so y = x @ W + b, then cast
    to bf16. Biases stay f32 with shape (1, out) for TPU-friendly 2D layout.
    """
    dims = [784, 800, 800, 800, 800, 800, 10]
    ws, bs = [], []
    for i in range(len(dims) - 1):
        fan_in, fan_out = dims[i], dims[i + 1]
        key, wk, bk = jax.random.split(key, 3)
        bound = 1.0 / (fan_in ** 0.5)
        ws.append(jax.random.uniform(wk, (fan_in, fan_out), jnp.float32, -bound, bound))
        bs.append(jax.random.uniform(bk, (1, fan_out), jnp.float32, -bound, bound))

    w0 = ws[0].astype(jnp.bfloat16)
    b0 = bs[0]
    wh = jnp.stack([w.astype(jnp.bfloat16) for w in ws[1:5]])   # (4, 800, 800) bf16
    bh = jnp.stack(bs[1:5])                                     # (4, 1, 800) f32
    wl = ws[5].astype(jnp.bfloat16)
    bl = bs[5]
    return (w0, b0, wh, bh, wl, bl)


@jax.jit
def mlp_forward(x, params):
    w0, b0, wh, bh, wl, bl = params
    x2d = x.reshape(x.shape[0], -1).astype(jnp.bfloat16)  # x.view(x.size(0), -1)
    return mlp_fused(x2d, w0, b0, wh, bh, wl, bl)


def mlp_reference(x, params):
    """Pure-JAX reference using the same bf16 operands / f32 accumulation."""
    w0, b0, wh, bh, wl, bl = params
    a = x.reshape(x.shape[0], -1).astype(jnp.bfloat16)
    y = jnp.dot(a, w0, preferred_element_type=jnp.float32) + b0
    a = jnp.maximum(y, 0.0).astype(jnp.bfloat16)
    for l in range(wh.shape[0]):
        y = jnp.dot(a, wh[l], preferred_element_type=jnp.float32) + bh[l]
        a = jnp.maximum(y, 0.0).astype(jnp.bfloat16)
    return jnp.dot(a, wl, preferred_element_type=jnp.float32) + bl


if __name__ == "__main__":
    key = jax.random.PRNGKey(0)
    pkey, xkey = jax.random.split(key)
    params = init_params(pkey)

    # Small MNIST-like input: batch=8, 1x28x28 (flattens to 784 as the module requires).
    x = jax.random.normal(xkey, (8, 1, 28, 28), jnp.float32)

    out = jax.block_until_ready(mlp_forward(x, params))
    ref = mlp_reference(x, params)

    assert out.shape == (8, 10), out.shape
    assert jnp.allclose(out, ref, atol=1e-2, rtol=1e-2), "mismatch vs reference"

    print("KERNEL_OK")
</pallas_src>

<mosaic_0001>
module attributes {stable_mosaic.version = 11 : i64} {
  func.func @_fused_mlp_kernel(%arg0: i32, %arg1: memref<8x784xbf16, #tpu.memory_space<vmem>>, %arg2: memref<784x800xbf16, #tpu.memory_space<vmem>>, %arg3: memref<1x800xf32, #tpu.memory_space<vmem>>, %arg4: memref<1x800x800xbf16, #tpu.memory_space<vmem>>, %arg5: memref<1x1x800xf32, #tpu.memory_space<vmem>>, %arg6: memref<800x10xbf16, #tpu.memory_space<vmem>>, %arg7: memref<1x10xf32, #tpu.memory_space<vmem>>, %arg8: memref<8x10xf32, #tpu.memory_space<vmem>>, %arg9: memref<8x800xbf16, #tpu.memory_space<vmem>>) attributes {dimension_semantics = [#tpu.dimension_semantics<arbitrary>], iteration_bounds = array<i64: 4>, scalar_prefetch = 0 : i64, scratch_operands = 1 : i64, tpu.core_type = #tpu.core_type<tc>, window_params = [{pipeline_mode = #tpu.pipeline_mode<synchronous>, transform_indices = @transform_0, window_bounds = array<i64: 8, 784>}, {pipeline_mode = #tpu.pipeline_mode<synchronous>, transform_indices = @transform_1, window_bounds = array<i64: 784, 800>}, {pipeline_mode = #tpu.pipeline_mode<synchronous>, transform_indices = @transform_2, window_bounds = array<i64: 1, 800>}, {transform_indices = @transform_3, window_bounds = array<i64: 1, 800, 800>}, {transform_indices = @transform_4, window_bounds = array<i64: 1, 1, 800>}, {pipeline_mode = #tpu.pipeline_mode<synchronous>, transform_indices = @transform_5, window_bounds = array<i64: 800, 10>}, {pipeline_mode = #tpu.pipeline_mode<synchronous>, transform_indices = @transform_6, window_bounds = array<i64: 1, 10>}, {pipeline_mode = #tpu.pipeline_mode<synchronous>, transform_indices = @transform_7, window_bounds = array<i64: 8, 10>}]} {
    %c0_i32 = arith.constant 0 : i32
    %0 = arith.cmpi eq, %arg0, %c0_i32 : i32
    %1 = arith.extui %0 : i1 to i32
    %c0_i32_0 = arith.constant 0 : i32
    %2 = arith.cmpi ne, %1, %c0_i32_0 : i32
    scf.if %2 {
      %c0_12 = arith.constant 0 : index
      %c0_13 = arith.constant 0 : index
      %18 = vector.load %arg1[%c0_12, %c0_13] : memref<8x784xbf16, #tpu.memory_space<vmem>>, vector<8x784xbf16>
      %c0_14 = arith.constant 0 : index
      %c0_15 = arith.constant 0 : index
      %19 = vector.load %arg2[%c0_14, %c0_15] : memref<784x800xbf16, #tpu.memory_space<vmem>>, vector<784x800xbf16>
      %cst_16 = arith.constant dense<0.000000e+00> : vector<8x800xf32>
      %20 = tpu.matmul %18, %19, %cst_16 {dimension_numbers = #tpu.dot_dimension_numbers<[1], [0], [0], [1], [0, 0, 1, 1], [], []>} : vector<8x784xbf16>, vector<784x800xbf16>, vector<8x800xf32> -> vector<8x800xf32>
      %c0_17 = arith.constant 0 : index
      %c0_18 = arith.constant 0 : index
      %21 = vector.load %arg3[%c0_17, %c0_18] : memref<1x800xf32, #tpu.memory_space<vmem>>, vector<1x800xf32>
      %22 = vector.broadcast %21 : vector<1x800xf32> to vector<8x800xf32>
      %23 = arith.addf %20, %22 : vector<8x800xf32>
      %cst_19 = arith.constant 0.000000e+00 : f32
      %24 = vector.broadcast %cst_19 : f32 to vector<8x800xf32>
      %25 = arith.maximumf %23, %24 : vector<8x800xf32>
      %26 = arith.truncf %25 : vector<8x800xf32> to vector<8x800xbf16>
      %c0_20 = arith.constant 0 : index
      %c0_21 = arith.constant 0 : index
      %27 = vector.load %arg9[%c0_20, %c0_21] : memref<8x800xbf16, #tpu.memory_space<vmem>>, vector<8x800xbf16>
      tpu.vector_store %arg9[%c0_20, %c0_21], %26 {strides = array<i32>} : memref<8x800xbf16, #tpu.memory_space<vmem>>, vector<8x800xbf16>,
    } else {
    }
    %c0 = arith.constant 0 : index
    %c0_1 = arith.constant 0 : index
    %3 = vector.load %arg9[%c0, %c0_1] : memref<8x800xbf16, #tpu.memory_space<vmem>>, vector<8x800xbf16>
    %c0_2 = arith.constant 0 : index
    %c0_3 = arith.constant 0 : index
    %c0_4 = arith.constant 0 : index
    %4 = vector.load %arg4[%c0_2, %c0_3, %c0_4] : memref<1x800x800xbf16, #tpu.memory_space<vmem>>, vector<1x800x800xbf16>
    %5 = vector.shape_cast %4 : vector<1x800x800xbf16> to vector<800x800xbf16>
    %cst = arith.constant dense<0.000000e+00> : vector<8x800xf32>
    %6 = tpu.matmul %3, %5, %cst {dimension_numbers = #tpu.dot_dimension_numbers<[1], [0], [0], [1], [0, 0, 1, 1], [], []>} : vector<8x800xbf16>, vector<800x800xbf16>, vector<8x800xf32> -> vector<8x800xf32>
    %c0_5 = arith.constant 0 : index
    %c0_6 = arith.constant 0 : index
    %c0_7 = arith.constant 0 : index
    %7 = vector.load %arg5[%c0_5, %c0_6, %c0_7] : memref<1x1x800xf32, #tpu.memory_space<vmem>>, vector<1x1x800xf32>
    %8 = vector.shape_cast %7 : vector<1x1x800xf32> to vector<1x800xf32>
    %9 = vector.broadcast %8 : vector<1x800xf32> to vector<8x800xf32>
    %10 = arith.addf %6, %9 : vector<8x800xf32>
    %cst_8 = arith.constant 0.000000e+00 : f32
    %11 = vector.broadcast %cst_8 : f32 to vector<8x800xf32>
    %12 = arith.maximumf %10, %11 : vector<8x800xf32>
    %13 = arith.truncf %12 : vector<8x800xf32> to vector<8x800xbf16>
    %c0_9 = arith.constant 0 : index
    %c0_10 = arith.constant 0 : index
    %14 = vector.load %arg9[%c0_9, %c0_10] : memref<8x800xbf16, #tpu.memory_space<vmem>>, vector<8x800xbf16>
    tpu.vector_store %arg9[%c0_9, %c0_10], %13 {strides = array<i32>} : memref<8x800xbf16, #tpu.memory_space<vmem>>, vector<8x800xbf16>,
    %c3_i32 = arith.constant 3 : i32
    %15 = arith.cmpi eq, %arg0, %c3_i32 : i32
    %16 = arith.extui %15 : i1 to i32
    %c0_i32_11 = arith.constant 0 : i32
    %17 = arith.cmpi ne, %16, %c0_i32_11 : i32
    scf.if %17 {
      %c0_12 = arith.constant 0 : index
      %c0_13 = arith.constant 0 : index
      %18 = vector.load %arg9[%c0_12, %c0_13] : memref<8x800xbf16, #tpu.memory_space<vmem>>, vector<8x800xbf16>
      %c0_14 = arith.constant 0 : index
      %c0_15 = arith.constant 0 : index
      %19 = vector.load %arg6[%c0_14, %c0_15] : memref<800x10xbf16, #tpu.memory_space<vmem>>, vector<800x10xbf16>
      %cst_16 = arith.constant dense<0.000000e+00> : vector<8x10xf32>
      %20 = tpu.matmul %18, %19, %cst_16 {dimension_numbers = #tpu.dot_dimension_numbers<[1], [0], [0], [1], [0, 0, 1, 1], [], []>} : vector<8x800xbf16>, vector<800x10xbf16>, vector<8x10xf32> -> vector<8x10xf32>
      %c0_17 = arith.constant 0 : index
      %c0_18 = arith.constant 0 : index
      %21 = vector.load %arg7[%c0_17, %c0_18] : memref<1x10xf32, #tpu.memory_space<vmem>>, vector<1x10xf32>
      %22 = vector.broadcast %21 : vector<1x10xf32> to vector<8x10xf32>
      %23 = arith.addf %20, %22 : vector<8x10xf32>
      %c0_19 = arith.constant 0 : index
      %c0_20 = arith.constant 0 : index
      %24 = vector.load %arg8[%c0_19, %c0_20] : memref<8x10xf32, #tpu.memory_space<vmem>>, vector<8x10xf32>
      tpu.vector_store %arg8[%c0_19, %c0_20], %23 {strides = array<i32>} : memref<8x10xf32, #tpu.memory_space<vmem>>, vector<8x10xf32>,
    } else {
    }
    return
  }
  func.func @transform_0(%arg0: i32) -> (i32, i32) {
    %c0_i32 = arith.constant 0 : i32
    %c0_i32_0 = arith.constant 0 : i32
    %c0_i32_1 = arith.constant 0 : i32
    return %c0_i32, %c0_i32_0 : i32, i32
  }
  func.func @transform_1(%arg0: i32) -> (i32, i32) {
    %c0_i32 = arith.constant 0 : i32
    %c0_i32_0 = arith.constant 0 : i32
    %c0_i32_1 = arith.constant 0 : i32
    return %c0_i32, %c0_i32_0 : i32, i32
  }
  func.func @transform_2(%arg0: i32) -> (i32, i32) {
    %c0_i32 = arith.constant 0 : i32
    %c0_i32_0 = arith.constant 0 : i32
    %c0_i32_1 = arith.constant 0 : i32
    return %c0_i32, %c0_i32_0 : i32, i32
  }
  func.func @transform_3(%arg0: i32) -> (i32, i32, i32) {
    %c0_i32 = arith.constant 0 : i32
    %c0_i32_0 = arith.constant 0 : i32
    %c0_i32_1 = arith.constant 0 : i32
    return %arg0, %c0_i32, %c0_i32_0 : i32, i32, i32
  }
  func.func @transform_4(%arg0: i32) -> (i32, i32, i32) {
    %c0_i32 = arith.constant 0 : i32
    %c0_i32_0 = arith.constant 0 : i32
    %c0_i32_1 = arith.constant 0 : i32
    return %arg0, %c0_i32, %c0_i32_0 : i32, i32, i32
  }
  func.func @transform_5(%arg0: i32) -> (i32, i32) {
    %c0_i32 = arith.constant 0 : i32
    %c0_i32_0 = arith.constant 0 : i32
    %c0_i32_1 = arith.constant 0 : i32
    return %c0_i32, %c0_i32_0 : i32, i32
  }
  func.func @transform_6(%arg0: i32) -> (i32, i32) {
    %c0_i32 = arith.constant 0 : i32
    %c0_i32_0 = arith.constant 0 : i32
    %c0_i32_1 = arith.constant 0 : i32
    return %c0_i32, %c0_i32_0 : i32, i32
  }
  func.func @transform_7(%arg0: i32) -> (i32, i32) {
    %c0_i32 = arith.constant 0 : i32
    %c0_i32_0 = arith.constant 0 : i32
    %c0_i32_1 = arith.constant 0 : i32
    return %c0_i32, %c0_i32_0 : i32, i32
  }
}

</mosaic_0001>

<bundles_post_ra>
// kernel: mlp_forward.1
= control target key start
LH: loop header
LB: loop body
LE: loop exit
PB: predicated region body
PF: predicated region fallthrough
CT: control target
= control target key end

     0   :  { %12 = vsyncpa [#allocation4], 0  ;;  %s10442_s0 = inlined_call_operand.vmem [shape: bf16[8,784], index: 0, kind: input, shape index: {}]   ;;  %s10443_s1 = inlined_call_operand.hbm [shape: bf16[784,800], index: 1, kind: input, shape index: {}]   ;;  %s10444_s2 = inlined_call_operand.hbm [shape: f32[1,800], index: 2, kind: input, shape index: {}]   ;;  %s10445_s3 = inlined_call_operand.hbm [shape: bf16[4,800,800], index: 3, kind: input, shape index: {}]   ;;  %s10446_s4 = inlined_call_operand.hbm [shape: f32[4,1,800], index: 4, kind: input, shape index: {}]   ;;  %s10447_s5 = inlined_call_operand.vmem [shape: bf16[800,10], index: 5, kind: input, shape index: {}]   ;;  %s10448_s6 = inlined_call_operand.hbm [shape: f32[1,10], index: 6, kind: input, shape index: {}]   ;;  %s10449_s7 = inlined_call_operand.hbm [shape: f32[8,10], index: 7, kind: output, shape index: {}]  }
   0x1   :  { %13 = vsyncpa [#allocation7], 0 }
   0x2   :  { %14 = vsyncpa [#allocation5], 0  ;;  %s9502_s24 = smov 0   ;;  %s9504_s25 = smov 0  }
   0x3   :  { %s9506_s26 = smov 0   ;;  %s9508_s27 = smov 0  }
   0x4 LB: > { %s9521_s28 = sadd.s32 4294967295, %s9444_s27   ;;  %s9524_s29 = sadd.s32 1, %s9444_s27   ;;  %s9444_s27 = sphi %s9508_s27, %s10482_s27   ;;  %s9440_s26 = sphi %s9506_s26, %s10486_s26   ;;  %s9436_s25 = sphi %s9504_s25, %s10485_s25   ;;  %s9432_s24 = sphi %s9502_s24, %s10484_s24  }
   0x5   : > { %10459 = sst [smem:[#allocation17_spill]] %s9524_s29  ;;  %s87_s30 = ssub.s32 %s9444_s27, %s9524_s29 }
   0x6   : > { %s90_s8 = sadd.s32 1, %s9440_s26  ;;  %p88_p0 = scmp.eq.s32.totalorder %s87_s30, 0 }
   0x7   : > { %p97_p1 = scmp.ne.s32.totalorder %s9440_s26, %s9436_s25  ;;  %p98_p2 = scmp.eq.s32.totalorder %s9444_s27, 0 }
   0x8   : > { %p103_p3 = scmp.ne.s32.totalorder %s9436_s25, %s9432_s24  ;;  %p10450_p5 = scmp.eq.s32.totalorder %s9521_s28, 0 }
   0x9   : > { %s9534_s9 = scalar_select %p88_p0, %s9440_s26, %s90_s8  }
   0xa   : > { %p9536_p4 = por %p98_p2, %p97_p1  ;;  %p6952_p6 = scmp.ge.s32.totalorder %s9444_s27, 1 }
   0xb   : > { %10460 = sst [smem:[#allocation18_spill]] %s9534_s9  ;;  %p203_p7 = scmp.lt.s32.totalorder %s9444_s27, 5 }
   0xc   : > { %p9545_p8 = por %p10450_p5, %p103_p3  ;;  %s9446_s13 = smov [#allocation3]  }
   0xd   : > { %p9550_p10 = pnand %p6952_p6, %p203_p7  ;;  %s218_s14 = sshll.u32 %s9446_s13, 4  ;;  %s219_s14 = int_to_ptr.vmem [resolvable:$true] %s218_s14 }
   0xe   : > { %s10462_s11 = scalar_select %p9545_p8, 1, 0 }
   0xf   : > { %s10463_s12 = scalar_select %p9550_p10, 1, 0 }
  0x10   : > { %p8089_p11 = pneg %p9550_p10  ;;  %p8109_p13 = scmp.lt.s32.totalorder %s9444_s27, 4 }
  0x11   : > { %s9224_s20 = scalar_lea.hbm %s10443_s1, 43904 }
  0x12   : > { %p9558_p12 = pnand %p8089_p11, %p10450_p5  ;;  %p9566_p0 = pnand %p8109_p13, %p9536_p4 }
  0x13   : > { %p9225_p1 = scmp.ne.s32.totalorder %s10443_s1, %s9224_s20  ;;  %p9231_p6 = scmp.lt.u32.totalorder %s9224_s20, %s10443_s1 }
  0x14   : > { %s10464_s15 = scalar_select %p9558_p12, 1, 0 }
  0x15   : > { %s10465_s17 = scalar_select %p9566_p0, 1, 0 }
  0x16   : > { %p9578_p2 = pneg %p9558_p12 }
  0x18   : > { %p9227_p3 = pnand %p9578_p2, %p9225_p1 }
  0x1a   : > { %p9228_p4 = pneg %p9227_p3 }
  0x1c   : > { %p9233_p7 = pnand %p9231_p6, %p9228_p4 }
  0x1e   : > { %9236 = shalt.err (!%p9233_p7)
}
  0x1f   : > { %s9237_s8 = scalar_lea.vmem %s219_s14, 43904  ;;  %p9245_p5 = scmp.lt.s32.totalorder %s219_s14, %s219_s14 }
  0x20   : > { %p9238_p11 = scmp.ne.s32.totalorder %s219_s14, %s9237_s8  ;;  %p9246_p8 = scmp.lt.s32.totalorder %s9237_s8, %s9237_s8 }
  0x22   : > { %p9240_p13 = pnand %p9238_p11, %p9578_p2  ;;  %p9247_p10 = por %p9246_p8, %p9245_p5 }
  0x24   : > { %p9241_p9 = pneg %p9240_p13 }
  0x26   : > { %p9248_p0 = pnand %p9247_p10, %p9241_p9 }
  0x28   : > { %9251 = shalt.err (!%p9248_p0)
}
  0x29   : > { %s10456_s10 = smov 448   ;;  %s10457_s13 = smov 28  }
  0x2a   : > { %8092 = dma.hbm_to_vmem [thread:$0]  (!%p9558_p12), %s10443_s1, 43904, %s219_s14, [#allocation4], %s10456_s10, %s10456_s10, %s10457_s13  }
  0x2b   : > { %s9449_s20 = smov [#allocation6]   ;;  %s9252_s30 = scalar_lea.hbm %s10444_s2, 112 }
  0x2c   : > { %s232_s21 = sshll.u32 %s9449_s20, 4  ;;  %p9253_p5 = scmp.ne.s32.totalorder %s10444_s2, %s9252_s30  ;;  %s233_s21 = int_to_ptr.vmem [resolvable:$true] %s232_s21 }
  0x2d   : > { %p9259_p10 = scmp.lt.u32.totalorder %s9252_s30, %s10444_s2 }
  0x2e   : > { %p9255_p8 = pnand %p9253_p5, %p9578_p2 }
  0x30   : > { %p9256_p9 = pneg %p9255_p8 }
  0x32   : > { %p9261_p0 = pnand %p9259_p10, %p9256_p9 }
  0x34   : > { %9264 = shalt.err (!%p9261_p0)
}
  0x35   : > { %s9265_s14 = scalar_lea.vmem %s233_s21, 112  ;;  %s9272_s18 = scalar_lea.vmem %s233_s21, 128 }
  0x36   : > { %p9266_p1 = scmp.ne.s32.totalorder %s233_s21, %s9265_s14  ;;  %p9273_p6 = scmp.lt.s32.totalorder %s233_s21, %s233_s21 }
  0x37   : > { %p9274_p7 = scmp.lt.s32.totalorder %s9272_s18, %s9265_s14 }
  0x38   : > { %p9268_p3 = pnand %p9266_p1, %p9578_p2 }
  0x39   : > { %p9275_p11 = por %p9274_p7, %p9273_p6 }
  0x3a   : > { %p9269_p4 = pneg %p9268_p3 }
  0x3c   : > { %p9276_p13 = pnand %p9275_p11, %p9269_p4 }
  0x3e   : > { %9279 = shalt.err (!%p9276_p13)
}
  0x3f   : > { %8095 = dma.hbm_to_vmem [thread:$0]  (!%p9558_p12), %s10444_s2, 112, %s233_s21, [#allocation7]  }
  0x40   : > { %s259_s29 = sand.u32 1, %s9440_s26   ;;  %s8064_s9 = smul.u32 44800, %s9444_s27 }
  0x41   : > { %s8063_s20 = smul.u32 2800, %s259_s29  ;;  %s9450_s8 = smov [#allocation10]  }
  0x42   : > { %s9620_s30 = scalar_lea.hbm %s10445_s3, %s8064_s9  ;;  %s246_s14 = sshll.u32 %s9450_s8, 4  ;;  %s9622_s14 = int_to_ptr.vmem [resolvable:$true] %s246_s14 }
  0x43   : > { %s261_s18 = scalar_lea.vmem [#allocation8], %s8063_s20  ;;  %s9624_s16 = smul.u32 7, %s259_s29 }
  0x44   : > { %s268_s21 = sshll.u32 %s261_s18, 4  ;;  %s10467_s10 = sand.u32 1, %s9444_s27   ;;  %s9626_s21 = int_to_ptr.vmem [resolvable:$true] %s268_s21 }
  0x45   : > { %s9631_s13 = scalar_lea.sflag [#allocation4], %s10467_s10  ;;  %s9280_s9 = scalar_lea.hbm %s9620_s30, 44800 }
  0x46   : > { %p9281_p5 = scmp.ne.s32.totalorder %s9620_s30, %s9280_s9  ;;  %p10468_p8 = scmp.ne.s32.totalorder %s10465_s17, 0 }
  0x47   : > { %s9285_s20 = scalar_lea.hbm %s10445_s3, 179200  ;;  %p9286_p1 = scmp.lt.u32.totalorder %s9620_s30, %s10445_s3 }
  0x48   : > { %p9282_p9 = pneg %p10468_p8  ;;  %p9287_p3 = scmp.lt.u32.totalorder %s9285_s20, %s9280_s9 }
  0x49   : > { %p9289_p6 = scmp.lt.u32.totalorder %s9280_s9, %s9620_s30 }
  0x4a   : > { %p9283_p10 = pnand %p9282_p9, %p9281_p5  ;;  %p9288_p4 = por %p9287_p3, %p9286_p1 }
  0x4c   : > { %p9284_p0 = pneg %p9283_p10  ;;  %p9290_p7 = por %p9289_p6, %p9288_p4 }
  0x4e   : > { %p9291_p11 = pnand %p9290_p7, %p9284_p0 }
  0x50   : > { %9294 = shalt.err (!%p9291_p11)
}
  0x51   : > { %s9295_s10 = scalar_lea.vmem %s9626_s21, 44800  ;;  %s9451_s18 = smov [#allocation8]  }
  0x52   : > { %p9296_p13 = scmp.ne.s32.totalorder %s9626_s21, %s9295_s10  ;;  %s9300_s22 = sshll.u32 %s9451_s18, 4  ;;  %s9301_s22 = int_to_ptr.vmem [resolvable:$false] %s9300_s22 }
  0x53   : > { %s9302_s24 = scalar_lea.vmem %s9301_s22, 89600  ;;  %p9303_p12 = scmp.lt.s32.totalorder %s9626_s21, %s9301_s22 }
  0x54   : > { %p9298_p5 = pnand %p9296_p13, %p9282_p9  ;;  %p9304_p1 = scmp.lt.s32.totalorder %s9302_s24, %s9295_s10 }
  0x56   : > { %p9299_p10 = pneg %p9298_p5  ;;  %p9305_p3 = por %p9304_p1, %p9303_p12 }
  0x58   : > { %p9306_p4 = pnand %p9305_p3, %p9299_p10 }
  0x5a   : > { %9309 = shalt.err (!%p9306_p4)
}
  0x5b   : > { %s10469_s9 = smov 28   ;;  %s10470_s20 = smov 448  }
  0x5c   : > { %8102 = dma.hbm_to_vmem [thread:$0]  (!%p10468_p8), %s9620_s30, 44800, %s9626_s21, %s9631_s13, %s10470_s20, %s10470_s20, %s10469_s9  }
  0x5d   : > { %s9310_s18 = scalar_lea.hbm %s10448_s6, 16 }
  0x5e   : > { %p9311_p12 = scmp.ne.s32.totalorder %s10448_s6, %s9310_s18  ;;  %p9317_p7 = scmp.lt.u32.totalorder %s9310_s18, %s10448_s6 }
  0x60   : > { %p9313_p0 = pnand %p9311_p12, %p9578_p2 }
  0x62   : > { %p9314_p6 = pneg %p9313_p0 }
  0x64   : > { %p9319_p11 = pnand %p9317_p7, %p9314_p6 }
  0x66   : > { %9322 = shalt.err (!%p9319_p11)
}
  0x67   : > { %s9323_s30 = scalar_lea.vmem %s9622_s14, 16  ;;  %s9330_s21 = scalar_lea.vmem %s9622_s14, 32 }
  0x68   : > { %p9324_p13 = scmp.ne.s32.totalorder %s9622_s14, %s9323_s30  ;;  %p9331_p1 = scmp.lt.s32.totalorder %s9622_s14, %s9622_s14 }
  0x69   : > { %p9332_p3 = scmp.lt.s32.totalorder %s9330_s21, %s9323_s30 }
  0x6a   : > { %p9326_p5 = pnand %p9324_p13, %p9578_p2 }
  0x6b   : > { %p9333_p4 = por %p9332_p3, %p9331_p1 }
  0x6c   : > { %p9327_p10 = pneg %p9326_p5 }
  0x6e   : > { %p9334_p12 = pnand %p9333_p4, %p9327_p10 }
  0x70   : > { %9337 = shalt.err (!%p9334_p12)
}
  0x71   : > { %p10471_p0 = scmp.ne.s32.totalorder %s10464_s15, 0  ;;  %s10472_s23 = smul.u32 112, %s9444_s27 }
  0x72   : > { %s282_s18 = scalar_lea.vmem [#allocation9], %s9624_s16  ;;  %s9343_s10 = scalar_lea.hbm %s10446_s4, 448 }
  0x73   : > { %8098 = dma.hbm_to_vmem [thread:$0]  (!%p10471_p0), %s10448_s6, 16, %s9622_s14, [#allocation7]  }
  0x74   : > { %s9691_s8 = scalar_lea.hbm %s10446_s4, %s10472_s23  ;;  %s290_s15 = sshll.u32 %s282_s18, 4  ;;  %s291_s15 = int_to_ptr.vmem [resolvable:$true] %s290_s15 }
  0x75   : > { %s9338_s22 = scalar_lea.hbm %s9691_s8, 112  ;;  %p9344_p11 = scmp.lt.u32.totalorder %s9691_s8, %s10446_s4 }
  0x76   : > { %p9339_p2 = scmp.ne.s32.totalorder %s9691_s8, %s9338_s22  ;;  %p9345_p13 = scmp.lt.u32.totalorder %s9343_s10, %s9338_s22 }
  0x77   : > { %p9347_p10 = scmp.lt.u32.totalorder %s9338_s22, %s9691_s8 }
  0x78   : > { %p9341_p6 = pnand %p9339_p2, %p9282_p9  ;;  %p9346_p5 = por %p9345_p13, %p9344_p11 }
  0x7a   : > { %p9342_p7 = pneg %p9341_p6  ;;  %p9348_p1 = por %p9347_p10, %p9346_p5 }
  0x7c   : > { %p9349_p3 = pnand %p9348_p1, %p9342_p7 }
  0x7e   : > { %9352 = shalt.err (!%p9349_p3)
}
  0x7f   : > { %s9353_s16 = scalar_lea.vmem %s291_s15, 112  ;;  %s9452_s21 = smov [#allocation9]  }
  0x80   : > { %p9354_p4 = scmp.ne.s32.totalorder %s291_s15, %s9353_s16  ;;  %s9358_s19 = sshll.u32 %s9452_s21, 4  ;;  %s9359_s19 = int_to_ptr.vmem [resolvable:$false] %s9358_s19 }
  0x81   : > { %s9360_s9 = scalar_lea.vmem %s9359_s19, 224  ;;  %p9361_p2 = scmp.lt.s32.totalorder %s291_s15, %s9359_s19 }
  0x82   : > { %p9356_p12 = pnand %p9354_p4, %p9282_p9  ;;  %p9362_p6 = scmp.lt.s32.totalorder %s9360_s9, %s9353_s16 }
  0x84   : > { %p9357_p0 = pneg %p9356_p12  ;;  %p9363_p11 = por %p9362_p6, %p9361_p2 }
  0x86   : > { %p9364_p13 = pnand %p9363_p11, %p9357_p0 }
  0x88   : > { %9367 = shalt.err (!%p9364_p13)
}
  0x89   : > { %8105 = dma.hbm_to_vmem [thread:$0]  (!%p10468_p8), %s9691_s8, 112, %s291_s15, %s9631_s13  }
  0x8a   : > { %p10473_p7 = scmp.ne.s32.totalorder %s10463_s12, 0 }
  0x8b   : > { %p10474_p9 = scmp.eq.s32.totalorder (!%p10473_p7), %s9521_s28, 0 }
  0x8c   : > { %299 = sbr.rel (%p10473_p7) target bundleno = 1585 (0x631), region = 48 }
  0x93   : > { %9411 = dma.done.wait (%p10474_p9), [#allocation4], 43904   ;;  %p10475_p5 = pmov %p10474_p9 }
  0x95   : > { %9413 = vsyncadd (%p10475_p5), [#allocation4], 4294923392  ;;  %p10476_p10 = pmov %p10475_p5 }
  0x96   : > { %p10477_p1 = pmov %p10475_p5 }
  0x97   : > { %9415 = dma.done.wait (%p10476_p10), [#allocation7], 112  }
  0x98   : > { %9417 = vsyncadd (%p10477_p1), [#allocation7], 4294967184  ;;  %s309_s17 = sand.u32 1, %s9521_s28   ;;  %s311_s13 = sand.u32 1, %s9436_s25  }
  0x99   : > { %s8067_s23 = smul.u32 2800, %s311_s13  ;;  %s310_s12 = scalar_lea.sflag [#allocation4], %s309_s17 }
  0x9a   : > { %p10478_p8 = scmp.ne.s32.totalorder %s10462_s11, 0 }
  0x9b   : > { %s9726_s20 = scalar_lea.vmem [#allocation8], %s8067_s23 }
  0x9c   : > { %9419 = dma.done.wait (%p10478_p8), %s310_s12, 44912  }
  0x9d   : > { %9421 = vsyncadd (%p10478_p8), %s310_s12, 4294922384  ;;  %s9732_s29 = smul.u32 7, %s311_s13  ;;  %p10479_p3 = pmov %p10477_p1 }
  0x9f   : > { %s322_s8 = scalar_lea.vmem [#allocation9], %s9732_s29 }
  0xa0   : > { %9423 = dma.done.wait (%p10479_p3), [#allocation7], 16   ;;  %p10480_p4 = pmov %p10477_p1 }
  0xa1   : > { %p10481_p12 = scmp.ne.s32.totalorder %s9521_s28, 0 }
  0xa2   : > { %9425 = vsyncadd (%p10480_p4), [#allocation7], 4294967280  ;;  %v8161_v0 = vld [vmem:[#allocation3 + $0x4] ss:$28 sps:$4 sm:$0xff] (!%p10481_p12)   ;;  %v8167_v4 = vld [vmem:[#allocation3 + $0x3c] ss:$28 sps:$4 sm:$0xff] (!%p10481_p12)  }
  0xa3   : > { %361 = sbr.rel (%p10481_p12) target bundleno = 744 (0x2e8), region = 72  ;;  %v8163_v1 = vld [vmem:[#allocation3 + $0x384] ss:$28 sps:$4 sm:$0xff] (!%p10481_p12)   ;;  %2587 = vmatprep.subr.bf16.mxu1 (!%p10481_p12), %v8161_v0  ;;  %v8169_v5 = vld [vmem:[#allocation3 + $0x3bc] ss:$28 sps:$4 sm:$0xff] (!%p10481_p12)   ;;  %v363_v48 = vld [vmem:[%s10442_s0 + $0x8] sm:$0xff] (!%p10481_p12) }
  0xa4   : > { %v8165_v2 = vld [vmem:[#allocation3] ss:$28 sps:$4 sm:$0xff] (!%p10481_p12)   ;;  %2628 = vmatprep.subr.bf16.mxu0 (!%p10481_p12), %v8163_v1  ;;  %v8171_v6 = vld [vmem:[#allocation3 + $0x38] ss:$28 sps:$4 sm:$0xff] (!%p10481_p12)   ;;  %v8177_v10 = vld [vmem:[#allocation3 + $0x70] ss:$28 sps:$4 sm:$0xff] (!%p10481_p12)   ;;  %v9749_v51 = vcombine.high (!%p10481_p12), %v363_v48, %v363_v48 }
  0xa5   : > { %v8166_v3 = vld [vmem:[#allocation3 + $0x380] ss:$28 sps:$4 sm:$0xff] (!%p10481_p12)   ;;  %2588 = vmatpush1.bf16.msra.mxu1 (!%p10481_p12), %v8165_v2  ;;  %v8172_v7 = vld [vmem:[#allocation3 + $0x3b8] ss:$28 sps:$4 sm:$0xff] (!%p10481_p12)   ;;  %v8178_v11 = vld [vmem:[#allocation3 + $0x3f0] ss:$28 sps:$4 sm:$0xff] (!%p10481_p12)  }
  0xa6   : > { %2629 = vmatpush1.bf16.msra.mxu0 (!%p10481_p12), %v8166_v3  ;;  %2589 = vmatprep.subr.bf16.mxu1 (!%p10481_p12), %v8167_v4  ;;  %v8173_v8 = vld [vmem:[#allocation3 + $0x74] ss:$28 sps:$4 sm:$0xff] (!%p10481_p12)   ;;  %v8179_v12 = vld [vmem:[#allocation3 + $0xac] ss:$28 sps:$4 sm:$0xff] (!%p10481_p12)   ;;  %v8185_v16 = vld [vmem:[#allocation3 + $0xe4] ss:$28 sps:$4 sm:$0xff] (!%p10481_p12)  }
  0xa7   : > { %2630 = vmatprep.subr.bf16.mxu0 (!%p10481_p12), %v8169_v5  ;;  %v8175_v9 = vld [vmem:[#allocation3 + $0x3f4] ss:$28 sps:$4 sm:$0xff] (!%p10481_p12)   ;;  %v8181_v13 = vld [vmem:[#allocation3 + $0x42c] ss:$28 sps:$4 sm:$0xff] (!%p10481_p12)   ;;  %v8187_v17 = vld [vmem:[#allocation3 + $0x464] ss:$28 sps:$4 sm:$0xff] (!%p10481_p12)   ;;  %2660 = vmatprep.mubr.bf16.mxu0 (!%p10481_p12), %v9749_v51 }
  0xa8   : > { %v8183_v14 = vld [vmem:[#allocation3 + $0xa8] ss:$28 sps:$4 sm:$0xff] (!%p10481_p12)   ;;  %v8189_v18 = vld [vmem:[#allocation3 + $0xe0] ss:$28 sps:$4 sm:$0xff] (!%p10481_p12)   ;;  %v8195_v22 = vld [vmem:[#allocation3 + $0x118] ss:$28 sps:$4 sm:$0xff] (!%p10481_p12)  }
  0xa9   : > { %2590 = vmatpush1.bf16.msra.mxu1 (!%p10481_p12), %v8171_v6  ;;  %v8184_v15 = vld [vmem:[#allocation3 + $0x428] ss:$28 sps:$4 sm:$0xff] (!%p10481_p12)   ;;  %v8190_v19 = vld [vmem:[#allocation3 + $0x460] ss:$28 sps:$4 sm:$0xff] (!%p10481_p12)   ;;  %v8196_v23 = vld [vmem:[#allocation3 + $0x498] ss:$28 sps:$4 sm:$0xff] (!%p10481_p12)  }
  0xaa   : > { %2631 = vmatpush1.bf16.msra.mxu0 %v8172_v7  ;;  %2591 = vmatprep.subr.bf16.mxu1 %v8173_v8  ;;  %v8191_v20 = vld [vmem:[#allocation3 + $0x11c] ss:$28 sps:$4 sm:$0xff]   ;;  %v8197_v24 = vld [vmem:[#allocation3 + $0x154] ss:$28 sps:$4 sm:$0xff]   ;;  %v8203_v28 = vld [vmem:[#allocation3 + $0x18c] ss:$28 sps:$4 sm:$0xff]   ;;  %v9755_v7 = vcombine.low %v363_v48, %v363_v48 }
  0xab   : > { %2632 = vmatprep.subr.bf16.mxu0 %v8175_v9  ;;  %v8193_v21 = vld [vmem:[#allocation3 + $0x49c] ss:$28 sps:$4 sm:$0xff]   ;;  %v8199_v25 = vld [vmem:[#allocation3 + $0x4d4] ss:$28 sps:$4 sm:$0xff]   ;;  %v8205_v29 = vld [vmem:[#allocation3 + $0x50c] ss:$28 sps:$4 sm:$0xff]  }
  0xac   : > { %v8201_v26 = vld [vmem:[#allocation3 + $0x150] ss:$28 sps:$4 sm:$0xff]   ;;  %v8207_v30 = vld [vmem:[#allocation3 + $0x188] ss:$28 sps:$4 sm:$0xff]   ;;  %v8213_v34 = vld [vmem:[#allocation3 + $0x1c0] ss:$28 sps:$4 sm:$0xff]  }
  0xad   : > { %2592 = vmatpush1.bf16.msra.mxu1 %v8177_v10  ;;  %v8202_v27 = vld [vmem:[#allocation3 + $0x4d0] ss:$28 sps:$4 sm:$0xff]   ;;  %v8208_v31 = vld [vmem:[#allocation3 + $0x508] ss:$28 sps:$4 sm:$0xff]   ;;  %v8214_v35 = vld [vmem:[#allocation3 + $0x540] ss:$28 sps:$4 sm:$0xff]  }
  0xae   : > { %2633 = vmatpush1.bf16.msra.mxu0 %v8178_v11  ;;  %2593 = vmatprep.subr.bf16.mxu1 %v8179_v12  ;;  %v8209_v32 = vld [vmem:[#allocation3 + $0x1c4] ss:$28 sps:$4 sm:$0xff]   ;;  %v8215_v36 = vld [vmem:[#allocation3 + $0x1fc] ss:$28 sps:$4 sm:$0xff]   ;;  %v8221_v40 = vld [vmem:[#allocation3 + $0x234] ss:$28 sps:$4 sm:$0xff]  }
  0xaf   : > { %2634 = vmatprep.subr.bf16.mxu0 %v8181_v13  ;;  %v8211_v33 = vld [vmem:[#allocation3 + $0x544] ss:$28 sps:$4 sm:$0xff]   ;;  %v8217_v37 = vld [vmem:[#allocation3 + $0x57c] ss:$28 sps:$4 sm:$0xff]   ;;  %v8223_v41 = vld [vmem:[#allocation3 + $0x5b4] ss:$28 sps:$4 sm:$0xff]  }
  0xb0   : > { %v8219_v38 = vld [vmem:[#allocation3 + $0x1f8] ss:$28 sps:$4 sm:$0xff]   ;;  %v8225_v42 = vld [vmem:[#allocation3 + $0x230] ss:$28 sps:$4 sm:$0xff]   ;;  %v362_v46 = vld [vmem:[%s10442_s0] sm:$0xff]  ;;  %vm2583_vm0 = vcmask 130048  }
  0xb1   : > { %2594 = vmatpush1.bf16.msra.mxu1 %v8183_v14  ;;  %v8220_v39 = vld [vmem:[#allocation3 + $0x578] ss:$28 sps:$4 sm:$0xff]   ;;  %v8226_v43 = vld [vmem:[#allocation3 + $0x5b0] ss:$28 sps:$4 sm:$0xff]   ;;  %v9744_v47 = vcombine.high %v362_v46, %v362_v46  ;;  %v8231_v49 = vld [vmem:[#allocation3 + $0x268] ss:$28 sps:$4 sm:$0xff]   ;;  %v9753_v6 = vcombine.low %v362_v46, %v362_v46 }
  0xb2   : > { %2635 = vmatpush1.bf16.msra.mxu0 %v8184_v15  ;;  %2595 = vmatprep.subr.bf16.mxu1 %v8185_v16  ;;  %v8227_v44 = vld [vmem:[#allocation3 + $0x26c] ss:$28 sps:$4 sm:$0xff]   ;;  %v8233_v52 = vld [vmem:[#allocation3 + $0x2a4] ss:$28 sps:$4 sm:$0xff]   ;;  %v8239_v56 = vld [vmem:[#allocation3 + $0x2dc] ss:$28 sps:$4 sm:$0xff]  }
  0xb3   : > { %2636 = vmatprep.subr.bf16.mxu0 %v8187_v17  ;;  %v8229_v45 = vld [vmem:[#allocation3 + $0x5ec] ss:$28 sps:$4 sm:$0xff]   ;;  %v8235_v53 = vld [vmem:[#allocation3 + $0x624] ss:$28 sps:$4 sm:$0xff]   ;;  %2619 = vmatprep.mubr.bf16.mxu1 %v9744_v47  ;;  %v8241_v57 = vld [vmem:[#allocation3 + $0x65c] ss:$28 sps:$4 sm:$0xff]  }
  0xb4   : > { %v8232_v50 = vld [vmem:[#allocation3 + $0x5e8] ss:$28 sps:$4 sm:$0xff]   ;;  %v8237_v54 = vld [vmem:[#allocation3 + $0x2a0] ss:$28 sps:$4 sm:$0xff]   ;;  %v8243_v58 = vld [vmem:[#allocation3 + $0x2d8] ss:$28 sps:$4 sm:$0xff]  }
  0xb5   : > { %2596 = vmatpush1.bf16.msra.mxu1 %v8189_v18  ;;  %v8238_v55 = vld [vmem:[#allocation3 + $0x620] ss:$28 sps:$4 sm:$0xff]   ;;  %v8244_v59 = vld [vmem:[#allocation3 + $0x658] ss:$28 sps:$4 sm:$0xff]   ;;  %v8249_v62 = vld [vmem:[#allocation3 + $0x310] ss:$28 sps:$4 sm:$0xff]  }
  0xb6   : > { %2637 = vmatpush1.bf16.msra.mxu0 %v8190_v19  ;;  %2597 = vmatprep.subr.bf16.mxu1 %v8191_v20  ;;  %v8245_v60 = vld [vmem:[#allocation3 + $0x314] ss:$28 sps:$4 sm:$0xff]   ;;  %v8251_v0 = vld [vmem:[#allocation3 + $0x34c] ss:$28 sps:$4 sm:$0xff]   ;;  %v8261_v4 = vld [vmem:[#allocation3 + $0x704] ss:$28 sps:$4 sm:$0xff]  }
  0xb7   : > { %2638 = vmatprep.subr.bf16.mxu0 %v8193_v21  ;;  %v8247_v61 = vld [vmem:[#allocation3 + $0x694] ss:$28 sps:$4 sm:$0xff]   ;;  %v8253_v1 = vld [vmem:[#allocation3 + $0x6cc] ss:$28 sps:$4 sm:$0xff]   ;;  %v8259_v8 = vld [vmem:[#allocation3 + $0x700] ss:$28 sps:$4 sm:$0xff]  }
  0xb8   : > { %v8250_v63 = vld [vmem:[#allocation3 + $0x690] ss:$28 sps:$4 sm:$0xff]   ;;  %v8255_v2 = vld [vmem:[#allocation3 + $0x348] ss:$28 sps:$4 sm:$0xff]   ;;  %v8269_v10 = vld [vmem:[#allocation3 + $0x73c] ss:$28 sps:$4 sm:$0xff]  }
  0xb9   : > { %2598 = vmatpush1.bf16.msra.mxu1 %v8195_v22  ;;  %v8256_v3 = vld [vmem:[#allocation3 + $0x6c8] ss:$28 sps:$4 sm:$0xff]   ;;  %v8267_v12 = vld [vmem:[#allocation3 + $0x738] ss:$28 sps:$4 sm:$0xff]   ;;  %v8270_v13 = vld [vmem:[#allocation3 + $0x40] ss:$28 sps:$4 sm:$0xff]  }
  0xba   : > { %2639 = vmatpush1.bf16.msra.mxu0 %v8196_v23  ;;  %2599 = vmatprep.subr.bf16.mxu1 %v8197_v24  ;;  %v8264_v5 = vld [vmem:[#allocation3 + $0xc] ss:$28 sps:$4 sm:$0xff]   ;;  %v8272_v11 = vld [vmem:[#allocation3 + $0x44] ss:$28 sps:$4 sm:$0xff]   ;;  %v8275_v14 = vld [vmem:[#allocation3 + $0x774] ss:$28 sps:$4 sm:$0xff]  }
  0xbb   : > { %2640 = vmatprep.subr.bf16.mxu0 %v8199_v25  ;;  %v8262_v9 = vld [vmem:[#allocation3 + $0x8] ss:$28 sps:$4 sm:$0xff]   ;;  %v8278_v15 = vld [vmem:[#allocation3 + $0x7c] ss:$28 sps:$4 sm:$0xff]   ;;  %v8273_v16 = vld [vmem:[#allocation3 + $0x770] ss:$28 sps:$4 sm:$0xff]  }
  0xbc   : > { %v8276_v17 = vld [vmem:[#allocation3 + $0x78] ss:$28 sps:$4 sm:$0xff]   ;;  %v8281_v18 = vld [vmem:[#allocation3 + $0x7ac] ss:$28 sps:$4 sm:$0xff]   ;;  %v8287_v22 = vld [vmem:[#allocation3 + $0x7e4] ss:$28 sps:$4 sm:$0xff]  }
  0xbd   : > { %2600 = vmatpush1.bf16.msra.mxu1 %v8201_v26  ;;  %v8284_v19 = vld [vmem:[#allocation3 + $0xb4] ss:$28 sps:$4 sm:$0xff]   ;;  %v8279_v20 = vld [vmem:[#allocation3 + $0x7a8] ss:$28 sps:$4 sm:$0xff]   ;;  %v8285_v24 = vld [vmem:[#allocation3 + $0x7e0] ss:$28 sps:$4 sm:$0xff]  }
  0xbe   : > { %2641 = vmatpush1.bf16.msra.mxu0 %v8202_v27  ;;  %2601 = vmatprep.subr.bf16.mxu1 %v8203_v28  ;;  %v8282_v21 = vld [vmem:[#allocation3 + $0xb0] ss:$28 sps:$4 sm:$0xff]   ;;  %v8288_v25 = vld [vmem:[#allocation3 + $0xe8] ss:$28 sps:$4 sm:$0xff]   ;;  %v8293_v26 = vld [vmem:[#allocation3 + $0x81c] ss:$28 sps:$4 sm:$0xff]  }
  0xbf   : > { %2642 = vmatprep.subr.bf16.mxu0 %v8205_v29  ;;  %v8290_v23 = vld [vmem:[#allocation3 + $0xec] ss:$28 sps:$4 sm:$0xff]   ;;  %v8296_v27 = vld [vmem:[#allocation3 + $0x124] ss:$28 sps:$4 sm:$0xff]   ;;  %v8291_v28 = vld [vmem:[#allocation3 + $0x818] ss:$28 sps:$4 sm:$0xff]  }
  0xc0   : > { %v8294_v29 = vld [vmem:[#allocation3 + $0x120] ss:$28 sps:$4 sm:$0xff]   ;;  %v8315_v46 = vld [vmem:[#allocation3 + $0x8f8] ss:$28 sps:$4 sm:$0xff]   ;;  %vm9455_vm1 = vmmov 0   ;;  %vm3278_vm2 = vcmask 257024  }
  0xc1   : > { %2602 = vmatpush1.bf16.msra.mxu1 %v8207_v30  ;;  %v8299_v30 = vld [vmem:[#allocation3 + $0x854] ss:$28 sps:$4 sm:$0xff]   ;;  %v8318_v48 = vld [vmem:[#allocation3 + $0x200] ss:$28 sps:$4 sm:$0xff]  }
  0xc2   : > { %2643 = vmatpush1.bf16.msra.mxu0 %v8208_v31  ;;  %2603 = vmatprep.subr.bf16.mxu1 %v8209_v32  ;;  %v8302_v31 = vld [vmem:[#allocation3 + $0x15c] ss:$28 sps:$4 sm:$0xff]  }
  0xc3   : > { %2644 = vmatprep.subr.bf16.mxu0 %v8211_v33  ;;  %v9763_v32 = vld [vmem:[%s10442_s0 + $0x10] sm:$0xff]  ;;  %v8297_v33 = vld [vmem:[#allocation3 + $0x850] ss:$28 sps:$4 sm:$0xff]  }
  0xc5   : > { %2604 = vmatpush1.bf16.msra.mxu1 %v8213_v34  ;;  %v9767_v34 = vcombine.high %v9763_v32, %v9763_v32 }
  0xc6   : > { %2645 = vmatpush1.bf16.msra.mxu0 %v8214_v35  ;;  %2605 = vmatprep.subr.bf16.mxu1 %v8215_v36  ;;  %v8300_v35 = vld [vmem:[#allocation3 + $0x158] ss:$28 sps:$4 sm:$0xff]   ;;  %v8305_v36 = vld [vmem:[#allocation3 + $0x88c] ss:$28 sps:$4 sm:$0xff]  }
  0xc7   : > { %2646 = vmatprep.subr.bf16.mxu0 %v8217_v37  ;;  %v8308_v37 = vld [vmem:[#allocation3 + $0x194] ss:$28 sps:$4 sm:$0xff]  }
  0xc9   : > { %2606 = vmatpush1.bf16.msra.mxu1 %v8219_v38  ;;  %v8303_v38 = vld [vmem:[#allocation3 + $0x888] ss:$28 sps:$4 sm:$0xff]  }
  0xca   : > { %2647 = vmatpush1.bf16.msra.mxu0 %v8220_v39  ;;  %2607 = vmatprep.subr.bf16.mxu1 %v8221_v40  ;;  %v8306_v39 = vld [vmem:[#allocation3 + $0x190] ss:$28 sps:$4 sm:$0xff]   ;;  %v8311_v40 = vld [vmem:[#allocation3 + $0x8c4] ss:$28 sps:$4 sm:$0xff]  }
  0xcb   : > { %2648 = vmatprep.subr.bf16.mxu0 %v8223_v41  ;;  %v8314_v41 = vld [vmem:[#allocation3 + $0x1cc] ss:$28 sps:$4 sm:$0xff]  }
  0xcd   : > { %2608 = vmatpush1.bf16.msra.mxu1 %v8225_v42  ;;  %v8309_v42 = vld [vmem:[#allocation3 + $0x8c0] ss:$28 sps:$4 sm:$0xff]  }
  0xce   : > { %2649 = vmatpush1.bf16.msra.mxu0 %v8226_v43  ;;  %2609 = vmatprep.subr.bf16.mxu1 %v8227_v44  ;;  %v8312_v43 = vld [vmem:[#allocation3 + $0x1c8] ss:$28 sps:$4 sm:$0xff]   ;;  %v8317_v44 = vld [vmem:[#allocation3 + $0x8fc] ss:$28 sps:$4 sm:$0xff]  }
  0xcf   : > { %2650 = vmatprep.subr.bf16.mxu0 %v8229_v45  ;;  %v8320_v45 = vld [vmem:[#allocation3 + $0x204] ss:$28 sps:$4 sm:$0xff]  }
  0xd1   : > { %2610 = vmatpush1.bf16.msra.mxu1 %v8231_v49  ;;  %v8323_v49 = vld [vmem:[#allocation3 + $0x934] ss:$28 sps:$4 sm:$0xff]  }
  0xd2   : > { %2651 = vmatpush1.bf16.msra.mxu0 %v8232_v50  ;;  %2611 = vmatprep.subr.bf16.mxu1 %v8233_v52  ;;  %v8326_v50 = vld [vmem:[#allocation3 + $0x23c] ss:$28 sps:$4 sm:$0xff]   ;;  %v8321_v52 = vld [vmem:[#allocation3 + $0x930] ss:$28 sps:$4 sm:$0xff]  }
  0xd3   : > { %2652 = vmatprep.subr.bf16.mxu0 %v8235_v53  ;;  %v8324_v53 = vld [vmem:[#allocation3 + $0x238] ss:$28 sps:$4 sm:$0xff]  }
  0xd5   : > { %2612 = vmatpush1.bf16.msra.mxu1 %v8237_v54  ;;  %v8329_v54 = vld [vmem:[#allocation3 + $0x96c] ss:$28 sps:$4 sm:$0xff]  }
  0xd6   : > { %2653 = vmatpush1.bf16.msra.mxu0 %v8238_v55  ;;  %2613 = vmatprep.subr.bf16.mxu1 %v8239_v56  ;;  %v8332_v55 = vld [vmem:[#allocation3 + $0x274] ss:$28 sps:$4 sm:$0xff]   ;;  %v8327_v56 = vld [vmem:[#allocation3 + $0x968] ss:$28 sps:$4 sm:$0xff]  }
  0xd7   : > { %2654 = vmatprep.subr.bf16.mxu0 %v8241_v57  ;;  %v8330_v57 = vld [vmem:[#allocation3 + $0x270] ss:$28 sps:$4 sm:$0xff]  }
  0xd9   : > { %2614 = vmatpush1.bf16.msra.mxu1 %v8243_v58  ;;  %v8335_v58 = vld [vmem:[#allocation3 + $0x9a4] ss:$28 sps:$4 sm:$0xff]  }
  0xda   : > { %2655 = vmatpush1.bf16.msra.mxu0 %v8244_v59  ;;  %2615 = vmatprep.subr.bf16.mxu1 %v8245_v60  ;;  %v8338_v59 = vld [vmem:[#allocation3 + $0x2ac] ss:$28 sps:$4 sm:$0xff]   ;;  %v8333_v60 = vld [vmem:[#allocation3 + $0x9a0] ss:$28 sps:$4 sm:$0xff]  }
  0xdb   : > { %2656 = vmatprep.subr.bf16.mxu0 %v8247_v61  ;;  %v8336_v61 = vld [vmem:[#allocation3 + $0x2a8] ss:$28 sps:$4 sm:$0xff]  }
  0xdd   : > { %2616 = vmatpush1.bf16.msra.mxu1 %v8249_v62  ;;  %v8341_v62 = vld [vmem:[#allocation3 + $0x9dc] ss:$28 sps:$4 sm:$0xff]  }
  0xde   : > { %2657 = vmatpush1.bf16.msra.mxu0 %v8250_v63  ;;  %2617 = vmatprep.subr.bf16.mxu1 %v8251_v0  ;;  %v8344_v63 = vld [vmem:[#allocation3 + $0x2e4] ss:$28 sps:$4 sm:$0xff]   ;;  %v8339_v0 = vld [vmem:[#allocation3 + $0x9d8] ss:$28 sps:$4 sm:$0xff]  }
  0xdf   : > { %2658 = vmatprep.subr.bf16.mxu0 %v8253_v1  ;;  %v8342_v1 = vld [vmem:[#allocation3 + $0x2e0] ss:$28 sps:$4 sm:$0xff]  }
  0xe1   : > { %2618 = vmatpush1.bf16.msra.mxu1 %v8255_v2  ;;  %v8347_v2 = vld [vmem:[#allocation3 + $0xa14] ss:$28 sps:$4 sm:$0xff]  }
  0xe2   : > { %2659 = vmatpush1.bf16.msra.mxu0 %v8256_v3  ;;  %2751 = vmatprep.subr.bf16.mxu1 %v8264_v5  ;;  %v8350_v3 = vld [vmem:[#allocation3 + $0x31c] ss:$28 sps:$4 sm:$0xff]  }
  0xe3   : > { %2669 = vmatprep.subr.bf16.mxu0 %v8261_v4  ;;  %v8345_v4 = vld [vmem:[#allocation3 + $0xa10] ss:$28 sps:$4 sm:$0xff]   ;;  %v8348_v5 = vld [vmem:[#allocation3 + $0x318] ss:$28 sps:$4 sm:$0xff]  }
  0xe4   : > { %2620 = vmatmul.mubr.bf16.vlgmr.msra.gmra.mrb[0].mxu1 %v9753_v6 }
  0xe5   : > { %2661 = vmatmul.mubr.bf16.vlgmr.msra.gmra.mrb[0].mxu0 %v9755_v7  ;;  %2752 = vmatpush1.bf16.msra.mxu1 %v8262_v9  ;;  %v8356_v9 = vld [vmem:[#allocation3 + $0x354] ss:$28 sps:$4 sm:$0xff]  }
  0xe6   : > { %2670 = vmatpush1.bf16.msra.mxu0 %v8259_v8  ;;  %2753 = vmatprep.subr.bf16.mxu1 %v8272_v11  ;;  %v8353_v8 = vld [vmem:[#allocation3 + $0xa4c] ss:$28 sps:$4 sm:$0xff]  }
  0xe7   : > { %2671 = vmatprep.subr.bf16.mxu0 %v8269_v10  ;;  %2783 = vmatprep.mubr.bf16.mxu1 %v9744_v47  ;;  %v8351_v10 = vld [vmem:[#allocation3 + $0xa48] ss:$28 sps:$4 sm:$0xff]   ;;  %v8354_v11 = vld [vmem:[#allocation3 + $0x350] ss:$28 sps:$4 sm:$0xff]  }
  0xe8   : > { %2701 = vmatprep.mubr.bf16.mxu0 %v9767_v34 }
  0xe9   : > { %2754 = vmatpush1.bf16.msra.mxu1 %v8270_v13  ;;  %v8364_v13 = vld [vmem:[#allocation3 + $0x38c] ss:$28 sps:$4 sm:$0xff]  }
  0xea   : > { %2672 = vmatpush1.bf16.msra.mxu0 %v8267_v12  ;;  %2755 = vmatprep.subr.bf16.mxu1 %v8278_v15  ;;  %v8361_v12 = vld [vmem:[#allocation3 + $0xa84] ss:$28 sps:$4 sm:$0xff]  }
  0xeb   : > { %2673 = vmatprep.subr.bf16.mxu0 %v8275_v14  ;;  %v9772_v14 = vcombine.low %v9763_v32, %v9763_v32  ;;  %v8359_v15 = vld [vmem:[#allocation3 + $0xa80] ss:$28 sps:$4 sm:$0xff]  }
  0xec   : > { %v8384_v32 = vld [vmem:[#allocation3 + $0x4a0] ss:$28 sps:$4 sm:$0xff]  }
  0xed   : > { %2756 = vmatpush1.bf16.msra.mxu1 %v8276_v17  ;;  %v8367_v17 = vld [vmem:[#allocation3 + $0x3c4] ss:$28 sps:$4 sm:$0xff]  }
  0xee   : > { %2674 = vmatpush1.bf16.msra.mxu0 %v8273_v16  ;;  %2757 = vmatprep.subr.bf16.mxu1 %v8284_v19  ;;  %v8362_v16 = vld [vmem:[#allocation3 + $0x388] ss:$28 sps:$4 sm:$0xff]   ;;  %v8365_v19 = vld [vmem:[#allocation3 + $0x3c0] ss:$28 sps:$4 sm:$0xff]  }
  0xef   : > { %2675 = vmatprep.subr.bf16.mxu0 %v8281_v18  ;;  %v8377_v18 = vld [vmem:[#allocation3 + $0xa8c] ss:$28 sps:$4 sm:$0xff]  }
  0xf1   : > { %2758 = vmatpush1.bf16.msra.mxu1 %v8282_v21  ;;  %v9453_v21 = vmov 0  }
  0xf2   : > { %2676 = vmatpush1.bf16.msra.mxu0 %v8279_v20  ;;  %2759 = vmatprep.subr.bf16.mxu1 %v8290_v23  ;;  %v8370_v20 = vld [vmem:[#allocation3 + $0x3fc] ss:$28 sps:$4 sm:$0xff]   ;;  %v8374_v23 = vld [vmem:[#allocation3 + $0x434] ss:$28 sps:$4 sm:$0xff]  }
  0xf3   : > { %2677 = vmatprep.subr.bf16.mxu0 %v8287_v22  ;;  %v8368_v22 = vld [vmem:[#allocation3 + $0x3f8] ss:$28 sps:$4 sm:$0xff]  }
  0xf5   : > { %2760 = vmatpush1.bf16.msra.mxu1 %v8288_v25  ;;  %v8372_v25 = vld [vmem:[#allocation3 + $0x430] ss:$28 sps:$4 sm:$0xff]  }
  0xf6   : > { %2678 = vmatpush1.bf16.msra.mxu0 %v8285_v24  ;;  %2761 = vmatprep.subr.bf16.mxu1 %v8296_v27  ;;  %v8371_v24 = vld [vmem:[%s10442_s0 + $0x18] ss:$0 sps:$4 sm:$0xff]   ;;  %v8380_v27 = vld [vmem:[#allocation3 + $0x46c] ss:$28 sps:$4 sm:$0xff]  }
  0xf7   : > { %2679 = vmatprep.subr.bf16.mxu0 %v8293_v26  ;;  %v8375_v26 = vld [vmem:[#allocation3 + $0xa88] ss:$28 sps:$4 sm:$0xff]  }
  0xf9   : > { %2762 = vmatpush1.bf16.msra.mxu1 %v8294_v29  ;;  %v8378_v29 = vld [vmem:[#allocation3 + $0x468] ss:$28 sps:$4 sm:$0xff]  }
  0xfa   : > { %2680 = vmatpush1.bf16.msra.mxu0 %v8291_v28  ;;  %2763 = vmatprep.subr.bf16.mxu1 %v8302_v31  ;;  %v8383_v28 = vld [vmem:[#allocation3 + $0x14] ss:$28 sps:$4 sm:$0xff]  }
  0xfb   : > { %2681 = vmatprep.subr.bf16.mxu0 %v8299_v30  ;;  %v8386_v30 = vld [vmem:[#allocation3 + $0x4a4] ss:$28 sps:$4 sm:$0xff]   ;;  %v8381_v31 = vld [vmem:[#allocation3 + $0x10] ss:$28 sps:$4 sm:$0xff]  }
  0xfd   : > { %2764 = vmatpush1.bf16.msra.mxu1 %v8300_v35  ;;  %v8392_v35 = vld [vmem:[#allocation3 + $0x4dc] ss:$28 sps:$4 sm:$0xff]  }
  0xfe   : > { %2682 = vmatpush1.bf16.msra.mxu0 %v8297_v33  ;;  %2765 = vmatprep.subr.bf16.mxu1 %v8308_v37  ;;  %v8389_v33 = vld [vmem:[#allocation3 + $0x4c] ss:$28 sps:$4 sm:$0xff]   ;;  %v8390_v37 = vld [vmem:[#allocation3 + $0x4d8] ss:$28 sps:$4 sm:$0xff]  }
  0xff   : > { %2683 = vmatprep.subr.bf16.mxu0 %v8305_v36  ;;  %v8387_v36 = vld [vmem:[#allocation3 + $0x48] ss:$28 sps:$4 sm:$0xff]  }
 0x101   : > { %2766 = vmatpush1.bf16.msra.mxu1 %v8306_v39  ;;  %v8398_v39 = vld [vmem:[#allocation3 + $0x514] ss:$28 sps:$4 sm:$0xff]  }
 0x102   : > { %2684 = vmatpush1.bf16.msra.mxu0 %v8303_v38  ;;  %2767 = vmatprep.subr.bf16.mxu1 %v8314_v41  ;;  %v8395_v38 = vld [vmem:[#allocation3 + $0x84] ss:$28 sps:$4 sm:$0xff]   ;;  %v8396_v41 = vld [vmem:[#allocation3 + $0x510] ss:$28 sps:$4 sm:$0xff]  }
 0x103   : > { %2685 = vmatprep.subr.bf16.mxu0 %v8311_v40  ;;  %v8393_v40 = vld [vmem:[#allocation3 + $0x80] ss:$28 sps:$4 sm:$0xff]  }
 0x105   : > { %2768 = vmatpush1.bf16.msra.mxu1 %v8312_v43  ;;  %v8404_v43 = vld [vmem:[#allocation3 + $0x54c] ss:$28 sps:$4 sm:$0xff]  }
 0x106   : > { %2686 = vmatpush1.bf16.msra.mxu0 %v8309_v42  ;;  %2769 = vmatprep.subr.bf16.mxu1 %v8320_v45  ;;  %v8401_v42 = vld [vmem:[#allocation3 + $0xbc] ss:$28 sps:$4 sm:$0xff]   ;;  %v8402_v45 = vld [vmem:[#allocation3 + $0x548] ss:$28 sps:$4 sm:$0xff]  }
 0x107   : > { %2687 = vmatprep.subr.bf16.mxu0 %v8317_v44  ;;  %v8399_v44 = vld [vmem:[#allocation3 + $0xb8] ss:$28 sps:$4 sm:$0xff]  }
 0x109   : > { %2770 = vmatpush1.bf16.msra.mxu1 %v8318_v48  ;;  %v8410_v48 = vld [vmem:[#allocation3 + $0x584] ss:$28 sps:$4 sm:$0xff]  }
 0x10a   : > { %2688 = vmatpush1.bf16.msra.mxu0 %v8315_v46  ;;  %2771 = vmatprep.subr.bf16.mxu1 %v8326_v50  ;;  %v8407_v46 = vld [vmem:[#allocation3 + $0xf4] ss:$28 sps:$4 sm:$0xff]   ;;  %v8408_v50 = vld [vmem:[#allocation3 + $0x580] ss:$28 sps:$4 sm:$0xff]  }
 0x10b   : > { %2689 = vmatprep.subr.bf16.mxu0 %v8323_v49  ;;  %v8405_v49 = vld [vmem:[#allocation3 + $0xf0] ss:$28 sps:$4 sm:$0xff]  }
 0x10d   : > { %2772 = vmatpush1.bf16.msra.mxu1 %v8324_v53  ;;  %v8416_v53 = vld [vmem:[#allocation3 + $0x5bc] ss:$28 sps:$4 sm:$0xff]  }
 0x10e   : > { %2690 = vmatpush1.bf16.msra.mxu0 %v8321_v52  ;;  %2773 = vmatprep.subr.bf16.mxu1 %v8332_v55  ;;  %v8413_v52 = vld [vmem:[#allocation3 + $0x12c] ss:$28 sps:$4 sm:$0xff]   ;;  %v8414_v55 = vld [vmem:[#allocation3 + $0x5b8] ss:$28 sps:$4 sm:$0xff]  }
 0x10f   : > { %2691 = vmatprep.subr.bf16.mxu0 %v8329_v54  ;;  %v8411_v54 = vld [vmem:[#allocation3 + $0x128] ss:$28 sps:$4 sm:$0xff]  }
 0x111   : > { %2774 = vmatpush1.bf16.msra.mxu1 %v8330_v57  ;;  %v8422_v57 = vld [vmem:[#allocation3 + $0x5f4] ss:$28 sps:$4 sm:$0xff]  }
 0x112   : > { %2692 = vmatpush1.bf16.msra.mxu0 %v8327_v56  ;;  %2775 = vmatprep.subr.bf16.mxu1 %v8338_v59  ;;  %v8419_v56 = vld [vmem:[#allocation3 + $0x164] ss:$28 sps:$4 sm:$0xff]   ;;  %v8420_v59 = vld [vmem:[#allocation3 + $0x5f0] ss:$28 sps:$4 sm:$0xff]  }
 0x113   : > { %2693 = vmatprep.subr.bf16.mxu0 %v8335_v58  ;;  %v8417_v58 = vld [vmem:[#allocation3 + $0x160] ss:$28 sps:$4 sm:$0xff]  }
 0x115   : > { %2776 = vmatpush1.bf16.msra.mxu1 %v8336_v61  ;;  %v8428_v61 = vld [vmem:[#allocation3 + $0x62c] ss:$28 sps:$4 sm:$0xff]  }
 0x116   : > { %2694 = vmatpush1.bf16.msra.mxu0 %v8333_v60  ;;  %2777 = vmatprep.subr.bf16.mxu1 %v8344_v63  ;;  %v8425_v60 = vld [vmem:[#allocation3 + $0x19c] ss:$28 sps:$4 sm:$0xff]   ;;  %v8426_v63 = vld [vmem:[#allocation3 + $0x628] ss:$28 sps:$4 sm:$0xff]  }
 0x117   : > { %2695 = vmatprep.subr.bf16.mxu0 %v8341_v62  ;;  %v8423_v62 = vld [vmem:[#allocation3 + $0x198] ss:$28 sps:$4 sm:$0xff]  }
 0x119   : > { %2778 = vmatpush1.bf16.msra.mxu1 %v8342_v1  ;;  %v8434_v1 = vld [vmem:[#allocation3 + $0x664] ss:$28 sps:$4 sm:$0xff]  }
 0x11a   : > { %2696 = vmatpush1.bf16.msra.mxu0 %v8339_v0  ;;  %2779 = vmatprep.subr.bf16.mxu1 %v8350_v3  ;;  %v8431_v0 = vld [vmem:[#allocation3 + $0x1d4] ss:$28 sps:$4 sm:$0xff]   ;;  %v8432_v3 = vld [vmem:[#allocation3 + $0x660] ss:$28 sps:$4 sm:$0xff]  }
 0x11b   : > { %2697 = vmatprep.subr.bf16.mxu0 %v8347_v2  ;;  %v8429_v2 = vld [vmem:[#allocation3 + $0x1d0] ss:$28 sps:$4 sm:$0xff]  }
 0x11d   : > { %2780 = vmatpush1.bf16.msra.mxu1 %v8348_v5  ;;  %v8440_v5 = vld [vmem:[#allocation3 + $0x69c] ss:$28 sps:$4 sm:$0xff]  }
 0x11e   : > { %2698 = vmatpush1.bf16.msra.mxu0 %v8345_v4  ;;  %2781 = vmatprep.subr.bf16.mxu1 %v8356_v9  ;;  %v8437_v4 = vld [vmem:[#allocation3 + $0x20c] ss:$28 sps:$4 sm:$0xff]   ;;  %v8438_v9 = vld [vmem:[#allocation3 + $0x698] ss:$28 sps:$4 sm:$0xff]  }
 0x11f   : > { %2699 = vmatprep.subr.bf16.mxu0 %v8353_v8  ;;  %v8435_v8 = vld [vmem:[#allocation3 + $0x208] ss:$28 sps:$4 sm:$0xff]  }
 0x121   : > { %2782 = vmatpush1.bf16.msra.mxu1 %v8354_v11  ;;  %v8446_v11 = vld [vmem:[#allocation3 + $0x6d4] ss:$28 sps:$4 sm:$0xff]  }
 0x122   : > { %2700 = vmatpush1.bf16.msra.mxu0 %v8351_v10  ;;  %2792 = vmatprep.subr.bf16.mxu1 %v8364_v13  ;;  %v8443_v10 = vld [vmem:[#allocation3 + $0x244] ss:$28 sps:$4 sm:$0xff]   ;;  %v8444_v13 = vld [vmem:[#allocation3 + $0x6d0] ss:$28 sps:$4 sm:$0xff]  }
 0x123   : > { %2710 = vmatprep.subr.bf16.mxu0 %v8361_v12  ;;  %v8441_v12 = vld [vmem:[#allocation3 + $0x240] ss:$28 sps:$4 sm:$0xff]  }
 0x124   : > { %2784 = vmatmul.mubr.bf16.vlgmr.msra.gmra.mrb[4].mxu1 %v9753_v6 }
 0x125   : > { %2702 = vmatmul.mubr.bf16.vlgmr.msra.gmra.mrb[0].mxu0 %v9772_v14  ;;  %2793 = vmatpush1.bf16.msra.mxu1 %v8362_v16  ;;  %v8452_v16 = vld [vmem:[#allocation3 + $0x70c] ss:$28 sps:$4 sm:$0xff]  }
 0x126   : > { %2711 = vmatpush1.bf16.msra.mxu0 %v8359_v15  ;;  %2794 = vmatprep.subr.bf16.mxu1 %v8367_v17  ;;  %v8449_v15 = vld [vmem:[#allocation3 + $0x27c] ss:$28 sps:$4 sm:$0xff]  }
 0x127   : > { %2742 = vmatprep.mubr.bf16.mxu0 %v9453_v21  ;;  %2874 = vmatprep.subr.bf16.mxu0 %v8377_v18  ;;  %v8447_v17 = vld [vmem:[#allocation3 + $0x278] ss:$28 sps:$4 sm:$0xff]   ;;  %v8450_v18 = vld [vmem:[#allocation3 + $0x708] ss:$28 sps:$4 sm:$0xff]  }
 0x128   : > { %2824 = vmatprep.mubr.bf16.mxu1 %v9749_v51 }
 0x129   : > { %2795 = vmatpush1.bf16.msra.mxu1 %v8365_v19  ;;  %v8455_v19 = vld [vmem:[#allocation3 + $0x2b4] ss:$28 sps:$4 sm:$0xff]  }
 0x12a   : > { %2796 = vmatprep.subr.bf16.mxu1 %v8370_v20  ;;  %v8458_v20 = vld [vmem:[#allocation3 + $0x744] ss:$28 sps:$4 sm:$0xff]  }
 0x12d   : > { %2797 = vmatpush1.bf16.msra.mxu1 %v8368_v22  ;;  %v8453_v22 = vld [vmem:[#allocation3 + $0x2b0] ss:$28 sps:$4 sm:$0xff]  }
 0x12e   : > { %2798 = vmatprep.subr.bf16.mxu1 %v8374_v23  ;;  %v8456_v23 = vld [vmem:[#allocation3 + $0x740] ss:$28 sps:$4 sm:$0xff]  }
 0x131   : > { %7314 = vmatmul.mubr.msk.bf16.vlgmr.msra.gmra.mrb[0].mxu0 %vm2583_vm0, %v8371_v24  ;;  %2799 = vmatpush1.bf16.msra.mxu1 %v8372_v25  ;;  %v8464_v25 = vld [vmem:[#allocation3 + $0x77c] ss:$28 sps:$4 sm:$0xff]  }
 0x132   : > { %2875 = vmatpush1.bf16.msra.mxu0 %v8375_v26  ;;  %2800 = vmatprep.subr.bf16.mxu1 %v8380_v27  ;;  %v8459_v26 = vld [vmem:[#allocation3 + $0x2e8] ss:$28 sps:$4 sm:$0xff]   ;;  %v8462_v27 = vld [vmem:[#allocation3 + $0x778] ss:$28 sps:$4 sm:$0xff]  }
 0x133   : > { %2906 = vmatprep.mubr.bf16.mxu0 %v9453_v21  ;;  %2915 = vmatprep.subr.bf16.mxu0 %v8383_v28  ;;  %v8467_v28 = vld [vmem:[#allocation3 + $0x324] ss:$28 sps:$4 sm:$0xff]  }
 0x135   : > { %2801 = vmatpush1.bf16.msra.mxu1 %v8378_v29  ;;  %v8470_v29 = vld [vmem:[#allocation3 + $0x7b4] ss:$28 sps:$4 sm:$0xff]  }
 0x136   : > { %2802 = vmatprep.subr.bf16.mxu1 %v8386_v30  ;;  %v8465_v30 = vld [vmem:[#allocation3 + $0x320] ss:$28 sps:$4 sm:$0xff]  }
 0x139   : > { %7315 = vmatmul.mubr.msk.bf16.vlgmr.msra.gmra.mrb[4].mxu0 %vm2583_vm0, %v8371_v24  ;;  %2803 = vmatpush1.bf16.msra.mxu1 %v8384_v32  ;;  %v8461_v24 = vld [vmem:[#allocation3 + $0x2ec] ss:$28 sps:$4 sm:$0xff]   ;;  %v8473_v32 = vld [vmem:[#allocation3 + $0x35c] ss:$28 sps:$4 sm:$0xff]  }
 0x13a   : > { %2916 = vmatpush1.bf16.msra.mxu0 %v8381_v31  ;;  %2804 = vmatprep.subr.bf16.mxu1 %v8392_v35  ;;  %v8468_v31 = vld [vmem:[#allocation3 + $0x7b0] ss:$28 sps:$4 sm:$0xff]   ;;  %v8471_v35 = vld [vmem:[#allocation3 + $0x358] ss:$28 sps:$4 sm:$0xff]  }
 0x13b   : > { %2917 = vmatprep.subr.bf16.mxu0 %v8389_v33  ;;  %2947 = vmatprep.mubr.bf16.mxu0 %v9744_v47  ;;  %v8476_v33 = vld [vmem:[#allocation3 + $0x7ec] ss:$28 sps:$4 sm:$0xff]  }
 0x13d   : > { %2805 = vmatpush1.bf16.msra.mxu1 %v8390_v37  ;;  %v8479_v37 = vld [vmem:[#allocation3 + $0x394] ss:$28 sps:$4 sm:$0xff]  }
 0x13e   : > { %2918 = vmatpush1.bf16.msra.mxu0 %v8387_v36  ;;  %2806 = vmatprep.subr.bf16.mxu1 %v8398_v39  ;;  %v8474_v36 = vld [vmem:[#allocation3 + $0x7e8] ss:$28 sps:$4 sm:$0xff]   ;;  %v8477_v39 = vld [vmem:[#allocation3 + $0x390] ss:$28 sps:$4 sm:$0xff]  }
 0x13f   : > { %2919 = vmatprep.subr.bf16.mxu0 %v8395_v38  ;;  %v8482_v38 = vld [vmem:[#allocation3 + $0x824] ss:$28 sps:$4 sm:$0xff]  }
 0x141   : > { %2807 = vmatpush1.bf16.msra.mxu1 %v8396_v41  ;;  %v8485_v41 = vld [vmem:[#allocation3 + $0x3cc] ss:$28 sps:$4 sm:$0xff]  }
 0x142   : > { %2920 = vmatpush1.bf16.msra.mxu0 %v8393_v40  ;;  %2808 = vmatprep.subr.bf16.mxu1 %v8404_v43  ;;  %v8480_v40 = vld [vmem:[#allocation3 + $0x820] ss:$28 sps:$4 sm:$0xff]   ;;  %v8483_v43 = vld [vmem:[#allocation3 + $0x3c8] ss:$28 sps:$4 sm:$0xff]  }
 0x143   : > { %2921 = vmatprep.subr.bf16.mxu0 %v8401_v42  ;;  %v8488_v42 = vld [vmem:[#allocation3 + $0x85c] ss:$28 sps:$4 sm:$0xff]  }
 0x145   : > { %2809 = vmatpush1.bf16.msra.mxu1 %v8402_v45  ;;  %v8491_v45 = vld [vmem:[#allocation3 + $0x404] ss:$28 sps:$4 sm:$0xff]  }
 0x146   : > { %2922 = vmatpush1.bf16.msra.mxu0 %v8399_v44  ;;  %2810 = vmatprep.subr.bf16.mxu1 %v8410_v48  ;;  %v8486_v44 = vld [vmem:[#allocation3 + $0x858] ss:$28 sps:$4 sm:$0xff]   ;;  %v8489_v48 = vld [vmem:[#allocation3 + $0x400] ss:$28 sps:$4 sm:$0xff]  }
 0x147   : > { %2923 = vmatprep.subr.bf16.mxu0 %v8407_v46  ;;  %v8494_v46 = vld [vmem:[#allocation3 + $0x894] ss:$28 sps:$4 sm:$0xff]  }
 0x149   : > { %2811 = vmatpush1.bf16.msra.mxu1 %v8408_v50  ;;  %v8497_v50 = vld [vmem:[#allocation3 + $0x43c] ss:$28 sps:$4 sm:$0xff]  }
 0x14a   : > { %2924 = vmatpush1.bf16.msra.mxu0 %v8405_v49  ;;  %2812 = vmatprep.subr.bf16.mxu1 %v8416_v53  ;;  %v8492_v49 = vld [vmem:[#allocation3 + $0x890] ss:$28 sps:$4 sm:$0xff]   ;;  %v8495_v53 = vld [vmem:[#allocation3 + $0x438] ss:$28 sps:$4 sm:$0xff]  }
 0x14b   : > { %2925 = vmatprep.subr.bf16.mxu0 %v8413_v52  ;;  %v8500_v52 = vld [vmem:[#allocation3 + $0x8cc] ss:$28 sps:$4 sm:$0xff]  }
 0x14d   : > { %2813 = vmatpush1.bf16.msra.mxu1 %v8414_v55  ;;  %v8503_v55 = vld [vmem:[#allocation3 + $0x474] ss:$28 sps:$4 sm:$0xff]  }
 0x14e   : > { %2926 = vmatpush1.bf16.msra.mxu0 %v8411_v54  ;;  %2814 = vmatprep.subr.bf16.mxu1 %v8422_v57  ;;  %v8498_v54 = vld [vmem:[#allocation3 + $0x8c8] ss:$28 sps:$4 sm:$0xff]   ;;  %v8501_v57 = vld [vmem:[#allocation3 + $0x470] ss:$28 sps:$4 sm:$0xff]  }
 0x14f   : > { %2927 = vmatprep.subr.bf16.mxu0 %v8419_v56  ;;  %v8506_v56 = vld [vmem:[#allocation3 + $0x904] ss:$28 sps:$4 sm:$0xff]  }
 0x151   : > { %2815 = vmatpush1.bf16.msra.mxu1 %v8420_v59  ;;  %v8509_v59 = vld [vmem:[#allocation3 + $0x4ac] ss:$28 sps:$4 sm:$0xff]  }
 0x152   : > { %2928 = vmatpush1.bf16.msra.mxu0 %v8417_v58  ;;  %2816 = vmatprep.subr.bf16.mxu1 %v8428_v61  ;;  %v8504_v58 = vld [vmem:[#allocation3 + $0x900] ss:$28 sps:$4 sm:$0xff]   ;;  %v8507_v61 = vld [vmem:[#allocation3 + $0x4a8] ss:$28 sps:$4 sm:$0xff]  }
 0x153   : > { %2929 = vmatprep.subr.bf16.mxu0 %v8425_v60  ;;  %v8512_v60 = vld [vmem:[#allocation3 + $0x93c] ss:$28 sps:$4 sm:$0xff]  }
 0x155   : > { %2817 = vmatpush1.bf16.msra.mxu1 %v8426_v63  ;;  %v8515_v63 = vld [vmem:[#allocation3 + $0x4e4] ss:$28 sps:$4 sm:$0xff]  }
 0x156   : > { %2930 = vmatpush1.bf16.msra.mxu0 %v8423_v62  ;;  %2818 = vmatprep.subr.bf16.mxu1 %v8434_v1  ;;  %v8510_v62 = vld [vmem:[#allocation3 + $0x938] ss:$28 sps:$4 sm:$0xff]   ;;  %v8513_v1 = vld [vmem:[#allocation3 + $0x4e0] ss:$28 sps:$4 sm:$0xff]  }
 0x157   : > { %2931 = vmatprep.subr.bf16.mxu0 %v8431_v0  ;;  %v8518_v0 = vld [vmem:[#allocation3 + $0x974] ss:$28 sps:$4 sm:$0xff]  }
 0x159   : > { %2819 = vmatpush1.bf16.msra.mxu1 %v8432_v3  ;;  %v8521_v3 = vld [vmem:[#allocation3 + $0x51c] ss:$28 sps:$4 sm:$0xff]  }
 0x15a   : > { %2932 = vmatpush1.bf16.msra.mxu0 %v8429_v2  ;;  %2820 = vmatprep.subr.bf16.mxu1 %v8440_v5  ;;  %v8516_v2 = vld [vmem:[#allocation3 + $0x970] ss:$28 sps:$4 sm:$0xff]   ;;  %v8519_v5 = vld [vmem:[#allocation3 + $0x518] ss:$28 sps:$4 sm:$0xff]  }
 0x15b   : > { %2933 = vmatprep.subr.bf16.mxu0 %v8437_v4  ;;  %v8524_v4 = vld [vmem:[#allocation3 + $0x9ac] ss:$28 sps:$4 sm:$0xff]  }
 0x15d   : > { %2821 = vmatpush1.bf16.msra.mxu1 %v8438_v9  ;;  %v8527_v9 = vld [vmem:[#allocation3 + $0x554] ss:$28 sps:$4 sm:$0xff]  }
 0x15e   : > { %2934 = vmatpush1.bf16.msra.mxu0 %v8435_v8  ;;  %2822 = vmatprep.subr.bf16.mxu1 %v8446_v11  ;;  %v8522_v8 = vld [vmem:[#allocation3 + $0x9a8] ss:$28 sps:$4 sm:$0xff]   ;;  %v8525_v11 = vld [vmem:[#allocation3 + $0x550] ss:$28 sps:$4 sm:$0xff]  }
 0x15f   : > { %2935 = vmatprep.subr.bf16.mxu0 %v8443_v10  ;;  %v8530_v10 = vld [vmem:[#allocation3 + $0x9e4] ss:$28 sps:$4 sm:$0xff]  }
 0x161   : > { %2823 = vmatpush1.bf16.msra.mxu1 %v8444_v13  ;;  %v8533_v13 = vld [vmem:[#allocation3 + $0x58c] ss:$28 sps:$4 sm:$0xff]  }
 0x162   : > { %2936 = vmatpush1.bf16.msra.mxu0 %v8441_v12  ;;  %2833 = vmatprep.subr.bf16.mxu1 %v8452_v16  ;;  %v8528_v12 = vld [vmem:[#allocation3 + $0x9e0] ss:$28 sps:$4 sm:$0xff]   ;;  %v8531_v16 = vld [vmem:[#allocation3 + $0x588] ss:$28 sps:$4 sm:$0xff]  }
 0x163   : > { %2937 = vmatprep.subr.bf16.mxu0 %v8449_v15  ;;  %v8536_v15 = vld [vmem:[#allocation3 + $0xa1c] ss:$28 sps:$4 sm:$0xff]  }
 0x164   : > { %2825 = vmatmul.mubr.bf16.vlgmr.msra.gmra.mrb[4].mxu1 %v9755_v7 }
 0x165   : > { %2834 = vmatpush1.bf16.msra.mxu1 %v8450_v18  ;;  %2865 = vmatprep.mubr.bf16.mxu1 %v9767_v34  ;;  %v8539_v18 = vld [vmem:[#allocation3 + $0x5c4] ss:$28 sps:$4 sm:$0xff]  }
 0x166   : > { %2938 = vmatpush1.bf16.msra.mxu0 %v8447_v17  ;;  %2835 = vmatprep.subr.bf16.mxu1 %v8458_v20  ;;  %v8534_v17 = vld [vmem:[#allocation3 + $0xa18] ss:$28 sps:$4 sm:$0xff]   ;;  %v8537_v20 = vld [vmem:[#allocation3 + $0x5c0] ss:$28 sps:$4 sm:$0xff]  }
 0x167   : > { %2939 = vmatprep.subr.bf16.mxu0 %v8455_v19  ;;  %v8542_v19 = vld [vmem:[#allocation3 + $0xa54] ss:$28 sps:$4 sm:$0xff]  }
 0x169   : > { %2836 = vmatpush1.bf16.msra.mxu1 %v8456_v23  ;;  %v8545_v23 = vld [vmem:[#allocation3 + $0x5fc] ss:$28 sps:$4 sm:$0xff]  }
 0x16a   : > { %2940 = vmatpush1.bf16.msra.mxu0 %v8453_v22  ;;  %2837 = vmatprep.subr.bf16.mxu1 %v8464_v25  ;;  %v8540_v22 = vld [vmem:[#allocation3 + $0xa50] ss:$28 sps:$4 sm:$0xff]   ;;  %v8543_v25 = vld [vmem:[#allocation3 + $0x5f8] ss:$28 sps:$4 sm:$0xff]  }
 0x16b   : > { %2941 = vmatprep.subr.bf16.mxu0 %v8461_v24  ;;  %v8546_v24 = vld [vmem:[#allocation3 + $0x1d8] ss:$28 sps:$4 sm:$0xff]  }
 0x16d   : > { %2838 = vmatpush1.bf16.msra.mxu1 %v8462_v27  ;;  %v8550_v27 = vld [vmem:[#allocation3 + $0x634] ss:$28 sps:$4 sm:$0xff]  }
 0x16e   : > { %2942 = vmatpush1.bf16.msra.mxu0 %v8459_v26  ;;  %2839 = vmatprep.subr.bf16.mxu1 %v8470_v29  ;;  %v8547_v26 = vld [vmem:[#allocation3 + $0x18] ss:$28 sps:$4 sm:$0xff]   ;;  %v8548_v29 = vld [vmem:[#allocation3 + $0x630] ss:$28 sps:$4 sm:$0xff]  }
 0x16f   : > { %2943 = vmatprep.subr.bf16.mxu0 %v8467_v28  ;;  %v8551_v28 = vld [vmem:[#allocation3 + $0x210] ss:$28 sps:$4 sm:$0xff]  }
 0x171   : > { %2840 = vmatpush1.bf16.msra.mxu1 %v8468_v31  ;;  %v8555_v31 = vld [vmem:[#allocation3 + $0x66c] ss:$28 sps:$4 sm:$0xff]  }
 0x172   : > { %2944 = vmatpush1.bf16.msra.mxu0 %v8465_v30  ;;  %2841 = vmatprep.subr.bf16.mxu1 %v8476_v33  ;;  %v8552_v30 = vld [vmem:[#allocation3 + $0x50] ss:$28 sps:$4 sm:$0xff]   ;;  %v8553_v33 = vld [vmem:[#allocation3 + $0x668] ss:$28 sps:$4 sm:$0xff]  }
 0x173   : > { %2945 = vmatprep.subr.bf16.mxu0 %v8473_v32  ;;  %v8556_v32 = vld [vmem:[#allocation3 + $0x248] ss:$28 sps:$4 sm:$0xff]  }
 0x175   : > { %2842 = vmatpush1.bf16.msra.mxu1 %v8474_v36  ;;  %v8560_v36 = vld [vmem:[#allocation3 + $0x6a4] ss:$28 sps:$4 sm:$0xff]  }
 0x176   : > { %2946 = vmatpush1.bf16.msra.mxu0 %v8471_v35  ;;  %2843 = vmatprep.subr.bf16.mxu1 %v8482_v38  ;;  %v8557_v35 = vld [vmem:[#allocation3 + $0x88] ss:$28 sps:$4 sm:$0xff]   ;;  %v8558_v38 = vld [vmem:[#allocation3 + $0x6a0] ss:$28 sps:$4 sm:$0xff]  }
 0x177   : > { %2956 = vmatprep.subr.bf16.mxu0 %v8479_v37  ;;  %v8561_v37 = vld [vmem:[#allocation3 + $0x280] ss:$28 sps:$4 sm:$0xff]  }
 0x179   : > { %2948 = vmatmul.mubr.bf16.vlgmr.msra.gmra.mrb[8].mxu0 %v9753_v6  ;;  %2844 = vmatpush1.bf16.msra.mxu1 %v8480_v40  ;;  %v8565_v40 = vld [vmem:[#allocation3 + $0x6dc] ss:$28 sps:$4 sm:$0xff]  }
 0x17a   : > { %2957 = vmatpush1.bf16.msra.mxu0 %v8477_v39  ;;  %2845 = vmatprep.subr.bf16.mxu1 %v8488_v42  ;;  %v8562_v39 = vld [vmem:[#allocation3 + $0xc0] ss:$28 sps:$4 sm:$0xff]   ;;  %v8563_v42 = vld [vmem:[#allocation3 + $0x6d8] ss:$28 sps:$4 sm:$0xff]  }
 0x17b   : > { %2958 = vmatprep.subr.bf16.mxu0 %v8485_v41  ;;  %2988 = vmatprep.mubr.bf16.mxu0 %v9749_v51  ;;  %v8566_v41 = vld [vmem:[#allocation3 + $0x2b8] ss:$28 sps:$4 sm:$0xff]  }
 0x17d   : > { %2846 = vmatpush1.bf16.msra.mxu1 %v8486_v44  ;;  %v8571_v44 = vld [vmem:[#allocation3 + $0x2f0] ss:$28 sps:$4 sm:$0xff]  }
 0x17e   : > { %2959 = vmatpush1.bf16.msra.mxu0 %v8483_v43  ;;  %2847 = vmatprep.subr.bf16.mxu1 %v8494_v46  ;;  %v8570_v43 = vld [vmem:[#allocation3 + $0x714] ss:$28 sps:$4 sm:$0xff]  }
 0x17f   : > { %2960 = vmatprep.subr.bf16.mxu0 %v8491_v45  ;;  %v8568_v45 = vld [vmem:[#allocation3 + $0x710] ss:$28 sps:$4 sm:$0xff]  }
 0x180   : > { %v8572_v46 = vld [vmem:[#allocation3 + $0x130] ss:$28 sps:$4 sm:$0xff]  }
 0x181   : > { %2848 = vmatpush1.bf16.msra.mxu1 %v8492_v49  ;;  %v8576_v49 = vld [vmem:[#allocation3 + $0x328] ss:$28 sps:$4 sm:$0xff]  }
 0x182   : > { %2961 = vmatpush1.bf16.msra.mxu0 %v8489_v48  ;;  %2849 = vmatprep.subr.bf16.mxu1 %v8500_v52  ;;  %v8575_v48 = vld [vmem:[#allocation3 + $0x74c] ss:$28 sps:$4 sm:$0xff]  }
 0x183   : > { %2962 = vmatprep.subr.bf16.mxu0 %v8497_v50 }
 0x185   : > { %2850 = vmatpush1.bf16.msra.mxu1 %v8498_v54  ;;  %v8573_v54 = vld [vmem:[#allocation3 + $0x748] ss:$28 sps:$4 sm:$0xff]  }
 0x186   : > { %2963 = vmatpush1.bf16.msra.mxu0 %v8495_v53  ;;  %2851 = vmatprep.subr.bf16.mxu1 %v8506_v56 }
 0x187   : > { %2964 = vmatprep.subr.bf16.mxu0 %v8503_v55  ;;  %v8577_v55 = vld [vmem:[#allocation3 + $0x168] ss:$28 sps:$4 sm:$0xff]  }
 0x189   : > { %2852 = vmatpush1.bf16.msra.mxu1 %v8504_v58  ;;  %v8581_v58 = vld [vmem:[#allocation3 + $0x360] ss:$28 sps:$4 sm:$0xff]  }
 0x18a   : > { %2965 = vmatpush1.bf16.msra.mxu0 %v8501_v57  ;;  %2853 = vmatprep.subr.bf16.mxu1 %v8512_v60  ;;  %v8580_v57 = vld [vmem:[#allocation3 + $0x784] ss:$28 sps:$4 sm:$0xff]  }
 0x18b   : > { %2966 = vmatprep.subr.bf16.mxu0 %v8509_v59  ;;  %v8578_v59 = vld [vmem:[#allocation3 + $0x780] ss:$28 sps:$4 sm:$0xff]  }
 0x18c   : > { %v8582_v60 = vld [vmem:[#allocation3 + $0x1a0] ss:$28 sps:$4 sm:$0xff]  }
 0x18d   : > { %2854 = vmatpush1.bf16.msra.mxu1 %v8510_v62  ;;  %v8586_v62 = vld [vmem:[#allocation3 + $0x558] ss:$28 sps:$4 sm:$0xff]  }
 0x18e   : > { %2967 = vmatpush1.bf16.msra.mxu0 %v8507_v61  ;;  %2855 = vmatprep.subr.bf16.mxu1 %v8518_v0  ;;  %v8585_v61 = vld [vmem:[#allocation3 + $0x7bc] ss:$28 sps:$4 sm:$0xff]  }
 0x18f   : > { %2968 = vmatprep.subr.bf16.mxu0 %v8515_v63  ;;  %v8583_v63 = vld [vmem:[#allocation3 + $0x7b8] ss:$28 sps:$4 sm:$0xff]  }
 0x190   : > { %v8587_v0 = vld [vmem:[#allocation3 + $0x398] ss:$28 sps:$4 sm:$0xff]  }
 0x191   : > { %2856 = vmatpush1.bf16.msra.mxu1 %v8516_v2  ;;  %v8591_v2 = vld [vmem:[#allocation3 + $0x590] ss:$28 sps:$4 sm:$0xff]  }
 0x192   : > { %2969 = vmatpush1.bf16.msra.mxu0 %v8513_v1  ;;  %2857 = vmatprep.subr.bf16.mxu1 %v8524_v4  ;;  %v8590_v1 = vld [vmem:[#allocation3 + $0x7f4] ss:$28 sps:$4 sm:$0xff]  }
 0x193   : > { %2970 = vmatprep.subr.bf16.mxu0 %v8521_v3  ;;  %v8588_v3 = vld [vmem:[#allocation3 + $0x7f0] ss:$28 sps:$4 sm:$0xff]  }
 0x194   : > { %v8592_v4 = vld [vmem:[#allocation3 + $0x3d0] ss:$28 sps:$4 sm:$0xff]  }
 0x195   : > { %2858 = vmatpush1.bf16.msra.mxu1 %v8522_v8  ;;  %v8596_v8 = vld [vmem:[#allocation3 + $0x5c8] ss:$28 sps:$4 sm:$0xff]  }
 0x196   : > { %2971 = vmatpush1.bf16.msra.mxu0 %v8519_v5  ;;  %2859 = vmatprep.subr.bf16.mxu1 %v8530_v10  ;;  %v8595_v5 = vld [vmem:[#allocation3 + $0x82c] ss:$28 sps:$4 sm:$0xff]  }
 0x197   : > { %2972 = vmatprep.subr.bf16.mxu0 %v8527_v9  ;;  %v8593_v9 = vld [vmem:[#allocation3 + $0x828] ss:$28 sps:$4 sm:$0xff]  }
 0x198   : > { %v8597_v10 = vld [vmem:[#allocation3 + $0x408] ss:$28 sps:$4 sm:$0xff]  }
 0x199   : > { %2860 = vmatpush1.bf16.msra.mxu1 %v8528_v12  ;;  %v8601_v12 = vld [vmem:[#allocation3 + $0x600] ss:$28 sps:$4 sm:$0xff]  }
 0x19a   : > { %2973 = vmatpush1.bf16.msra.mxu0 %v8525_v11  ;;  %2861 = vmatprep.subr.bf16.mxu1 %v8536_v15  ;;  %v8600_v11 = vld [vmem:[#allocation3 + $0x864] ss:$28 sps:$4 sm:$0xff]   ;;  %v8605_v15 = vld [vmem:[#allocation3 + $0x89c] ss:$28 sps:$4 sm:$0xff]  }
 0x19b   : > { %2974 = vmatprep.subr.bf16.mxu0 %v8533_v13  ;;  %v8602_v13 = vld [vmem:[#allocation3 + $0x440] ss:$28 sps:$4 sm:$0xff]  }
 0x19d   : > { %2862 = vmatpush1.bf16.msra.mxu1 %v8534_v17  ;;  %v8603_v17 = vld [vmem:[#allocation3 + $0x898] ss:$28 sps:$4 sm:$0xff]  }
 0x19e   : > { %2975 = vmatpush1.bf16.msra.mxu0 %v8531_v16  ;;  %2863 = vmatprep.subr.bf16.mxu1 %v8542_v19  ;;  %v8606_v16 = vld [vmem:[#allocation3 + $0x638] ss:$28 sps:$4 sm:$0xff]   ;;  %v8611_v19 = vld [vmem:[#allocation3 + $0x670] ss:$28 sps:$4 sm:$0xff]  }
 0x19f   : > { %2976 = vmatprep.subr.bf16.mxu0 %v8539_v18  ;;  %v8610_v18 = vld [vmem:[#allocation3 + $0x8d4] ss:$28 sps:$4 sm:$0xff]  }
 0x1a1   : > { %2864 = vmatpush1.bf16.msra.mxu1 %v8540_v22  ;;  %v8612_v22 = vld [vmem:[#allocation3 + $0x4b0] ss:$28 sps:$4 sm:$0xff]  }
 0x1a2   : > { %2977 = vmatpush1.bf16.msra.mxu0 %v8537_v20  ;;  %7759 = vmatprep.subr.bf16.mxu1 %v8546_v24  ;;  %v8608_v20 = vld [vmem:[#allocation3 + $0x8d0] ss:$28 sps:$4 sm:$0xff]   ;;  %v8616_v24 = vld [vmem:[#allocation3 + $0x6a8] ss:$28 sps:$4 sm:$0xff]  }
 0x1a3   : > { %2978 = vmatprep.subr.bf16.mxu0 %v8545_v23  ;;  %v8615_v23 = vld [vmem:[#allocation3 + $0x90c] ss:$28 sps:$4 sm:$0xff]  }
 0x1a4   : > { %2866 = vmatmul.mubr.bf16.vlgmr.msra.gmra.mrb[4].mxu1 %v9772_v14 }
 0x1a5   : > { %7760 = vmatpush3.bf16.msra.mxu1 %v8547_v26  ;;  %3111 = vmatprep.mubr.bf16.mxu1 %v9744_v47  ;;  %v8567_v47 = vld [vmem:[#allocation3 + $0xf8] ss:$28 sps:$4 sm:$0xff]   ;;  %v8617_v26 = vld [vmem:[#allocation3 + $0x4e8] ss:$28 sps:$4 sm:$0xff]  }
 0x1a6   : > { %2979 = vmatpush1.bf16.msra.mxu0 %v8543_v25  ;;  %7761 = vmatprep.subr.bf16.mxu1 %v8551_v28  ;;  %v8613_v25 = vld [vmem:[#allocation3 + $0x908] ss:$28 sps:$4 sm:$0xff]   ;;  %v8621_v28 = vld [vmem:[#allocation3 + $0x6e0] ss:$28 sps:$4 sm:$0xff]  }
 0x1a7   : > { %2980 = vmatprep.subr.bf16.mxu0 %v8550_v27  ;;  %v8620_v27 = vld [vmem:[#allocation3 + $0x944] ss:$28 sps:$4 sm:$0xff]  }
 0x1a9   : > { %7762 = vmatpush3.bf16.msra.mxu1 %v8552_v30  ;;  %v8622_v30 = vld [vmem:[#allocation3 + $0x520] ss:$28 sps:$4 sm:$0xff]  }
 0x1aa   : > { %2981 = vmatpush1.bf16.msra.mxu0 %v8548_v29  ;;  %7763 = vmatprep.subr.bf16.mxu1 %v8556_v32  ;;  %v8618_v29 = vld [vmem:[#allocation3 + $0x940] ss:$28 sps:$4 sm:$0xff]   ;;  %v8626_v32 = vld [vmem:[#allocation3 + $0x8d8] ss:$28 sps:$4 sm:$0xff]  }
 0x1ab   : > { %2982 = vmatprep.subr.bf16.mxu0 %v8555_v31  ;;  %v8625_v31 = vld [vmem:[#allocation3 + $0x97c] ss:$28 sps:$4 sm:$0xff]  }
 0x1ad   : > { %7764 = vmatpush3.bf16.msra.mxu1 %v8557_v35  ;;  %v8627_v35 = vld [vmem:[#allocation3 + $0x718] ss:$28 sps:$4 sm:$0xff]  }
 0x1ae   : > { %2983 = vmatpush1.bf16.msra.mxu0 %v8553_v33  ;;  %7765 = vmatprep.subr.bf16.mxu1 %v8561_v37  ;;  %v8623_v33 = vld [vmem:[#allocation3 + $0x978] ss:$28 sps:$4 sm:$0xff]   ;;  %v8631_v37 = vld [vmem:[#allocation3 + $0x910] ss:$28 sps:$4 sm:$0xff]  }
 0x1af   : > { %2984 = vmatprep.subr.bf16.mxu0 %v8560_v36  ;;  %v8630_v36 = vld [vmem:[#allocation3 + $0x9b4] ss:$28 sps:$4 sm:$0xff]  }
 0x1b1   : > { %7766 = vmatpush3.bf16.msra.mxu1 %v8562_v39  ;;  %v8632_v39 = vld [vmem:[#allocation3 + $0x750] ss:$28 sps:$4 sm:$0xff]  }
 0x1b2   : > { %2985 = vmatpush1.bf16.msra.mxu0 %v8558_v38  ;;  %7767 = vmatprep.subr.bf16.mxu1 %v8566_v41  ;;  %v8628_v38 = vld [vmem:[#allocation3 + $0x9b0] ss:$28 sps:$4 sm:$0xff]   ;;  %v8636_v41 = vld [vmem:[#allocation3 + $0x948] ss:$28 sps:$4 sm:$0xff]  }
 0x1b3   : > { %2986 = vmatprep.subr.bf16.mxu0 %v8565_v40  ;;  %v8635_v40 = vld [vmem:[#allocation3 + $0x9ec] ss:$28 sps:$4 sm:$0xff]  }
 0x1b5   : > { %7768 = vmatpush3.bf16.msra.mxu1 %v8567_v47  ;;  %v8637_v47 = vld [vmem:[#allocation3 + $0x788] ss:$28 sps:$4 sm:$0xff]  }
 0x1b6   : > { %2987 = vmatpush1.bf16.msra.mxu0 %v8563_v42  ;;  %7769 = vmatprep.subr.bf16.mxu1 %v8571_v44  ;;  %v8633_v42 = vld [vmem:[#allocation3 + $0x9e8] ss:$28 sps:$4 sm:$0xff]   ;;  %v8641_v44 = vld [vmem:[#allocation3 + $0x980] ss:$28 sps:$4 sm:$0xff]  }
 0x1b7   : > { %2997 = vmatprep.subr.bf16.mxu0 %v8570_v43  ;;  %v9791_v50 = vpop.f32.mrb[0].mxu1  ;;  %v8640_v43 = vld [vmem:[#allocation3 + $0xa24] ss:$28 sps:$4 sm:$0xff]  }
 0x1b8   : > { %v9794_v52 = vpop.f32.mrb[1].mxu1 }
 0x1b9   : > { %2989 = vmatmul.mubr.bf16.vlgmr.msra.gmra.mrb[8].mxu0 %v9755_v7  ;;  %7770 = vmatpush3.bf16.msra.mxu1 %v8572_v46  ;;  %v2625_v53 = vpop.f32.mrb[2].mxu1  ;;  %v8645_v46 = vld [vmem:[#allocation3 + $0xa5c] ss:$28 sps:$4 sm:$0xff]  }
 0x1ba   : > { %2998 = vmatpush1.bf16.msra.mxu0 %v8568_v45  ;;  %v2626_v56 = vpop.f32.mrb[3].mxu1  ;;  %7771 = vmatprep.subr.bf16.mxu1 %v8576_v49  ;;  %v8642_v45 = vld [vmem:[#allocation3 + $0x7c0] ss:$28 sps:$4 sm:$0xff]   ;;  %v8643_v49 = vld [vmem:[#allocation3 + $0xa58] ss:$28 sps:$4 sm:$0xff]   ;;  %v760_v53 = vlaneseq }
 0x1bb   : > { %2999 = vmatprep.subr.bf16.mxu0 %v8575_v48  ;;  %3029 = vmatprep.mubr.bf16.mxu0 %v9767_v34  ;;  %v8646_v48 = vld [vmem:[#allocation3 + $0x9b8] ss:$28 sps:$4 sm:$0xff]   ;;  %v8648_v56 = vld [vmem:[#allocation3 + $0xa90] ss:$28 sps:$4 sm:$0xff]  }
 0x1bd   : > { %7772 = vmatpush3.bf16.msra.mxu1 %v8577_v55  ;;  %v8651_v55 = vld [vmem:[#allocation3 + $0x9f0] ss:$28 sps:$4 sm:$0xff]  }
 0x1be   : > { %3000 = vmatpush1.bf16.msra.mxu0 %v8573_v54  ;;  %7773 = vmatprep.subr.bf16.mxu1 %v8581_v58  ;;  %v8650_v54 = vld [vmem:[#allocation3 + $0xa94] ss:$28 sps:$4 sm:$0xff]   ;;  %v9801_v58 = vshrl.u32 %v760_v53, 7 }
 0x1bf   : > { %3001 = vmatprep.subr.bf16.mxu0 %v8580_v57  ;;  %v8652_v57 = vld [vmem:[#allocation3 + $0x830] ss:$28 sps:$4 sm:$0xff]  }
 0x1c1   : > { %7774 = vmatpush3.bf16.msra.mxu1 %v8582_v60  ;;  %v8654_v60 = vld [vmem:[#allocation3 + $0x868] ss:$28 sps:$4 sm:$0xff]  }
 0x1c2   : > { %3002 = vmatpush1.bf16.msra.mxu0 %v8578_v59  ;;  %7781 = vmatprep.subr.bf16.mxu1 %v8586_v62  ;;  %v8653_v59 = vld [vmem:[#allocation3 + $0xa28] ss:$28 sps:$4 sm:$0xff]   ;;  %v8655_v62 = vld [vmem:[#allocation3 + $0xa60] ss:$28 sps:$4 sm:$0xff]  }
 0x1c3   : > { %3003 = vmatprep.subr.bf16.mxu0 %v8585_v61  ;;  %v762_v61 = vsub.s32 0, %v9801_v58 }
 0x1c4   : > { %3112 = vmatmul.mubr.bf16.vlgmr.msra.gmra.mrb[8].mxu1 %v9753_v6  ;;  %v8598_v6 = vld [vmem:[#allocation3 + $0x860] ss:$28 sps:$4 sm:$0xff]  }
 0x1c5   : > { %7782 = vmatpush3.bf16.msra.mxu1 %v8587_v0  ;;  %3151 = vmatprep.mubr.bf16.mxu1 %v9749_v51  ;;  %v8607_v51 = vld [vmem:[#allocation3 + $0x478] ss:$28 sps:$4 sm:$0xff]   ;;  %v766_v0 = vsub.s32 1, %v9801_v58 }
 0x1c6   : > { %3004 = vmatpush1.bf16.msra.mxu0 %v8583_v63  ;;  %7783 = vmatprep.subr.bf16.mxu1 %v8591_v2  ;;  %v9806_v63 = vld [vmem:[#allocation6] sm:$0x7f] }
 0x1c7   : > { %3005 = vmatprep.subr.bf16.mxu0 %v8590_v1  ;;  %v9454_v1 = vmov 0.0   ;;  %v8656_v2 = vld [vmem:[#allocation3 + $0x8a0] ss:$28 sps:$4 sm:$0xff]  }
 0x1c9   : > { %7784 = vmatpush3.bf16.msra.mxu1 %v8592_v4  ;;  %v767_v4 = vrot.slane %v9806_v63, %v766_v0 }
 0x1ca   : > { %3006 = vmatpush1.bf16.msra.mxu0 %v8588_v3  ;;  %7785 = vmatprep.subr.bf16.mxu1 %v8596_v8  ;;  %v763_v3 = vrot.slane %v9806_v63, %v762_v61 }
 0x1cb   : > { %3007 = vmatprep.subr.bf16.mxu0 %v8595_v5  ;;  %v8657_v5 = vld [vmem:[#allocation3 + $0xa98] ss:$28 sps:$4 sm:$0xff]  }
 0x1cc   : > { %v2622_v8 = vadd.f32 %v9791_v50, %v763_v3 }
 0x1cd   : > { %7786 = vmatpush3.bf16.msra.mxu1 %v8597_v10 }
 0x1ce   : > { %3008 = vmatpush1.bf16.msra.mxu0 %v8593_v9  ;;  %7787 = vmatprep.subr.bf16.mxu1 %v8601_v12  ;;  %v2624_v9 = vadd.f32 %v9794_v52, %v767_v4 }
 0x1cf   : > { %3009 = vmatprep.subr.bf16.mxu0 %v8600_v11  ;;  %v8658_v11 = vld [vmem:[%s10442_s0 + $0x18] ss:$0 sps:$4 sm:$0xff]  }
 0x1d1   : > { %7788 = vmatpush3.bf16.msra.mxu1 %v8602_v13 }
 0x1d2   : > { %3010 = vmatpush1.bf16.msra.mxu0 %v8598_v6  ;;  %7789 = vmatprep.subr.bf16.mxu1 %v8606_v16 }
 0x1d3   : > { %3011 = vmatprep.subr.bf16.mxu0 %v8605_v15 }
 0x1d5   : > { %7790 = vmatpush3.bf16.msra.mxu1 %v8607_v51 }
 0x1d6   : > { %3012 = vmatpush1.bf16.msra.mxu0 %v8603_v17  ;;  %7791 = vmatprep.subr.bf16.mxu1 %v8611_v19 }
 0x1d7   : > { %3013 = vmatprep.subr.bf16.mxu0 %v8610_v18 }
 0x1d9   : > { %7792 = vmatpush3.bf16.msra.mxu1 %v8612_v22 }
 0x1da   : > { %3014 = vmatpush1.bf16.msra.mxu0 %v8608_v20  ;;  %7793 = vmatprep.subr.bf16.mxu1 %v8616_v24  ;;  %v770_v20 = vsub.s32 2, %v9801_v58 }
 0x1db   : > { %3015 = vmatprep.subr.bf16.mxu0 %v8615_v23 }
 0x1dc   : > { %v771_v22 = vrot.slane %v9806_v63, %v770_v20 }
 0x1dd   : > { %7794 = vmatpush3.bf16.msra.mxu1 %v8617_v26 }
 0x1de   : > { %3016 = vmatpush1.bf16.msra.mxu0 %v8613_v25  ;;  %7795 = vmatprep.subr.bf16.mxu1 %v8621_v28 }
 0x1df   : > { %3017 = vmatprep.subr.bf16.mxu0 %v8620_v27 }
 0x1e1   : > { %7796 = vmatpush3.bf16.msra.mxu1 %v8622_v30 }
 0x1e2   : > { %3018 = vmatpush1.bf16.msra.mxu0 %v8618_v29  ;;  %7803 = vmatprep.subr.bf16.mxu1 %v8626_v32 }
 0x1e3   : > { %3019 = vmatprep.subr.bf16.mxu0 %v8625_v31 }
 0x1e4   : > { %3152 = vmatmul.mubr.bf16.vlgmr.msra.gmra.mrb[12].mxu1 %v9755_v7  ;;  %v8638_v7 = vld [vmem:[#allocation3 + $0xa20] ss:$28 sps:$4 sm:$0xff]  }
 0x1e5   : > { %7804 = vmatpush3.bf16.msra.mxu1 %v8627_v35  ;;  %3191 = vmatprep.mubr.bf16.mxu1 %v9767_v34  ;;  %v8647_v34 = vld [vmem:[#allocation3 + $0x7f8] ss:$28 sps:$4 sm:$0xff]  }
 0x1e6   : > { %3020 = vmatpush1.bf16.msra.mxu0 %v8623_v33  ;;  %7805 = vmatprep.subr.bf16.mxu1 %v8631_v37 }
 0x1e7   : > { %3021 = vmatprep.subr.bf16.mxu0 %v8630_v36 }
 0x1e9   : > { %7806 = vmatpush3.bf16.msra.mxu1 %v8632_v39 }
 0x1ea   : > { %3022 = vmatpush1.bf16.msra.mxu0 %v8628_v38  ;;  %7807 = vmatprep.subr.bf16.mxu1 %v8636_v41  ;;  %v786_v41 = vsub.s32 6, %v9801_v58 }
 0x1eb   : > { %3023 = vmatprep.subr.bf16.mxu0 %v8635_v40 }
 0x1ed   : > { %7808 = vmatpush3.bf16.msra.mxu1 %v8637_v47 }
 0x1ee   : > { %3024 = vmatpush1.bf16.msra.mxu0 %v8633_v42  ;;  %7809 = vmatprep.subr.bf16.mxu1 %v8641_v44  ;;  %v787_v42 = vrot.slane %v9806_v63, %v786_v41 }
 0x1ef   : > { %3025 = vmatprep.subr.bf16.mxu0 %v8640_v43 }
 0x1f1   : > { %7810 = vmatpush3.bf16.msra.mxu1 %v8642_v45 }
 0x1f2   : > { %3026 = vmatpush1.bf16.msra.mxu0 %v8638_v7  ;;  %7811 = vmatprep.subr.bf16.mxu1 %v8646_v48 }
 0x1f3   : > { %3027 = vmatprep.subr.bf16.mxu0 %v8645_v46 }
 0x1f5   : > { %7812 = vmatpush3.bf16.msra.mxu1 %v8647_v34  ;;  %v782_v34 = vsub.s32 5, %v9801_v58 }
 0x1f6   : > { %3028 = vmatpush1.bf16.msra.mxu0 %v8643_v49  ;;  %7813 = vmatprep.subr.bf16.mxu1 %v8651_v55  ;;  %v778_v49 = vsub.s32 4, %v9801_v58 }
 0x1f7   : > { %3038 = vmatprep.subr.bf16.mxu0 %v8650_v54  ;;  %v783_v54 = vrot.slane %v9806_v63, %v782_v34 }
 0x1f8   : > { %v779_v53 = vrot.slane %v9806_v63, %v778_v49 }
 0x1f9   : > { %3030 = vmatmul.mubr.bf16.vlgmr.msra.gmra.mrb[8].mxu0 %v9772_v14  ;;  %7814 = vmatpush3.bf16.msra.mxu1 %v8652_v57 }
 0x1fa   : > { %3039 = vmatpush1.bf16.msra.mxu0 %v8648_v56  ;;  %7815 = vmatprep.subr.bf16.mxu1 %v8653_v59 }
 0x1fb   : > { %3070 = vmatprep.mubr.bf16.mxu0 %v9453_v21  ;;  %7965 = vmatprep.subr.bf16.mxu0 %v9454_v1 }
 0x1fd   : > { %7816 = vmatpush3.bf16.msra.mxu1 %v8654_v60 }
 0x1fe   : > { %7817 = vmatprep.subr.bf16.mxu1 %v8655_v62 }
 0x201   : > { %7818 = vmatpush3.bf16.msra.mxu1 %v8656_v2 }
 0x204   : > { %v2744_v21 = vpop.f32.mrb[0].mxu0  ;;  %3192 = vmatmul.mubr.bf16.vlgmr.msra.gmra.mrb[16].mxu1 %v9772_v14  ;;  %v774_v14 = vsub.s32 3, %v9801_v58 }
 0x205   : > { %v7988_v10 = vadd.f32 %v2744_v21, %v2622_v8  ;;  %7316 = vmatmul.mubr.msk.bf16.vlgmr.msra.gmra.mrb[8].mxu0 %vm2583_vm0, %v8658_v11  ;;  %v2746_v12 = vpop.f32.mrb[1].mxu0 }
 0x206   : > { %v7990_v6 = vadd.f32 %v2746_v12, %v2624_v9  ;;  %7966 = vmatpush3.bf16.msra.mxu0 %v8657_v5  ;;  %v2748_v13 = vpop.f32.mrb[2].mxu0  ;;  %7967 = vmatprep.mubr.msk.bf16.mxu0 %vm9455_vm1, %v9454_v1  ;;  %v775_v23 = vrot.slane %v9806_v63, %v774_v14 }
 0x207   : > { %v3239_v15 = vmax.f32 %v7988_v10, 0.0  ;;  %v2749_v50 = vpop.f32.mrb[3].mxu0 }
 0x208   : > { %v3240_v16 = vmax.f32 %v7990_v6, 0.0 }
 0x20a   : > { %v7751_v52 = vpack.c.bf16 %v3240_v16, %v3239_v15 }
 0x20c   : > { %3275 = vst [vmem:[#allocation2] sm:$0xff] %v7751_v52  ;;  %v2908_v17 = vpop.f32.mrb[4].mxu0 }
 0x20d   : > { %7968 = vmatmul.mubr.msk.bf16.vlgmr.msra.gmra.mrb[12].mxu0 %vm2583_vm0, %v8658_v11  ;;  %v2910_v51 = vpop.f32.mrb[5].mxu0 }
 0x20e   : > { %v2912_v18 = vpop.f32.mrb[6].mxu0 }
 0x20f   : > { %v2913_v19 = vpop.f32.mrb[7].mxu0 }
 0x277   : > { %v2867_v24 = vpop.f32.mrb[4].mxu1 }
 0x278   : > { %v7991_v25 = vadd.f32 %v2867_v24, %v771_v22  ;;  %v2869_v26 = vpop.f32.mrb[5].mxu1 }
 0x279   : > { %v7993_v27 = vadd.f32 %v2869_v26, %v775_v23  ;;  %v2871_v28 = vpop.f32.mrb[6].mxu1 }
 0x27a   : > { %v7992_v29 = vadd.f32 %v7991_v25, %v2908_v17  ;;  %v2872_v30 = vpop.f32.mrb[7].mxu1 }
 0x27b   : > { %v7994_v31 = vadd.f32 %v7993_v27, %v2910_v51 }
 0x27c   : > { %v3241_v32 = vmax.f32 %v7992_v29, 0.0 }
 0x27d   : > { %v3242_v33 = vmax.f32 %v7994_v31, 0.0 }
 0x27f   : > { %v7752_v35 = vpack.c.bf16 %v3242_v33, %v3241_v32 }
 0x281   : > { %3276 = vst [vmem:[#allocation2 + $0x8] sm:$0xff] %v7752_v35 }
 0x297   : > { %v7775_v36 = vpop.f32.mrb[8].mxu1 }
 0x298   : > { %v7776_v37 = vpop.f32.mrb[9].mxu1 }
 0x299   : > { %v7777_v38 = vadd.f32 %v7776_v37, %v7775_v36  ;;  %v7778_v39 = vpop.f32.mrb[10].mxu1 }
 0x29a   : > { %v7779_v40 = vpop.f32.mrb[11].mxu1 }
 0x29b   : > { %v3114_v44 = vadd.f32 %v7777_v38, %v787_v42 }
 0x2b7   : > { %v7797_v47 = vpop.f32.mrb[12].mxu1 }
 0x2b8   : > { %v7798_v43 = vpop.f32.mrb[13].mxu1 }
 0x2b9   : > { %v7799_v7 = vadd.f32 %v7798_v43, %v7797_v47  ;;  %v7800_v45 = vpop.f32.mrb[14].mxu1 }
 0x2ba   : > { %v7801_v46 = vpop.f32.mrb[15].mxu1 }
 0x2bb   : > { %v3154_v48 = vadd.f32 %v7799_v7, %v3114_v44 }
 0x2d7   : > { %v7819_v56 = vpop.f32.mrb[16].mxu1 }
 0x2d8   : > { %v3072_v55 = vpop.f32.mrb[8].mxu0  ;;  %v7820_v60 = vpop.f32.mrb[17].mxu1 }
 0x2d9   : > { %v7995_v57 = vadd.f32 %v3072_v55, %v779_v53  ;;  %v3074_v59 = vpop.f32.mrb[9].mxu0  ;;  %v7821_v0 = vadd.f32 %v7820_v60, %v7819_v56  ;;  %v7822_v1 = vpop.f32.mrb[18].mxu1 }
 0x2da   : > { %v7996_v61 = vadd.f32 %v3074_v59, %v783_v54  ;;  %v3076_v62 = vpop.f32.mrb[10].mxu0  ;;  %v7823_v4 = vpop.f32.mrb[19].mxu1 }
 0x2db   : > { %v3243_v2 = vmax.f32 %v7995_v57, 0.0  ;;  %v3077_v3 = vpop.f32.mrb[11].mxu0  ;;  %v3194_v8 = vadd.f32 %v7821_v0, %v3154_v48 }
 0x2dc   : > { %v3244_v5 = vmax.f32 %v7996_v61, 0.0 }
 0x2de   : > { %v7753_v9 = vpack.c.bf16 %v3244_v5, %v3243_v2 }
 0x2e0   : > { %3277 = vst [vmem:[#allocation2 + $0x10] sm:$0xff] %v7753_v9  ;;  %v3233_v58 = vpop.f32.mrb[12].mxu0 }
 0x2e1   : > { %v3234_v21 = vadd.f32 %v3233_v58, %v3194_v8  ;;  %v7969_v10 = vpop.f32.mrb[13].mxu0 }
 0x2e2   : > { %v3236_v63 = vpop.f32.mrb[14].mxu0 }
 0x2e3   : > { %v3245_v11 = vmax.f32 %v3234_v21, 0.0  ;;  %v7970_v12 = vpop.f32.mrb[15].mxu0 }
 0x2e5   : > { %v7754_v6 = vpack.c.bf16 %v3245_v11, %v3245_v11 }
 0x2e7   : > { %3279 = vst.msk [vmem:[#allocation2 + $0x18] sm:$0xf] %vm3278_vm2, %v7754_v6 }
 0x2e8 PF: > { %v8659_v13 = vld [vmem:[%s9726_s20 + $0x4] ss:$28 sps:$4 sm:$0xff]   ;;  %v8665_v52 = vld [vmem:[%s9726_s20 + $0x3c] ss:$28 sps:$4 sm:$0xff]   ;;  %v8671_v19 = vld [vmem:[%s9726_s20 + $0x74] ss:$28 sps:$4 sm:$0xff]  }
 0x2e9   : > { %v8661_v15 = vld [vmem:[%s9726_s20 + $0x384] ss:$28 sps:$4 sm:$0xff]   ;;  %5549 = vmatprep.subr.bf16.mxu1 %v8659_v13  ;;  %v8667_v17 = vld [vmem:[%s9726_s20 + $0x3bc] ss:$28 sps:$4 sm:$0xff]   ;;  %v8673_v20 = vld [vmem:[%s9726_s20 + $0x3f4] ss:$28 sps:$4 sm:$0xff]  }
 0x2ea   : > { %v8663_v50 = vld [vmem:[%s9726_s20] ss:$28 sps:$4 sm:$0xff]   ;;  %5590 = vmatprep.subr.bf16.mxu0 %v8661_v15  ;;  %v8669_v51 = vld [vmem:[%s9726_s20 + $0x38] ss:$28 sps:$4 sm:$0xff]   ;;  %v8675_v14 = vld [vmem:[%s9726_s20 + $0x70] ss:$28 sps:$4 sm:$0xff]  }
 0x2eb   : > { %v8664_v16 = vld [vmem:[%s9726_s20 + $0x380] ss:$28 sps:$4 sm:$0xff]   ;;  %5550 = vmatpush1.bf16.msra.mxu1 %v8663_v50  ;;  %v8670_v18 = vld [vmem:[%s9726_s20 + $0x3b8] ss:$28 sps:$4 sm:$0xff]   ;;  %v8676_v22 = vld [vmem:[%s9726_s20 + $0x3f0] ss:$28 sps:$4 sm:$0xff]  }
 0x2ec   : > { %5591 = vmatpush1.bf16.msra.mxu0 %v8664_v16  ;;  %5551 = vmatprep.subr.bf16.mxu1 %v8665_v52  ;;  %v8677_v23 = vld [vmem:[%s9726_s20 + $0xac] ss:$28 sps:$4 sm:$0xff]   ;;  %v8683_v27 = vld [vmem:[%s9726_s20 + $0xe4] ss:$28 sps:$4 sm:$0xff]   ;;  %v8689_v31 = vld [vmem:[%s9726_s20 + $0x11c] ss:$28 sps:$4 sm:$0xff]  }
 0x2ed   : > { %5592 = vmatprep.subr.bf16.mxu0 %v8667_v17  ;;  %v8679_v24 = vld [vmem:[%s9726_s20 + $0x42c] ss:$28 sps:$4 sm:$0xff]   ;;  %v8685_v28 = vld [vmem:[%s9726_s20 + $0x464] ss:$28 sps:$4 sm:$0xff]   ;;  %v8691_v32 = vld [vmem:[%s9726_s20 + $0x49c] ss:$28 sps:$4 sm:$0xff]  }
 0x2ee   : > { %v8681_v25 = vld [vmem:[%s9726_s20 + $0xa8] ss:$28 sps:$4 sm:$0xff]   ;;  %v8687_v29 = vld [vmem:[%s9726_s20 + $0xe0] ss:$28 sps:$4 sm:$0xff]   ;;  %v8693_v33 = vld [vmem:[%s9726_s20 + $0x118] ss:$28 sps:$4 sm:$0xff]  }
 0x2ef   : > { %5552 = vmatpush1.bf16.msra.mxu1 %v8669_v51  ;;  %v8682_v26 = vld [vmem:[%s9726_s20 + $0x428] ss:$28 sps:$4 sm:$0xff]   ;;  %v8688_v30 = vld [vmem:[%s9726_s20 + $0x460] ss:$28 sps:$4 sm:$0xff]   ;;  %v8694_v35 = vld [vmem:[%s9726_s20 + $0x498] ss:$28 sps:$4 sm:$0xff]  }
 0x2f0   : > { %5593 = vmatpush1.bf16.msra.mxu0 %v8670_v18  ;;  %5553 = vmatprep.subr.bf16.mxu1 %v8671_v19  ;;  %v8695_v36 = vld [vmem:[%s9726_s20 + $0x154] ss:$28 sps:$4 sm:$0xff]   ;;  %v8701_v40 = vld [vmem:[%s9726_s20 + $0x18c] ss:$28 sps:$4 sm:$0xff]   ;;  %v8707_v43 = vld [vmem:[%s9726_s20 + $0x1c4] ss:$28 sps:$4 sm:$0xff]  }
 0x2f1   : > { %5594 = vmatprep.subr.bf16.mxu0 %v8673_v20  ;;  %v8697_v37 = vld [vmem:[%s9726_s20 + $0x4d4] ss:$28 sps:$4 sm:$0xff]   ;;  %v8703_v41 = vld [vmem:[%s9726_s20 + $0x50c] ss:$28 sps:$4 sm:$0xff]   ;;  %v8709_v44 = vld [vmem:[%s9726_s20 + $0x544] ss:$28 sps:$4 sm:$0xff]  }
 0x2f2   : > { %v8699_v38 = vld [vmem:[%s9726_s20 + $0x150] ss:$28 sps:$4 sm:$0xff]   ;;  %v8705_v42 = vld [vmem:[%s9726_s20 + $0x188] ss:$28 sps:$4 sm:$0xff]   ;;  %v8711_v7 = vld [vmem:[%s9726_s20 + $0x1c0] ss:$28 sps:$4 sm:$0xff]  }
 0x2f3   : > { %5554 = vmatpush1.bf16.msra.mxu1 %v8675_v14  ;;  %v8700_v39 = vld [vmem:[%s9726_s20 + $0x4d0] ss:$28 sps:$4 sm:$0xff]   ;;  %v8706_v47 = vld [vmem:[%s9726_s20 + $0x508] ss:$28 sps:$4 sm:$0xff]   ;;  %v8712_v45 = vld [vmem:[%s9726_s20 + $0x540] ss:$28 sps:$4 sm:$0xff]  }
 0x2f4   : > { %5595 = vmatpush1.bf16.msra.mxu0 %v8676_v22  ;;  %5555 = vmatprep.subr.bf16.mxu1 %v8677_v23  ;;  %v8713_v46 = vld [vmem:[%s9726_s20 + $0x1fc] ss:$28 sps:$4 sm:$0xff]   ;;  %v8719_v53 = vld [vmem:[%s9726_s20 + $0x234] ss:$28 sps:$4 sm:$0xff]   ;;  %v8725_v57 = vld [vmem:[%s9726_s20 + $0x26c] ss:$28 sps:$4 sm:$0xff]  }
 0x2f5   : > { %5596 = vmatprep.subr.bf16.mxu0 %v8679_v24  ;;  %v8715_v48 = vld [vmem:[%s9726_s20 + $0x57c] ss:$28 sps:$4 sm:$0xff]   ;;  %v8721_v54 = vld [vmem:[%s9726_s20 + $0x5b4] ss:$28 sps:$4 sm:$0xff]   ;;  %v8727_v59 = vld [vmem:[%s9726_s20 + $0x5ec] ss:$28 sps:$4 sm:$0xff]  }
 0x2f6   : > { %v8717_v49 = vld [vmem:[%s9726_s20 + $0x1f8] ss:$28 sps:$4 sm:$0xff]   ;;  %v8723_v55 = vld [vmem:[%s9726_s20 + $0x230] ss:$28 sps:$4 sm:$0xff]   ;;  %v8729_v0 = vld [vmem:[%s9726_s20 + $0x268] ss:$28 sps:$4 sm:$0xff]  }
 0x2f7   : > { %5556 = vmatpush1.bf16.msra.mxu1 %v8681_v25  ;;  %v8718_v34 = vld [vmem:[%s9726_s20 + $0x578] ss:$28 sps:$4 sm:$0xff]   ;;  %v8724_v56 = vld [vmem:[%s9726_s20 + $0x5b0] ss:$28 sps:$4 sm:$0xff]   ;;  %v8730_v1 = vld [vmem:[%s9726_s20 + $0x5e8] ss:$28 sps:$4 sm:$0xff]  }
 0x2f8   : > { %5597 = vmatpush1.bf16.msra.mxu0 %v8682_v26  ;;  %5557 = vmatprep.subr.bf16.mxu1 %v8683_v27  ;;  %v3280_v60 = vld [vmem:[#allocation2] sm:$0xff]  ;;  %v3281_v62 = vld [vmem:[#allocation2 + $0x8] sm:$0xff]  ;;  %vm5545_vm3 = vcmask 261120   ;;  %vm9458_vm4 = vmmov 0   ;;  %vm6240_vm5 = vcmask 257024   ;;  %p7687_p0 = scmp.ne.s32.totalorder %s9521_s28, 3 }
 0x2f9   : > { %5598 = vmatprep.subr.bf16.mxu0 %v8685_v28  ;;  %v9875_v61 = vcombine.high %v3280_v60, %v3280_v60  ;;  %v9879_v2 = vcombine.high %v3281_v62, %v3281_v62  ;;  %v8731_v3 = vld [vmem:[%s9726_s20 + $0x2a4] ss:$28 sps:$4 sm:$0xff]   ;;  %v8737_v9 = vld [vmem:[%s9726_s20 + $0x2dc] ss:$28 sps:$4 sm:$0xff]   ;;  %v8743_v63 = vld [vmem:[%s9726_s20 + $0x314] ss:$28 sps:$4 sm:$0xff]   ;;  %v9901_v51 = vcombine.low %v3280_v60, %v3280_v60  ;;  %v9903_v18 = vcombine.low %v3281_v62, %v3281_v62 }
 0x2fa   : > { %v8733_v4 = vld [vmem:[%s9726_s20 + $0x624] ss:$28 sps:$4 sm:$0xff]   ;;  %v8739_v58 = vld [vmem:[%s9726_s20 + $0x65c] ss:$28 sps:$4 sm:$0xff]   ;;  %v8745_v11 = vld [vmem:[%s9726_s20 + $0x694] ss:$28 sps:$4 sm:$0xff]  }
 0x2fb   : > { %5558 = vmatpush1.bf16.msra.mxu1 %v8687_v29  ;;  %5581 = vmatprep.mubr.bf16.mxu1 %v9875_v61  ;;  %v8735_v5 = vld [vmem:[%s9726_s20 + $0x2a0] ss:$28 sps:$4 sm:$0xff]   ;;  %v8741_v21 = vld [vmem:[%s9726_s20 + $0x2d8] ss:$28 sps:$4 sm:$0xff]   ;;  %v8747_v12 = vld [vmem:[%s9726_s20 + $0x310] ss:$28 sps:$4 sm:$0xff]  }
 0x2fc   : > { %5599 = vmatpush1.bf16.msra.mxu0 %v8688_v30  ;;  %5559 = vmatprep.subr.bf16.mxu1 %v8689_v31  ;;  %v8736_v8 = vld [vmem:[%s9726_s20 + $0x620] ss:$28 sps:$4 sm:$0xff]   ;;  %v8742_v10 = vld [vmem:[%s9726_s20 + $0x658] ss:$28 sps:$4 sm:$0xff]   ;;  %v8748_v6 = vld [vmem:[%s9726_s20 + $0x690] ss:$28 sps:$4 sm:$0xff]  }
 0x2fd   : > { %5600 = vmatprep.subr.bf16.mxu0 %v8691_v32  ;;  %5622 = vmatprep.mubr.bf16.mxu0 %v9879_v2  ;;  %v8749_v13 = vld [vmem:[%s9726_s20 + $0x34c] ss:$28 sps:$4 sm:$0xff]   ;;  %v8759_v52 = vld [vmem:[%s9726_s20 + $0x704] ss:$28 sps:$4 sm:$0xff]   ;;  %v8767_v14 = vld [vmem:[%s9726_s20 + $0x73c] ss:$28 sps:$4 sm:$0xff]  }
 0x2fe   : > { %v8751_v15 = vld [vmem:[%s9726_s20 + $0x6cc] ss:$28 sps:$4 sm:$0xff]   ;;  %v8757_v19 = vld [vmem:[%s9726_s20 + $0x700] ss:$28 sps:$4 sm:$0xff]   ;;  %v8765_v23 = vld [vmem:[%s9726_s20 + $0x738] ss:$28 sps:$4 sm:$0xff]  }
 0x2ff   : > { %5560 = vmatpush1.bf16.msra.mxu1 %v8693_v33  ;;  %v8753_v50 = vld [vmem:[%s9726_s20 + $0x348] ss:$28 sps:$4 sm:$0xff]   ;;  %v8768_v24 = vld [vmem:[%s9726_s20 + $0x40] ss:$28 sps:$4 sm:$0xff]   ;;  %v8773_v25 = vld [vmem:[%s9726_s20 + $0x774] ss:$28 sps:$4 sm:$0xff]  }
 0x300   : > { %5601 = vmatpush1.bf16.msra.mxu0 %v8694_v35  ;;  %5561 = vmatprep.subr.bf16.mxu1 %v8695_v36  ;;  %v8754_v16 = vld [vmem:[%s9726_s20 + $0x6c8] ss:$28 sps:$4 sm:$0xff]   ;;  %v8776_v26 = vld [vmem:[%s9726_s20 + $0x7c] ss:$28 sps:$4 sm:$0xff]   ;;  %v8771_v27 = vld [vmem:[%s9726_s20 + $0x770] ss:$28 sps:$4 sm:$0xff]  }
 0x301   : > { %5602 = vmatprep.subr.bf16.mxu0 %v8697_v37  ;;  %v8762_v17 = vld [vmem:[%s9726_s20 + $0xc] ss:$28 sps:$4 sm:$0xff]   ;;  %v8770_v22 = vld [vmem:[%s9726_s20 + $0x44] ss:$28 sps:$4 sm:$0xff]   ;;  %v8774_v28 = vld [vmem:[%s9726_s20 + $0x78] ss:$28 sps:$4 sm:$0xff]  }
 0x302   : > { %v8760_v20 = vld [vmem:[%s9726_s20 + $0x8] ss:$28 sps:$4 sm:$0xff]   ;;  %v8782_v30 = vld [vmem:[%s9726_s20 + $0xb4] ss:$28 sps:$4 sm:$0xff]   ;;  %v8783_v36 = vld [vmem:[%s9726_s20 + $0x7e0] ss:$28 sps:$4 sm:$0xff]  }
 0x303   : > { %5562 = vmatpush1.bf16.msra.mxu1 %v8699_v38  ;;  %v8779_v29 = vld [vmem:[%s9726_s20 + $0x7ac] ss:$28 sps:$4 sm:$0xff]   ;;  %v8785_v33 = vld [vmem:[%s9726_s20 + $0x7e4] ss:$28 sps:$4 sm:$0xff]   ;;  %v8791_v38 = vld [vmem:[%s9726_s20 + $0x81c] ss:$28 sps:$4 sm:$0xff]  }
 0x304   : > { %5603 = vmatpush1.bf16.msra.mxu0 %v8700_v39  ;;  %5563 = vmatprep.subr.bf16.mxu1 %v8701_v40  ;;  %v8777_v31 = vld [vmem:[%s9726_s20 + $0x7a8] ss:$28 sps:$4 sm:$0xff]   ;;  %v8780_v32 = vld [vmem:[%s9726_s20 + $0xb0] ss:$28 sps:$4 sm:$0xff]   ;;  %v8789_v40 = vld [vmem:[%s9726_s20 + $0x818] ss:$28 sps:$4 sm:$0xff]  }
 0x305   : > { %5604 = vmatprep.subr.bf16.mxu0 %v8703_v41  ;;  %v8788_v35 = vld [vmem:[%s9726_s20 + $0xec] ss:$28 sps:$4 sm:$0xff]   ;;  %v8794_v39 = vld [vmem:[%s9726_s20 + $0x124] ss:$28 sps:$4 sm:$0xff]   ;;  %v8813_v60 = vld [vmem:[%s9726_s20 + $0x8f8] ss:$28 sps:$4 sm:$0xff]  }
 0x306   : > { %v8786_v37 = vld [vmem:[%s9726_s20 + $0xe8] ss:$28 sps:$4 sm:$0xff]   ;;  %v8792_v41 = vld [vmem:[%s9726_s20 + $0x120] ss:$28 sps:$4 sm:$0xff]   ;;  %vm9460_vm6 = vmmov (!%p7687_p0), 0   ;;  %vm6844_vm7 = vcmask (!%p7687_p0), 80896  }
 0x307   : > { %5564 = vmatpush1.bf16.msra.mxu1 %v8705_v42  ;;  %v8797_v42 = vld [vmem:[%s9726_s20 + $0x854] ss:$28 sps:$4 sm:$0xff]   ;;  %v8816_v62 = vld [vmem:[%s9726_s20 + $0x200] ss:$28 sps:$4 sm:$0xff]  }
 0x308   : > { %5605 = vmatpush1.bf16.msra.mxu0 %v8706_v47  ;;  %5565 = vmatprep.subr.bf16.mxu1 %v8707_v43  ;;  %v8800_v47 = vld [vmem:[%s9726_s20 + $0x15c] ss:$28 sps:$4 sm:$0xff]  }
 0x309   : > { %5606 = vmatprep.subr.bf16.mxu0 %v8709_v44  ;;  %v9932_v43 = vld [vmem:[#allocation2 + $0x10] sm:$0xff]  ;;  %v8795_v44 = vld [vmem:[%s9726_s20 + $0x850] ss:$28 sps:$4 sm:$0xff]  }
 0x30b   : > { %5566 = vmatpush1.bf16.msra.mxu1 %v8711_v7  ;;  %v9937_v7 = vcombine.high %v9932_v43, %v9932_v43 }
 0x30c   : > { %5607 = vmatpush1.bf16.msra.mxu0 %v8712_v45  ;;  %5567 = vmatprep.subr.bf16.mxu1 %v8713_v46  ;;  %v8798_v45 = vld [vmem:[%s9726_s20 + $0x158] ss:$28 sps:$4 sm:$0xff]   ;;  %v8803_v46 = vld [vmem:[%s9726_s20 + $0x88c] ss:$28 sps:$4 sm:$0xff]  }
 0x30d   : > { %5608 = vmatprep.subr.bf16.mxu0 %v8715_v48  ;;  %v8806_v48 = vld [vmem:[%s9726_s20 + $0x194] ss:$28 sps:$4 sm:$0xff]  }
 0x30f   : > { %5568 = vmatpush1.bf16.msra.mxu1 %v8717_v49  ;;  %v8801_v49 = vld [vmem:[%s9726_s20 + $0x888] ss:$28 sps:$4 sm:$0xff]  }
 0x310   : > { %5609 = vmatpush1.bf16.msra.mxu0 %v8718_v34  ;;  %5569 = vmatprep.subr.bf16.mxu1 %v8719_v53  ;;  %v8804_v34 = vld [vmem:[%s9726_s20 + $0x190] ss:$28 sps:$4 sm:$0xff]   ;;  %v8809_v53 = vld [vmem:[%s9726_s20 + $0x8c4] ss:$28 sps:$4 sm:$0xff]  }
 0x311   : > { %5610 = vmatprep.subr.bf16.mxu0 %v8721_v54  ;;  %v8812_v54 = vld [vmem:[%s9726_s20 + $0x1cc] ss:$28 sps:$4 sm:$0xff]  }
 0x313   : > { %5570 = vmatpush1.bf16.msra.mxu1 %v8723_v55  ;;  %v8807_v55 = vld [vmem:[%s9726_s20 + $0x8c0] ss:$28 sps:$4 sm:$0xff]  }
 0x314   : > { %5611 = vmatpush1.bf16.msra.mxu0 %v8724_v56  ;;  %5571 = vmatprep.subr.bf16.mxu1 %v8725_v57  ;;  %v8810_v56 = vld [vmem:[%s9726_s20 + $0x1c8] ss:$28 sps:$4 sm:$0xff]   ;;  %v8815_v57 = vld [vmem:[%s9726_s20 + $0x8fc] ss:$28 sps:$4 sm:$0xff]  }
 0x315   : > { %5612 = vmatprep.subr.bf16.mxu0 %v8727_v59  ;;  %v8818_v59 = vld [vmem:[%s9726_s20 + $0x204] ss:$28 sps:$4 sm:$0xff]  }
 0x317   : > { %5572 = vmatpush1.bf16.msra.mxu1 %v8729_v0  ;;  %v8821_v0 = vld [vmem:[%s9726_s20 + $0x934] ss:$28 sps:$4 sm:$0xff]  }
 0x318   : > { %5613 = vmatpush1.bf16.msra.mxu0 %v8730_v1  ;;  %5573 = vmatprep.subr.bf16.mxu1 %v8731_v3  ;;  %v8824_v1 = vld [vmem:[%s9726_s20 + $0x23c] ss:$28 sps:$4 sm:$0xff]   ;;  %v8819_v3 = vld [vmem:[%s9726_s20 + $0x930] ss:$28 sps:$4 sm:$0xff]  }
 0x319   : > { %5614 = vmatprep.subr.bf16.mxu0 %v8733_v4  ;;  %v8822_v4 = vld [vmem:[%s9726_s20 + $0x238] ss:$28 sps:$4 sm:$0xff]  }
 0x31b   : > { %5574 = vmatpush1.bf16.msra.mxu1 %v8735_v5  ;;  %v8827_v5 = vld [vmem:[%s9726_s20 + $0x96c] ss:$28 sps:$4 sm:$0xff]  }
 0x31c   : > { %5615 = vmatpush1.bf16.msra.mxu0 %v8736_v8  ;;  %5575 = vmatprep.subr.bf16.mxu1 %v8737_v9  ;;  %v8830_v8 = vld [vmem:[%s9726_s20 + $0x274] ss:$28 sps:$4 sm:$0xff]   ;;  %v8825_v9 = vld [vmem:[%s9726_s20 + $0x968] ss:$28 sps:$4 sm:$0xff]  }
 0x31d   : > { %5616 = vmatprep.subr.bf16.mxu0 %v8739_v58  ;;  %v8828_v58 = vld [vmem:[%s9726_s20 + $0x270] ss:$28 sps:$4 sm:$0xff]  }
 0x31f   : > { %5576 = vmatpush1.bf16.msra.mxu1 %v8741_v21  ;;  %v8833_v21 = vld [vmem:[%s9726_s20 + $0x9a4] ss:$28 sps:$4 sm:$0xff]  }
 0x320   : > { %5617 = vmatpush1.bf16.msra.mxu0 %v8742_v10  ;;  %5577 = vmatprep.subr.bf16.mxu1 %v8743_v63  ;;  %v8836_v10 = vld [vmem:[%s9726_s20 + $0x2ac] ss:$28 sps:$4 sm:$0xff]   ;;  %v8831_v63 = vld [vmem:[%s9726_s20 + $0x9a0] ss:$28 sps:$4 sm:$0xff]  }
 0x321   : > { %5618 = vmatprep.subr.bf16.mxu0 %v8745_v11  ;;  %v8834_v11 = vld [vmem:[%s9726_s20 + $0x2a8] ss:$28 sps:$4 sm:$0xff]  }
 0x323   : > { %5578 = vmatpush1.bf16.msra.mxu1 %v8747_v12  ;;  %v8839_v12 = vld [vmem:[%s9726_s20 + $0x9dc] ss:$28 sps:$4 sm:$0xff]  }
 0x324   : > { %5619 = vmatpush1.bf16.msra.mxu0 %v8748_v6  ;;  %5579 = vmatprep.subr.bf16.mxu1 %v8749_v13  ;;  %v8842_v6 = vld [vmem:[%s9726_s20 + $0x2e4] ss:$28 sps:$4 sm:$0xff]   ;;  %v8837_v13 = vld [vmem:[%s9726_s20 + $0x9d8] ss:$28 sps:$4 sm:$0xff]  }
 0x325   : > { %5620 = vmatprep.subr.bf16.mxu0 %v8751_v15  ;;  %v8840_v15 = vld [vmem:[%s9726_s20 + $0x2e0] ss:$28 sps:$4 sm:$0xff]  }
 0x327   : > { %5580 = vmatpush1.bf16.msra.mxu1 %v8753_v50  ;;  %v8845_v50 = vld [vmem:[%s9726_s20 + $0xa14] ss:$28 sps:$4 sm:$0xff]  }
 0x328   : > { %5621 = vmatpush1.bf16.msra.mxu0 %v8754_v16  ;;  %5713 = vmatprep.subr.bf16.mxu1 %v8762_v17  ;;  %v8848_v16 = vld [vmem:[%s9726_s20 + $0x31c] ss:$28 sps:$4 sm:$0xff]  }
 0x329   : > { %5631 = vmatprep.subr.bf16.mxu0 %v8759_v52  ;;  %v8843_v52 = vld [vmem:[%s9726_s20 + $0xa10] ss:$28 sps:$4 sm:$0xff]   ;;  %v8846_v17 = vld [vmem:[%s9726_s20 + $0x318] ss:$28 sps:$4 sm:$0xff]  }
 0x32a   : > { %5582 = vmatmul.mubr.bf16.vlgmr.msra.gmra.mrb[0].mxu1 %v9901_v51 }
 0x32b   : > { %5623 = vmatmul.mubr.bf16.vlgmr.msra.gmra.mrb[0].mxu0 %v9903_v18  ;;  %5714 = vmatpush1.bf16.msra.mxu1 %v8760_v20  ;;  %v8854_v20 = vld [vmem:[%s9726_s20 + $0x354] ss:$28 sps:$4 sm:$0xff]  }
 0x32c   : > { %5632 = vmatpush1.bf16.msra.mxu0 %v8757_v19  ;;  %5715 = vmatprep.subr.bf16.mxu1 %v8770_v22  ;;  %v8851_v19 = vld [vmem:[%s9726_s20 + $0xa4c] ss:$28 sps:$4 sm:$0xff]  }
 0x32d   : > { %5633 = vmatprep.subr.bf16.mxu0 %v8767_v14  ;;  %5745 = vmatprep.mubr.bf16.mxu1 %v9875_v61  ;;  %v8849_v14 = vld [vmem:[%s9726_s20 + $0xa48] ss:$28 sps:$4 sm:$0xff]   ;;  %v8852_v22 = vld [vmem:[%s9726_s20 + $0x350] ss:$28 sps:$4 sm:$0xff]  }
 0x32e   : > { %5663 = vmatprep.mubr.bf16.mxu0 %v9937_v7 }
 0x32f   : > { %5716 = vmatpush1.bf16.msra.mxu1 %v8768_v24  ;;  %v8862_v24 = vld [vmem:[%s9726_s20 + $0x38c] ss:$28 sps:$4 sm:$0xff]  }
 0x330   : > { %5634 = vmatpush1.bf16.msra.mxu0 %v8765_v23  ;;  %5717 = vmatprep.subr.bf16.mxu1 %v8776_v26  ;;  %v8859_v23 = vld [vmem:[%s9726_s20 + $0xa84] ss:$28 sps:$4 sm:$0xff]  }
 0x331   : > { %5635 = vmatprep.subr.bf16.mxu0 %v8773_v25  ;;  %v9981_v25 = vcombine.low %v9932_v43, %v9932_v43  ;;  %v8857_v26 = vld [vmem:[%s9726_s20 + $0xa80] ss:$28 sps:$4 sm:$0xff]   ;;  %v8882_v43 = vld [vmem:[%s9726_s20 + $0x468] ss:$28 sps:$4 sm:$0xff]  }
 0x333   : > { %5718 = vmatpush1.bf16.msra.mxu1 %v8774_v28  ;;  %v8865_v28 = vld [vmem:[%s9726_s20 + $0x3c4] ss:$28 sps:$4 sm:$0xff]  }
 0x334   : > { %5636 = vmatpush1.bf16.msra.mxu0 %v8771_v27  ;;  %5719 = vmatprep.subr.bf16.mxu1 %v8782_v30  ;;  %v8860_v27 = vld [vmem:[%s9726_s20 + $0x388] ss:$28 sps:$4 sm:$0xff]   ;;  %v8863_v30 = vld [vmem:[%s9726_s20 + $0x3c0] ss:$28 sps:$4 sm:$0xff]  }
 0x335   : > { %5637 = vmatprep.subr.bf16.mxu0 %v8779_v29  ;;  %v8868_v29 = vld [vmem:[%s9726_s20 + $0xabc] ss:$28 sps:$4 sm:$0xff]  }
 0x337   : > { %5720 = vmatpush1.bf16.msra.mxu1 %v8780_v32  ;;  %v8871_v32 = vld [vmem:[%s9726_s20 + $0x3fc] ss:$28 sps:$4 sm:$0xff]  }
 0x338   : > { %5638 = vmatpush1.bf16.msra.mxu0 %v8777_v31  ;;  %5721 = vmatprep.subr.bf16.mxu1 %v8788_v35  ;;  %v8866_v31 = vld [vmem:[%s9726_s20 + $0xab8] ss:$28 sps:$4 sm:$0xff]   ;;  %v9456_v35 = vmov 0  }
 0x339   : > { %5639 = vmatprep.subr.bf16.mxu0 %v8785_v33  ;;  %v8874_v33 = vld [vmem:[%s9726_s20 + $0xa8c] ss:$28 sps:$4 sm:$0xff]  }
 0x33b   : > { %5722 = vmatpush1.bf16.msra.mxu1 %v8786_v37  ;;  %v8878_v37 = vld [vmem:[%s9726_s20 + $0x434] ss:$28 sps:$4 sm:$0xff]  }
 0x33c   : > { %5640 = vmatpush1.bf16.msra.mxu0 %v8783_v36  ;;  %5723 = vmatprep.subr.bf16.mxu1 %v8794_v39  ;;  %v8869_v36 = vld [vmem:[%s9726_s20 + $0x3f8] ss:$28 sps:$4 sm:$0xff]   ;;  %v8875_v39 = vld [vmem:[#allocation2 + $0x18] ss:$0 sps:$4 sm:$0xff]  }
 0x33d   : > { %5641 = vmatprep.subr.bf16.mxu0 %v8791_v38  ;;  %v8872_v38 = vld [vmem:[%s9726_s20 + $0xa88] ss:$28 sps:$4 sm:$0xff]  }
 0x33f   : > { %5724 = vmatpush1.bf16.msra.mxu1 %v8792_v41  ;;  %v8881_v41 = vld [vmem:[%s9726_s20 + $0xac4] ss:$28 sps:$4 sm:$0xff]  }
 0x340   : > { %5642 = vmatpush1.bf16.msra.mxu0 %v8789_v40  ;;  %5725 = vmatprep.subr.bf16.mxu1 %v8800_v47  ;;  %v8876_v40 = vld [vmem:[%s9726_s20 + $0x430] ss:$28 sps:$4 sm:$0xff]   ;;  %v8879_v47 = vld [vmem:[%s9726_s20 + $0xac0] ss:$28 sps:$4 sm:$0xff]  }
 0x341   : > { %5643 = vmatprep.subr.bf16.mxu0 %v8797_v42  ;;  %v8884_v42 = vld [vmem:[%s9726_s20 + $0x46c] ss:$28 sps:$4 sm:$0xff]  }
 0x343   : > { %5726 = vmatpush1.bf16.msra.mxu1 %v8798_v45  ;;  %v8890_v45 = vld [vmem:[%s9726_s20 + $0x4a4] ss:$28 sps:$4 sm:$0xff]  }
 0x344   : > { %5644 = vmatpush1.bf16.msra.mxu0 %v8795_v44  ;;  %5727 = vmatprep.subr.bf16.mxu1 %v8806_v48  ;;  %v8887_v44 = vld [vmem:[%s9726_s20 + $0x14] ss:$28 sps:$4 sm:$0xff]   ;;  %v8888_v48 = vld [vmem:[%s9726_s20 + $0x4a0] ss:$28 sps:$4 sm:$0xff]  }
 0x345   : > { %5645 = vmatprep.subr.bf16.mxu0 %v8803_v46  ;;  %v8885_v46 = vld [vmem:[%s9726_s20 + $0x10] ss:$28 sps:$4 sm:$0xff]  }
 0x347   : > { %5728 = vmatpush1.bf16.msra.mxu1 %v8804_v34  ;;  %v8896_v34 = vld [vmem:[%s9726_s20 + $0x4dc] ss:$28 sps:$4 sm:$0xff]  }
 0x348   : > { %5646 = vmatpush1.bf16.msra.mxu0 %v8801_v49  ;;  %5729 = vmatprep.subr.bf16.mxu1 %v8812_v54  ;;  %v8893_v49 = vld [vmem:[%s9726_s20 + $0x4c] ss:$28 sps:$4 sm:$0xff]   ;;  %v8894_v54 = vld [vmem:[%s9726_s20 + $0x4d8] ss:$28 sps:$4 sm:$0xff]  }
 0x349   : > { %5647 = vmatprep.subr.bf16.mxu0 %v8809_v53  ;;  %v8891_v53 = vld [vmem:[%s9726_s20 + $0x48] ss:$28 sps:$4 sm:$0xff]  }
 0x34b   : > { %5730 = vmatpush1.bf16.msra.mxu1 %v8810_v56  ;;  %v8902_v56 = vld [vmem:[%s9726_s20 + $0x514] ss:$28 sps:$4 sm:$0xff]  }
 0x34c   : > { %5648 = vmatpush1.bf16.msra.mxu0 %v8807_v55  ;;  %5731 = vmatprep.subr.bf16.mxu1 %v8818_v59  ;;  %v8899_v55 = vld [vmem:[%s9726_s20 + $0x84] ss:$28 sps:$4 sm:$0xff]   ;;  %v8900_v59 = vld [vmem:[%s9726_s20 + $0x510] ss:$28 sps:$4 sm:$0xff]  }
 0x34d   : > { %5649 = vmatprep.subr.bf16.mxu0 %v8815_v57  ;;  %v8897_v57 = vld [vmem:[%s9726_s20 + $0x80] ss:$28 sps:$4 sm:$0xff]  }
 0x34f   : > { %5732 = vmatpush1.bf16.msra.mxu1 %v8816_v62  ;;  %v8908_v62 = vld [vmem:[%s9726_s20 + $0x54c] ss:$28 sps:$4 sm:$0xff]  }
 0x350   : > { %5650 = vmatpush1.bf16.msra.mxu0 %v8813_v60  ;;  %5733 = vmatprep.subr.bf16.mxu1 %v8824_v1  ;;  %v8905_v60 = vld [vmem:[%s9726_s20 + $0xbc] ss:$28 sps:$4 sm:$0xff]   ;;  %v8906_v1 = vld [vmem:[%s9726_s20 + $0x548] ss:$28 sps:$4 sm:$0xff]  }
 0x351   : > { %5651 = vmatprep.subr.bf16.mxu0 %v8821_v0  ;;  %v8903_v0 = vld [vmem:[%s9726_s20 + $0xb8] ss:$28 sps:$4 sm:$0xff]  }
 0x353   : > { %5734 = vmatpush1.bf16.msra.mxu1 %v8822_v4  ;;  %v8914_v4 = vld [vmem:[%s9726_s20 + $0x584] ss:$28 sps:$4 sm:$0xff]  }
 0x354   : > { %5652 = vmatpush1.bf16.msra.mxu0 %v8819_v3  ;;  %5735 = vmatprep.subr.bf16.mxu1 %v8830_v8  ;;  %v8911_v3 = vld [vmem:[%s9726_s20 + $0xf4] ss:$28 sps:$4 sm:$0xff]   ;;  %v8912_v8 = vld [vmem:[%s9726_s20 + $0x580] ss:$28 sps:$4 sm:$0xff]  }
 0x355   : > { %5653 = vmatprep.subr.bf16.mxu0 %v8827_v5  ;;  %v8909_v5 = vld [vmem:[%s9726_s20 + $0xf0] ss:$28 sps:$4 sm:$0xff]  }
 0x357   : > { %5736 = vmatpush1.bf16.msra.mxu1 %v8828_v58  ;;  %v8920_v58 = vld [vmem:[%s9726_s20 + $0x5bc] ss:$28 sps:$4 sm:$0xff]  }
 0x358   : > { %5654 = vmatpush1.bf16.msra.mxu0 %v8825_v9  ;;  %5737 = vmatprep.subr.bf16.mxu1 %v8836_v10  ;;  %v8917_v9 = vld [vmem:[%s9726_s20 + $0x12c] ss:$28 sps:$4 sm:$0xff]   ;;  %v8918_v10 = vld [vmem:[%s9726_s20 + $0x5b8] ss:$28 sps:$4 sm:$0xff]  }
 0x359   : > { %5655 = vmatprep.subr.bf16.mxu0 %v8833_v21  ;;  %v8915_v21 = vld [vmem:[%s9726_s20 + $0x128] ss:$28 sps:$4 sm:$0xff]  }
 0x35b   : > { %5738 = vmatpush1.bf16.msra.mxu1 %v8834_v11  ;;  %v8926_v11 = vld [vmem:[%s9726_s20 + $0x5f4] ss:$28 sps:$4 sm:$0xff]  }
 0x35c   : > { %5656 = vmatpush1.bf16.msra.mxu0 %v8831_v63  ;;  %5739 = vmatprep.subr.bf16.mxu1 %v8842_v6  ;;  %v8923_v63 = vld [vmem:[%s9726_s20 + $0x164] ss:$28 sps:$4 sm:$0xff]   ;;  %v8924_v6 = vld [vmem:[%s9726_s20 + $0x5f0] ss:$28 sps:$4 sm:$0xff]  }
 0x35d   : > { %5657 = vmatprep.subr.bf16.mxu0 %v8839_v12  ;;  %v8921_v12 = vld [vmem:[%s9726_s20 + $0x160] ss:$28 sps:$4 sm:$0xff]  }
 0x35f   : > { %5740 = vmatpush1.bf16.msra.mxu1 %v8840_v15  ;;  %v8932_v15 = vld [vmem:[%s9726_s20 + $0x62c] ss:$28 sps:$4 sm:$0xff]  }
 0x360   : > { %5658 = vmatpush1.bf16.msra.mxu0 %v8837_v13  ;;  %5741 = vmatprep.subr.bf16.mxu1 %v8848_v16  ;;  %v8929_v13 = vld [vmem:[%s9726_s20 + $0x19c] ss:$28 sps:$4 sm:$0xff]   ;;  %v8930_v16 = vld [vmem:[%s9726_s20 + $0x628] ss:$28 sps:$4 sm:$0xff]  }
 0x361   : > { %5659 = vmatprep.subr.bf16.mxu0 %v8845_v50  ;;  %v8927_v50 = vld [vmem:[%s9726_s20 + $0x198] ss:$28 sps:$4 sm:$0xff]  }
 0x363   : > { %5742 = vmatpush1.bf16.msra.mxu1 %v8846_v17  ;;  %v8938_v17 = vld [vmem:[%s9726_s20 + $0x664] ss:$28 sps:$4 sm:$0xff]  }
 0x364   : > { %5660 = vmatpush1.bf16.msra.mxu0 %v8843_v52  ;;  %5743 = vmatprep.subr.bf16.mxu1 %v8854_v20  ;;  %v8935_v52 = vld [vmem:[%s9726_s20 + $0x1d4] ss:$28 sps:$4 sm:$0xff]   ;;  %v8936_v20 = vld [vmem:[%s9726_s20 + $0x660] ss:$28 sps:$4 sm:$0xff]  }
 0x365   : > { %5661 = vmatprep.subr.bf16.mxu0 %v8851_v19  ;;  %v8933_v19 = vld [vmem:[%s9726_s20 + $0x1d0] ss:$28 sps:$4 sm:$0xff]  }
 0x367   : > { %5744 = vmatpush1.bf16.msra.mxu1 %v8852_v22  ;;  %v8944_v22 = vld [vmem:[%s9726_s20 + $0x69c] ss:$28 sps:$4 sm:$0xff]  }
 0x368   : > { %5662 = vmatpush1.bf16.msra.mxu0 %v8849_v14  ;;  %5754 = vmatprep.subr.bf16.mxu1 %v8862_v24  ;;  %v8941_v14 = vld [vmem:[%s9726_s20 + $0x20c] ss:$28 sps:$4 sm:$0xff]   ;;  %v8942_v24 = vld [vmem:[%s9726_s20 + $0x698] ss:$28 sps:$4 sm:$0xff]  }
 0x369   : > { %5672 = vmatprep.subr.bf16.mxu0 %v8859_v23  ;;  %v8939_v23 = vld [vmem:[%s9726_s20 + $0x208] ss:$28 sps:$4 sm:$0xff]  }
 0x36a   : > { %5746 = vmatmul.mubr.bf16.vlgmr.msra.gmra.mrb[4].mxu1 %v9901_v51 }
 0x36b   : > { %5664 = vmatmul.mubr.bf16.vlgmr.msra.gmra.mrb[0].mxu0 %v9981_v25  ;;  %5755 = vmatpush1.bf16.msra.mxu1 %v8860_v27  ;;  %v8950_v27 = vld [vmem:[%s9726_s20 + $0x6d4] ss:$28 sps:$4 sm:$0xff]  }
 0x36c   : > { %5673 = vmatpush1.bf16.msra.mxu0 %v8857_v26  ;;  %5756 = vmatprep.subr.bf16.mxu1 %v8865_v28  ;;  %v8947_v26 = vld [vmem:[%s9726_s20 + $0x244] ss:$28 sps:$4 sm:$0xff]  }
 0x36d   : > { %5674 = vmatprep.subr.bf16.mxu0 %v8868_v29  ;;  %5704 = vmatprep.mubr.bf16.mxu0 %v9456_v35  ;;  %v8945_v28 = vld [vmem:[%s9726_s20 + $0x240] ss:$28 sps:$4 sm:$0xff]   ;;  %v8948_v29 = vld [vmem:[%s9726_s20 + $0x6d0] ss:$28 sps:$4 sm:$0xff]  }
 0x36e   : > { %5786 = vmatprep.mubr.bf16.mxu1 %v9879_v2 }
 0x36f   : > { %5757 = vmatpush1.bf16.msra.mxu1 %v8863_v30  ;;  %v8953_v30 = vld [vmem:[%s9726_s20 + $0x27c] ss:$28 sps:$4 sm:$0xff]  }
 0x370   : > { %5675 = vmatpush1.bf16.msra.mxu0 %v8866_v31  ;;  %5758 = vmatprep.subr.bf16.mxu1 %v8871_v32  ;;  %v8956_v31 = vld [vmem:[%s9726_s20 + $0x70c] ss:$28 sps:$4 sm:$0xff]   ;;  %v8951_v32 = vld [vmem:[%s9726_s20 + $0x278] ss:$28 sps:$4 sm:$0xff]  }
 0x371   : > { %5836 = vmatprep.subr.bf16.mxu0 %v8874_v33  ;;  %v8954_v33 = vld [vmem:[%s9726_s20 + $0x708] ss:$28 sps:$4 sm:$0xff]  }
 0x373   : > { %5759 = vmatpush1.bf16.msra.mxu1 %v8869_v36  ;;  %v8959_v36 = vld [vmem:[%s9726_s20 + $0x2b4] ss:$28 sps:$4 sm:$0xff]  }
 0x374   : > { %5760 = vmatprep.subr.bf16.mxu1 %v8878_v37  ;;  %v8962_v37 = vld [vmem:[%s9726_s20 + $0x744] ss:$28 sps:$4 sm:$0xff]  }
 0x377   : > { %7679 = vmatmul.mubr.msk.bf16.vlgmr.msra.gmra.mrb[0].mxu0 %vm5545_vm3, %v8875_v39  ;;  %5761 = vmatpush1.bf16.msra.mxu1 %v8876_v40  ;;  %v8965_v40 = vld [vmem:[%s9726_s20 + $0x2ec] ss:$28 sps:$4 sm:$0xff]  }
 0x378   : > { %5837 = vmatpush1.bf16.msra.mxu0 %v8872_v38  ;;  %5762 = vmatprep.subr.bf16.mxu1 %v8884_v42  ;;  %v8957_v38 = vld [vmem:[%s9726_s20 + $0x2b0] ss:$28 sps:$4 sm:$0xff]   ;;  %v8963_v42 = vld [vmem:[%s9726_s20 + $0x2e8] ss:$28 sps:$4 sm:$0xff]  }
 0x379   : > { %5838 = vmatprep.subr.bf16.mxu0 %v8881_v41  ;;  %5868 = vmatprep.mubr.bf16.mxu0 %v9456_v35  ;;  %v8968_v41 = vld [vmem:[%s9726_s20 + $0x77c] ss:$28 sps:$4 sm:$0xff]  }
 0x37b   : > { %5763 = vmatpush1.bf16.msra.mxu1 %v8882_v43  ;;  %v8971_v43 = vld [vmem:[%s9726_s20 + $0x324] ss:$28 sps:$4 sm:$0xff]  }
 0x37c   : > { %5839 = vmatpush1.bf16.msra.mxu0 %v8879_v47  ;;  %5764 = vmatprep.subr.bf16.mxu1 %v8890_v45  ;;  %v8966_v47 = vld [vmem:[%s9726_s20 + $0x778] ss:$28 sps:$4 sm:$0xff]   ;;  %v8969_v45 = vld [vmem:[%s9726_s20 + $0x320] ss:$28 sps:$4 sm:$0xff]  }
 0x37d   : > { %5877 = vmatprep.subr.bf16.mxu0 %v8887_v44  ;;  %v8974_v44 = vld [vmem:[%s9726_s20 + $0x7b4] ss:$28 sps:$4 sm:$0xff]  }
 0x37f   : > { %7680 = vmatmul.mubr.msk.bf16.vlgmr.msra.gmra.mrb[4].mxu0 %vm5545_vm3, %v8875_v39  ;;  %5765 = vmatpush1.bf16.msra.mxu1 %v8888_v48  ;;  %v8960_v39 = vld [vmem:[%s9726_s20 + $0x740] ss:$28 sps:$4 sm:$0xff]  }
 0x380   : > { %5878 = vmatpush1.bf16.msra.mxu0 %v8885_v46  ;;  %5766 = vmatprep.subr.bf16.mxu1 %v8896_v34  ;;  %v8972_v46 = vld [vmem:[%s9726_s20 + $0x7b0] ss:$28 sps:$4 sm:$0xff]   ;;  %v8977_v48 = vld [vmem:[%s9726_s20 + $0x35c] ss:$28 sps:$4 sm:$0xff]  }
 0x381   : > { %5879 = vmatprep.subr.bf16.mxu0 %v8893_v49  ;;  %5909 = vmatprep.mubr.bf16.mxu0 %v9875_v61  ;;  %v8980_v49 = vld [vmem:[%s9726_s20 + $0x7ec] ss:$28 sps:$4 sm:$0xff]   ;;  %v8975_v34 = vld [vmem:[%s9726_s20 + $0x358] ss:$28 sps:$4 sm:$0xff]  }
 0x383   : > { %5767 = vmatpush1.bf16.msra.mxu1 %v8894_v54  ;;  %v8983_v54 = vld [vmem:[%s9726_s20 + $0x394] ss:$28 sps:$4 sm:$0xff]  }
 0x384   : > { %5880 = vmatpush1.bf16.msra.mxu0 %v8891_v53  ;;  %5768 = vmatprep.subr.bf16.mxu1 %v8902_v56  ;;  %v8978_v53 = vld [vmem:[%s9726_s20 + $0x7e8] ss:$28 sps:$4 sm:$0xff]   ;;  %v8981_v56 = vld [vmem:[%s9726_s20 + $0x390] ss:$28 sps:$4 sm:$0xff]  }
 0x385   : > { %5881 = vmatprep.subr.bf16.mxu0 %v8899_v55  ;;  %v8986_v55 = vld [vmem:[%s9726_s20 + $0x824] ss:$28 sps:$4 sm:$0xff]  }
 0x387   : > { %5769 = vmatpush1.bf16.msra.mxu1 %v8900_v59  ;;  %v8989_v59 = vld [vmem:[%s9726_s20 + $0x3cc] ss:$28 sps:$4 sm:$0xff]  }
 0x388   : > { %5882 = vmatpush1.bf16.msra.mxu0 %v8897_v57  ;;  %5770 = vmatprep.subr.bf16.mxu1 %v8908_v62  ;;  %v8984_v57 = vld [vmem:[%s9726_s20 + $0x820] ss:$28 sps:$4 sm:$0xff]   ;;  %v8987_v62 = vld [vmem:[%s9726_s20 + $0x3c8] ss:$28 sps:$4 sm:$0xff]  }
 0x389   : > { %5883 = vmatprep.subr.bf16.mxu0 %v8905_v60  ;;  %v8992_v60 = vld [vmem:[%s9726_s20 + $0x85c] ss:$28 sps:$4 sm:$0xff]  }
 0x38b   : > { %5771 = vmatpush1.bf16.msra.mxu1 %v8906_v1  ;;  %v8995_v1 = vld [vmem:[%s9726_s20 + $0x404] ss:$28 sps:$4 sm:$0xff]  }
 0x38c   : > { %5884 = vmatpush1.bf16.msra.mxu0 %v8903_v0  ;;  %5772 = vmatprep.subr.bf16.mxu1 %v8914_v4  ;;  %v8990_v0 = vld [vmem:[%s9726_s20 + $0x858] ss:$28 sps:$4 sm:$0xff]   ;;  %v8993_v4 = vld [vmem:[%s9726_s20 + $0x400] ss:$28 sps:$4 sm:$0xff]  }
 0x38d   : > { %5885 = vmatprep.subr.bf16.mxu0 %v8911_v3  ;;  %v8998_v3 = vld [vmem:[%s9726_s20 + $0x894] ss:$28 sps:$4 sm:$0xff]  }
 0x38f   : > { %5773 = vmatpush1.bf16.msra.mxu1 %v8912_v8  ;;  %v9001_v8 = vld [vmem:[%s9726_s20 + $0x43c] ss:$28 sps:$4 sm:$0xff]  }
 0x390   : > { %5886 = vmatpush1.bf16.msra.mxu0 %v8909_v5  ;;  %5774 = vmatprep.subr.bf16.mxu1 %v8920_v58  ;;  %v8996_v5 = vld [vmem:[%s9726_s20 + $0x890] ss:$28 sps:$4 sm:$0xff]   ;;  %v8999_v58 = vld [vmem:[%s9726_s20 + $0x438] ss:$28 sps:$4 sm:$0xff]  }
 0x391   : > { %5887 = vmatprep.subr.bf16.mxu0 %v8917_v9  ;;  %v9004_v9 = vld [vmem:[%s9726_s20 + $0x8cc] ss:$28 sps:$4 sm:$0xff]  }
 0x393   : > { %5775 = vmatpush1.bf16.msra.mxu1 %v8918_v10  ;;  %v9007_v10 = vld [vmem:[%s9726_s20 + $0x474] ss:$28 sps:$4 sm:$0xff]  }
 0x394   : > { %5888 = vmatpush1.bf16.msra.mxu0 %v8915_v21  ;;  %5776 = vmatprep.subr.bf16.mxu1 %v8926_v11  ;;  %v9002_v21 = vld [vmem:[%s9726_s20 + $0x8c8] ss:$28 sps:$4 sm:$0xff]   ;;  %v9005_v11 = vld [vmem:[%s9726_s20 + $0x470] ss:$28 sps:$4 sm:$0xff]  }
 0x395   : > { %5889 = vmatprep.subr.bf16.mxu0 %v8923_v63  ;;  %v9010_v63 = vld [vmem:[%s9726_s20 + $0x904] ss:$28 sps:$4 sm:$0xff]  }
 0x397   : > { %5777 = vmatpush1.bf16.msra.mxu1 %v8924_v6  ;;  %v9013_v6 = vld [vmem:[%s9726_s20 + $0x4ac] ss:$28 sps:$4 sm:$0xff]  }
 0x398   : > { %5890 = vmatpush1.bf16.msra.mxu0 %v8921_v12  ;;  %5778 = vmatprep.subr.bf16.mxu1 %v8932_v15  ;;  %v9008_v12 = vld [vmem:[%s9726_s20 + $0x900] ss:$28 sps:$4 sm:$0xff]   ;;  %v9011_v15 = vld [vmem:[%s9726_s20 + $0x4a8] ss:$28 sps:$4 sm:$0xff]  }
 0x399   : > { %5891 = vmatprep.subr.bf16.mxu0 %v8929_v13  ;;  %v9016_v13 = vld [vmem:[%s9726_s20 + $0x93c] ss:$28 sps:$4 sm:$0xff]  }
 0x39b   : > { %5779 = vmatpush1.bf16.msra.mxu1 %v8930_v16  ;;  %v9019_v16 = vld [vmem:[%s9726_s20 + $0x4e4] ss:$28 sps:$4 sm:$0xff]  }
 0x39c   : > { %5892 = vmatpush1.bf16.msra.mxu0 %v8927_v50  ;;  %5780 = vmatprep.subr.bf16.mxu1 %v8938_v17  ;;  %v9014_v50 = vld [vmem:[%s9726_s20 + $0x938] ss:$28 sps:$4 sm:$0xff]   ;;  %v9017_v17 = vld [vmem:[%s9726_s20 + $0x4e0] ss:$28 sps:$4 sm:$0xff]  }
 0x39d   : > { %5893 = vmatprep.subr.bf16.mxu0 %v8935_v52  ;;  %v9022_v52 = vld [vmem:[%s9726_s20 + $0x974] ss:$28 sps:$4 sm:$0xff]  }
 0x39f   : > { %5781 = vmatpush1.bf16.msra.mxu1 %v8936_v20  ;;  %v9025_v20 = vld [vmem:[%s9726_s20 + $0x51c] ss:$28 sps:$4 sm:$0xff]  }
 0x3a0   : > { %5894 = vmatpush1.bf16.msra.mxu0 %v8933_v19  ;;  %5782 = vmatprep.subr.bf16.mxu1 %v8944_v22  ;;  %v9020_v19 = vld [vmem:[%s9726_s20 + $0x970] ss:$28 sps:$4 sm:$0xff]   ;;  %v9023_v22 = vld [vmem:[%s9726_s20 + $0x518] ss:$28 sps:$4 sm:$0xff]  }
 0x3a1   : > { %5895 = vmatprep.subr.bf16.mxu0 %v8941_v14  ;;  %v9028_v14 = vld [vmem:[%s9726_s20 + $0x9ac] ss:$28 sps:$4 sm:$0xff]  }
 0x3a3   : > { %5783 = vmatpush1.bf16.msra.mxu1 %v8942_v24  ;;  %v9031_v24 = vld [vmem:[%s9726_s20 + $0x554] ss:$28 sps:$4 sm:$0xff]  }
 0x3a4   : > { %5896 = vmatpush1.bf16.msra.mxu0 %v8939_v23  ;;  %5784 = vmatprep.subr.bf16.mxu1 %v8950_v27  ;;  %v9026_v23 = vld [vmem:[%s9726_s20 + $0x9a8] ss:$28 sps:$4 sm:$0xff]   ;;  %v9029_v27 = vld [vmem:[%s9726_s20 + $0x550] ss:$28 sps:$4 sm:$0xff]  }
 0x3a5   : > { %5897 = vmatprep.subr.bf16.mxu0 %v8947_v26  ;;  %v9034_v26 = vld [vmem:[%s9726_s20 + $0x9e4] ss:$28 sps:$4 sm:$0xff]  }
 0x3a7   : > { %5785 = vmatpush1.bf16.msra.mxu1 %v8948_v29  ;;  %v9037_v29 = vld [vmem:[%s9726_s20 + $0x58c] ss:$28 sps:$4 sm:$0xff]  }
 0x3a8   : > { %5898 = vmatpush1.bf16.msra.mxu0 %v8945_v28  ;;  %5795 = vmatprep.subr.bf16.mxu1 %v8956_v31  ;;  %v9032_v28 = vld [vmem:[%s9726_s20 + $0x9e0] ss:$28 sps:$4 sm:$0xff]   ;;  %v9035_v31 = vld [vmem:[%s9726_s20 + $0x588] ss:$28 sps:$4 sm:$0xff]  }
 0x3a9   : > { %5899 = vmatprep.subr.bf16.mxu0 %v8953_v30  ;;  %v9040_v30 = vld [vmem:[%s9726_s20 + $0xa1c] ss:$28 sps:$4 sm:$0xff]  }
 0x3aa   : > { %5787 = vmatmul.mubr.bf16.vlgmr.msra.gmra.mrb[4].mxu1 %v9903_v18 }
 0x3ab   : > { %5796 = vmatpush1.bf16.msra.mxu1 %v8954_v33  ;;  %5827 = vmatprep.mubr.bf16.mxu1 %v9937_v7  ;;  %v9043_v33 = vld [vmem:[%s9726_s20 + $0x5c4] ss:$28 sps:$4 sm:$0xff]  }
 0x3ac   : > { %5900 = vmatpush1.bf16.msra.mxu0 %v8951_v32  ;;  %5797 = vmatprep.subr.bf16.mxu1 %v8962_v37  ;;  %v9038_v32 = vld [vmem:[%s9726_s20 + $0xa18] ss:$28 sps:$4 sm:$0xff]   ;;  %v9041_v37 = vld [vmem:[%s9726_s20 + $0x5c0] ss:$28 sps:$4 sm:$0xff]  }
 0x3ad   : > { %5901 = vmatprep.subr.bf16.mxu0 %v8959_v36  ;;  %v9046_v36 = vld [vmem:[%s9726_s20 + $0xa54] ss:$28 sps:$4 sm:$0xff]  }
 0x3af   : > { %5798 = vmatpush1.bf16.msra.mxu1 %v8960_v39  ;;  %v9049_v39 = vld [vmem:[%s9726_s20 + $0x5fc] ss:$28 sps:$4 sm:$0xff]  }
 0x3b0   : > { %5902 = vmatpush1.bf16.msra.mxu0 %v8957_v38  ;;  %5799 = vmatprep.subr.bf16.mxu1 %v8968_v41  ;;  %v9044_v38 = vld [vmem:[%s9726_s20 + $0xa50] ss:$28 sps:$4 sm:$0xff]   ;;  %v9047_v41 = vld [vmem:[%s9726_s20 + $0x5f8] ss:$28 sps:$4 sm:$0xff]  }
 0x3b1   : > { %5903 = vmatprep.subr.bf16.mxu0 %v8965_v40  ;;  %v9050_v40 = vld [vmem:[%s9726_s20 + $0x1d8] ss:$28 sps:$4 sm:$0xff]  }
 0x3b3   : > { %5800 = vmatpush1.bf16.msra.mxu1 %v8966_v47  ;;  %v9054_v47 = vld [vmem:[%s9726_s20 + $0x634] ss:$28 sps:$4 sm:$0xff]  }
 0x3b4   : > { %5904 = vmatpush1.bf16.msra.mxu0 %v8963_v42  ;;  %5801 = vmatprep.subr.bf16.mxu1 %v8974_v44  ;;  %v9051_v42 = vld [vmem:[%s9726_s20 + $0x18] ss:$28 sps:$4 sm:$0xff]   ;;  %v9052_v44 = vld [vmem:[%s9726_s20 + $0x630] ss:$28 sps:$4 sm:$0xff]  }
 0x3b5   : > { %5905 = vmatprep.subr.bf16.mxu0 %v8971_v43  ;;  %v9055_v43 = vld [vmem:[%s9726_s20 + $0x210] ss:$28 sps:$4 sm:$0xff]  }
 0x3b7   : > { %5802 = vmatpush1.bf16.msra.mxu1 %v8972_v46  ;;  %v9059_v46 = vld [vmem:[%s9726_s20 + $0x66c] ss:$28 sps:$4 sm:$0xff]  }
 0x3b8   : > { %5906 = vmatpush1.bf16.msra.mxu0 %v8969_v45  ;;  %5803 = vmatprep.subr.bf16.mxu1 %v8980_v49  ;;  %v9056_v45 = vld [vmem:[%s9726_s20 + $0x50] ss:$28 sps:$4 sm:$0xff]   ;;  %v9057_v49 = vld [vmem:[%s9726_s20 + $0x668] ss:$28 sps:$4 sm:$0xff]  }
 0x3b9   : > { %5907 = vmatprep.subr.bf16.mxu0 %v8977_v48  ;;  %v9060_v48 = vld [vmem:[%s9726_s20 + $0x248] ss:$28 sps:$4 sm:$0xff]  }
 0x3bb   : > { %5804 = vmatpush1.bf16.msra.mxu1 %v8978_v53  ;;  %v9064_v53 = vld [vmem:[%s9726_s20 + $0x6a4] ss:$28 sps:$4 sm:$0xff]  }
 0x3bc   : > { %5908 = vmatpush1.bf16.msra.mxu0 %v8975_v34  ;;  %5805 = vmatprep.subr.bf16.mxu1 %v8986_v55  ;;  %v9061_v34 = vld [vmem:[%s9726_s20 + $0x88] ss:$28 sps:$4 sm:$0xff]   ;;  %v9062_v55 = vld [vmem:[%s9726_s20 + $0x6a0] ss:$28 sps:$4 sm:$0xff]  }
 0x3bd   : > { %5918 = vmatprep.subr.bf16.mxu0 %v8983_v54  ;;  %v9065_v54 = vld [vmem:[%s9726_s20 + $0x280] ss:$28 sps:$4 sm:$0xff]  }
 0x3bf   : > { %5910 = vmatmul.mubr.bf16.vlgmr.msra.gmra.mrb[8].mxu0 %v9901_v51  ;;  %5806 = vmatpush1.bf16.msra.mxu1 %v8984_v57  ;;  %v9070_v57 = vld [vmem:[%s9726_s20 + $0x2b8] ss:$28 sps:$4 sm:$0xff]  }
 0x3c0   : > { %5919 = vmatpush1.bf16.msra.mxu0 %v8981_v56  ;;  %5807 = vmatprep.subr.bf16.mxu1 %v8992_v60  ;;  %v9066_v56 = vld [vmem:[%s9726_s20 + $0xc0] ss:$28 sps:$4 sm:$0xff]   ;;  %v9071_v60 = vld [vmem:[%s9726_s20 + $0xf8] ss:$28 sps:$4 sm:$0xff]  }
 0x3c1   : > { %5920 = vmatprep.subr.bf16.mxu0 %v8989_v59  ;;  %5950 = vmatprep.mubr.bf16.mxu0 %v9879_v2  ;;  %v9067_v59 = vld [vmem:[%s9726_s20 + $0x6d8] ss:$28 sps:$4 sm:$0xff]  }
 0x3c3   : > { %5808 = vmatpush1.bf16.msra.mxu1 %v8990_v0  ;;  %v9075_v0 = vld [vmem:[%s9726_s20 + $0x2f0] ss:$28 sps:$4 sm:$0xff]  }
 0x3c4   : > { %5921 = vmatpush1.bf16.msra.mxu0 %v8987_v62  ;;  %5809 = vmatprep.subr.bf16.mxu1 %v8998_v3  ;;  %v9074_v62 = vld [vmem:[%s9726_s20 + $0x714] ss:$28 sps:$4 sm:$0xff]  }
 0x3c5   : > { %5922 = vmatprep.subr.bf16.mxu0 %v8995_v1  ;;  %v9072_v1 = vld [vmem:[%s9726_s20 + $0x710] ss:$28 sps:$4 sm:$0xff]  }
 0x3c6   : > { %v9076_v3 = vld [vmem:[%s9726_s20 + $0x130] ss:$28 sps:$4 sm:$0xff]  }
 0x3c7   : > { %5810 = vmatpush1.bf16.msra.mxu1 %v8996_v5  ;;  %v9080_v5 = vld [vmem:[%s9726_s20 + $0x328] ss:$28 sps:$4 sm:$0xff]  }
 0x3c8   : > { %5923 = vmatpush1.bf16.msra.mxu0 %v8993_v4  ;;  %5811 = vmatprep.subr.bf16.mxu1 %v9004_v9  ;;  %v9079_v4 = vld [vmem:[%s9726_s20 + $0x74c] ss:$28 sps:$4 sm:$0xff]  }
 0x3c9   : > { %5924 = vmatprep.subr.bf16.mxu0 %v9001_v8 }
 0x3cb   : > { %5812 = vmatpush1.bf16.msra.mxu1 %v9002_v21  ;;  %v9077_v21 = vld [vmem:[%s9726_s20 + $0x748] ss:$28 sps:$4 sm:$0xff]  }
 0x3cc   : > { %5925 = vmatpush1.bf16.msra.mxu0 %v8999_v58  ;;  %5813 = vmatprep.subr.bf16.mxu1 %v9010_v63 }
 0x3cd   : > { %5926 = vmatprep.subr.bf16.mxu0 %v9007_v10  ;;  %v9081_v10 = vld [vmem:[%s9726_s20 + $0x168] ss:$28 sps:$4 sm:$0xff]  }
 0x3cf   : > { %5814 = vmatpush1.bf16.msra.mxu1 %v9008_v12  ;;  %v9085_v12 = vld [vmem:[%s9726_s20 + $0x360] ss:$28 sps:$4 sm:$0xff]  }
 0x3d0   : > { %5927 = vmatpush1.bf16.msra.mxu0 %v9005_v11  ;;  %5815 = vmatprep.subr.bf16.mxu1 %v9016_v13  ;;  %v9084_v11 = vld [vmem:[%s9726_s20 + $0x784] ss:$28 sps:$4 sm:$0xff]  }
 0x3d1   : > { %5928 = vmatprep.subr.bf16.mxu0 %v9013_v6  ;;  %v9082_v6 = vld [vmem:[%s9726_s20 + $0x780] ss:$28 sps:$4 sm:$0xff]  }
 0x3d2   : > { %v9086_v13 = vld [vmem:[%s9726_s20 + $0x1a0] ss:$28 sps:$4 sm:$0xff]  }
 0x3d3   : > { %5816 = vmatpush1.bf16.msra.mxu1 %v9014_v50  ;;  %v9090_v50 = vld [vmem:[%s9726_s20 + $0x558] ss:$28 sps:$4 sm:$0xff]  }
 0x3d4   : > { %5929 = vmatpush1.bf16.msra.mxu0 %v9011_v15  ;;  %5817 = vmatprep.subr.bf16.mxu1 %v9022_v52  ;;  %v9089_v15 = vld [vmem:[%s9726_s20 + $0x7bc] ss:$28 sps:$4 sm:$0xff]  }
 0x3d5   : > { %5930 = vmatprep.subr.bf16.mxu0 %v9019_v16  ;;  %v9087_v16 = vld [vmem:[%s9726_s20 + $0x7b8] ss:$28 sps:$4 sm:$0xff]  }
 0x3d6   : > { %v9091_v52 = vld [vmem:[%s9726_s20 + $0x398] ss:$28 sps:$4 sm:$0xff]  }
 0x3d7   : > { %5818 = vmatpush1.bf16.msra.mxu1 %v9020_v19  ;;  %v9095_v19 = vld [vmem:[%s9726_s20 + $0x590] ss:$28 sps:$4 sm:$0xff]  }
 0x3d8   : > { %5931 = vmatpush1.bf16.msra.mxu0 %v9017_v17  ;;  %5819 = vmatprep.subr.bf16.mxu1 %v9028_v14  ;;  %v9094_v17 = vld [vmem:[%s9726_s20 + $0x7f4] ss:$28 sps:$4 sm:$0xff]  }
 0x3d9   : > { %5932 = vmatprep.subr.bf16.mxu0 %v9025_v20  ;;  %v9092_v20 = vld [vmem:[%s9726_s20 + $0x7f0] ss:$28 sps:$4 sm:$0xff]  }
 0x3da   : > { %v9096_v14 = vld [vmem:[%s9726_s20 + $0x3d0] ss:$28 sps:$4 sm:$0xff]  }
 0x3db   : > { %5820 = vmatpush1.bf16.msra.mxu1 %v9026_v23  ;;  %v9100_v23 = vld [vmem:[%s9726_s20 + $0x5c8] ss:$28 sps:$4 sm:$0xff]  }
 0x3dc   : > { %5933 = vmatpush1.bf16.msra.mxu0 %v9023_v22  ;;  %5821 = vmatprep.subr.bf16.mxu1 %v9034_v26  ;;  %v9099_v22 = vld [vmem:[%s9726_s20 + $0x82c] ss:$28 sps:$4 sm:$0xff]   ;;  %v9104_v26 = vld [vmem:[%s9726_s20 + $0x864] ss:$28 sps:$4 sm:$0xff]  }
 0x3dd   : > { %5934 = vmatprep.subr.bf16.mxu0 %v9031_v24  ;;  %v9097_v24 = vld [vmem:[%s9726_s20 + $0x828] ss:$28 sps:$4 sm:$0xff]  }
 0x3df   : > { %5822 = vmatpush1.bf16.msra.mxu1 %v9032_v28  ;;  %v9102_v28 = vld [vmem:[%s9726_s20 + $0x860] ss:$28 sps:$4 sm:$0xff]  }
 0x3e0   : > { %5935 = vmatpush1.bf16.msra.mxu0 %v9029_v27  ;;  %5823 = vmatprep.subr.bf16.mxu1 %v9040_v30  ;;  %v9105_v27 = vld [vmem:[%s9726_s20 + $0x600] ss:$28 sps:$4 sm:$0xff]   ;;  %v9110_v30 = vld [vmem:[%s9726_s20 + $0x638] ss:$28 sps:$4 sm:$0xff]  }
 0x3e1   : > { %5936 = vmatprep.subr.bf16.mxu0 %v9037_v29  ;;  %v9106_v29 = vld [vmem:[%s9726_s20 + $0x440] ss:$28 sps:$4 sm:$0xff]  }
 0x3e3   : > { %5824 = vmatpush1.bf16.msra.mxu1 %v9038_v32  ;;  %v9111_v32 = vld [vmem:[%s9726_s20 + $0x478] ss:$28 sps:$4 sm:$0xff]  }
 0x3e4   : > { %5937 = vmatpush1.bf16.msra.mxu0 %v9035_v31  ;;  %5825 = vmatprep.subr.bf16.mxu1 %v9046_v36  ;;  %v9107_v31 = vld [vmem:[%s9726_s20 + $0x898] ss:$28 sps:$4 sm:$0xff]   ;;  %v9115_v36 = vld [vmem:[%s9726_s20 + $0x670] ss:$28 sps:$4 sm:$0xff]  }
 0x3e5   : > { %5938 = vmatprep.subr.bf16.mxu0 %v9043_v33  ;;  %v9114_v33 = vld [vmem:[%s9726_s20 + $0x8d4] ss:$28 sps:$4 sm:$0xff]  }
 0x3e7   : > { %5826 = vmatpush1.bf16.msra.mxu1 %v9044_v38  ;;  %v9116_v38 = vld [vmem:[%s9726_s20 + $0x4b0] ss:$28 sps:$4 sm:$0xff]  }
 0x3e8   : > { %5939 = vmatpush1.bf16.msra.mxu0 %v9041_v37  ;;  %7827 = vmatprep.subr.bf16.mxu1 %v9050_v40  ;;  %v9112_v37 = vld [vmem:[%s9726_s20 + $0x8d0] ss:$28 sps:$4 sm:$0xff]   ;;  %v9120_v40 = vld [vmem:[%s9726_s20 + $0x6a8] ss:$28 sps:$4 sm:$0xff]  }
 0x3e9   : > { %5940 = vmatprep.subr.bf16.mxu0 %v9049_v39  ;;  %v9119_v39 = vld [vmem:[%s9726_s20 + $0x90c] ss:$28 sps:$4 sm:$0xff]  }
 0x3ea   : > { %5828 = vmatmul.mubr.bf16.vlgmr.msra.gmra.mrb[4].mxu1 %v9981_v25 }
 0x3eb   : > { %7828 = vmatpush3.bf16.msra.mxu1 %v9051_v42  ;;  %6073 = vmatprep.mubr.bf16.mxu1 %v9875_v61  ;;  %v9069_v61 = vld [vmem:[%s9726_s20 + $0x6dc] ss:$28 sps:$4 sm:$0xff]   ;;  %v9121_v42 = vld [vmem:[%s9726_s20 + $0x4e8] ss:$28 sps:$4 sm:$0xff]  }
 0x3ec   : > { %5941 = vmatpush1.bf16.msra.mxu0 %v9047_v41  ;;  %7829 = vmatprep.subr.bf16.mxu1 %v9055_v43  ;;  %v9117_v41 = vld [vmem:[%s9726_s20 + $0x908] ss:$28 sps:$4 sm:$0xff]   ;;  %v9125_v43 = vld [vmem:[%s9726_s20 + $0x6e0] ss:$28 sps:$4 sm:$0xff]  }
 0x3ed   : > { %5942 = vmatprep.subr.bf16.mxu0 %v9054_v47  ;;  %v9124_v47 = vld [vmem:[%s9726_s20 + $0x944] ss:$28 sps:$4 sm:$0xff]  }
 0x3ef   : > { %7830 = vmatpush3.bf16.msra.mxu1 %v9056_v45  ;;  %v9126_v45 = vld [vmem:[%s9726_s20 + $0x520] ss:$28 sps:$4 sm:$0xff]  }
 0x3f0   : > { %5943 = vmatpush1.bf16.msra.mxu0 %v9052_v44  ;;  %7831 = vmatprep.subr.bf16.mxu1 %v9060_v48  ;;  %v9122_v44 = vld [vmem:[%s9726_s20 + $0x940] ss:$28 sps:$4 sm:$0xff]   ;;  %v9130_v48 = vld [vmem:[%s9726_s20 + $0x8d8] ss:$28 sps:$4 sm:$0xff]  }
 0x3f1   : > { %5944 = vmatprep.subr.bf16.mxu0 %v9059_v46  ;;  %v9129_v46 = vld [vmem:[%s9726_s20 + $0x97c] ss:$28 sps:$4 sm:$0xff]  }
 0x3f3   : > { %7832 = vmatpush3.bf16.msra.mxu1 %v9061_v34  ;;  %v9131_v34 = vld [vmem:[%s9726_s20 + $0x718] ss:$28 sps:$4 sm:$0xff]  }
 0x3f4   : > { %5945 = vmatpush1.bf16.msra.mxu0 %v9057_v49  ;;  %7833 = vmatprep.subr.bf16.mxu1 %v9065_v54  ;;  %v9127_v49 = vld [vmem:[%s9726_s20 + $0x978] ss:$28 sps:$4 sm:$0xff]   ;;  %v9135_v54 = vld [vmem:[%s9726_s20 + $0x910] ss:$28 sps:$4 sm:$0xff]  }
 0x3f5   : > { %5946 = vmatprep.subr.bf16.mxu0 %v9064_v53  ;;  %v9134_v53 = vld [vmem:[%s9726_s20 + $0x9b4] ss:$28 sps:$4 sm:$0xff]  }
 0x3f7   : > { %7834 = vmatpush3.bf16.msra.mxu1 %v9066_v56  ;;  %v9136_v56 = vld [vmem:[%s9726_s20 + $0x750] ss:$28 sps:$4 sm:$0xff]  }
 0x3f8   : > { %5947 = vmatpush1.bf16.msra.mxu0 %v9062_v55  ;;  %7835 = vmatprep.subr.bf16.mxu1 %v9070_v57  ;;  %v9132_v55 = vld [vmem:[%s9726_s20 + $0x9b0] ss:$28 sps:$4 sm:$0xff]   ;;  %v9140_v57 = vld [vmem:[%s9726_s20 + $0x948] ss:$28 sps:$4 sm:$0xff]  }
 0x3f9   : > { %5948 = vmatprep.subr.bf16.mxu0 %v9069_v61  ;;  %v9139_v61 = vld [vmem:[%s9726_s20 + $0x9ec] ss:$28 sps:$4 sm:$0xff]  }
 0x3fb   : > { %7836 = vmatpush3.bf16.msra.mxu1 %v9071_v60  ;;  %v9144_v60 = vld [vmem:[%s9726_s20 + $0xa24] ss:$28 sps:$4 sm:$0xff]  }
 0x3fc   : > { %5949 = vmatpush1.bf16.msra.mxu0 %v9067_v59  ;;  %7837 = vmatprep.subr.bf16.mxu1 %v9075_v0  ;;  %v9137_v59 = vld [vmem:[%s9726_s20 + $0x9e8] ss:$28 sps:$4 sm:$0xff]   ;;  %v9142_v0 = vld [vmem:[%s9726_s20 + $0xa20] ss:$28 sps:$4 sm:$0xff]  }
 0x3fd   : > { %5959 = vmatprep.subr.bf16.mxu0 %v9074_v62  ;;  %v10147_v8 = vpop.f32.mrb[0].mxu1  ;;  %v9145_v62 = vld [vmem:[%s9726_s20 + $0x980] ss:$28 sps:$4 sm:$0xff]  }
 0x3fe   : > { %v10150_v9 = vpop.f32.mrb[1].mxu1 }
 0x3ff   : > { %5951 = vmatmul.mubr.bf16.vlgmr.msra.gmra.mrb[8].mxu0 %v9903_v18  ;;  %7838 = vmatpush3.bf16.msra.mxu1 %v9076_v3  ;;  %v5587_v58 = vpop.f32.mrb[2].mxu1  ;;  %v9150_v3 = vld [vmem:[%s9726_s20 + $0x9b8] ss:$28 sps:$4 sm:$0xff]  }
 0x400   : > { %5960 = vmatpush1.bf16.msra.mxu0 %v9072_v1  ;;  %v5588_v63 = vpop.f32.mrb[3].mxu1  ;;  %7839 = vmatprep.subr.bf16.mxu1 %v9080_v5  ;;  %v9146_v1 = vld [vmem:[%s9726_s20 + $0x7c0] ss:$28 sps:$4 sm:$0xff]   ;;  %v9151_v5 = vld [vmem:[%s9726_s20 + $0x7f8] ss:$28 sps:$4 sm:$0xff]   ;;  %v3686_v58 = vlaneseq }
 0x401   : > { %5961 = vmatprep.subr.bf16.mxu0 %v9079_v4  ;;  %5991 = vmatprep.mubr.bf16.mxu0 %v9937_v7  ;;  %v9147_v4 = vld [vmem:[%s9726_s20 + $0xa58] ss:$28 sps:$4 sm:$0xff]   ;;  %v9152_v63 = vld [vmem:[%s9726_s20 + $0xa90] ss:$28 sps:$4 sm:$0xff]  }
 0x403   : > { %7840 = vmatpush3.bf16.msra.mxu1 %v9081_v10  ;;  %v9155_v10 = vld [vmem:[%s9726_s20 + $0x9f0] ss:$28 sps:$4 sm:$0xff]  }
 0x404   : > { %5962 = vmatpush1.bf16.msra.mxu0 %v9077_v21  ;;  %7841 = vmatprep.subr.bf16.mxu1 %v9085_v12  ;;  %v9154_v21 = vld [vmem:[%s9726_s20 + $0xa94] ss:$28 sps:$4 sm:$0xff]   ;;  %v10219_v12 = vshrl.u32 %v3686_v58, 7 }
 0x405   : > { %5963 = vmatprep.subr.bf16.mxu0 %v9084_v11  ;;  %v9156_v11 = vld [vmem:[%s9726_s20 + $0x830] ss:$28 sps:$4 sm:$0xff]  }
 0x407   : > { %7842 = vmatpush3.bf16.msra.mxu1 %v9086_v13  ;;  %v9160_v13 = vld [vmem:[%s9726_s20 + $0xacc] ss:$28 sps:$4 sm:$0xff]  }
 0x408   : > { %5964 = vmatpush1.bf16.msra.mxu0 %v9082_v6  ;;  %7849 = vmatprep.subr.bf16.mxu1 %v9090_v50  ;;  %v9157_v6 = vld [vmem:[%s9726_s20 + $0xa28] ss:$28 sps:$4 sm:$0xff]  }
 0x409   : > { %5965 = vmatprep.subr.bf16.mxu0 %v9089_v15  ;;  %v9158_v15 = vld [vmem:[%s9726_s20 + $0xac8] ss:$28 sps:$4 sm:$0xff]  }
 0x40a   : > { %6074 = vmatmul.mubr.bf16.vlgmr.msra.gmra.mrb[8].mxu1 %v9901_v51  ;;  %v9101_v51 = vld [vmem:[%s9726_s20 + $0x408] ss:$28 sps:$4 sm:$0xff]  }
 0x40b   : > { %7850 = vmatpush3.bf16.msra.mxu1 %v9091_v52  ;;  %6113 = vmatprep.mubr.bf16.mxu1 %v9879_v2  ;;  %v9109_v2 = vld [vmem:[%s9726_s20 + $0x89c] ss:$28 sps:$4 sm:$0xff]   ;;  %v9161_v50 = vld [vmem:[%s9726_s20 + $0x868] ss:$28 sps:$4 sm:$0xff]  }
 0x40c   : > { %5966 = vmatpush1.bf16.msra.mxu0 %v9087_v16  ;;  %7851 = vmatprep.subr.bf16.mxu1 %v9095_v19  ;;  %v3688_v16 = vsub.s32 0, %v10219_v12  ;;  %v9162_v52 = vld [vmem:[%s9726_s20 + $0xa60] ss:$28 sps:$4 sm:$0xff]   ;;  %v3692_v19 = vsub.s32 1, %v10219_v12 }
 0x40d   : > { %5967 = vmatprep.subr.bf16.mxu0 %v9094_v17  ;;  %v10230_v17 = vld [vmem:[%s322_s8] sm:$0x7f] }
 0x40f   : > { %7852 = vmatpush3.bf16.msra.mxu1 %v9096_v14  ;;  %v3689_v14 = vrot.slane %v10230_v17, %v3688_v16 }
 0x410   : > { %5968 = vmatpush1.bf16.msra.mxu0 %v9092_v20  ;;  %7853 = vmatprep.subr.bf16.mxu1 %v9100_v23  ;;  %v9163_v20 = vld [vmem:[%s9726_s20 + $0x8a0] ss:$28 sps:$4 sm:$0xff]   ;;  %v3693_v23 = vrot.slane %v10230_v17, %v3692_v19 }
 0x411   : > { %5969 = vmatprep.subr.bf16.mxu0 %v9099_v22  ;;  %v9457_v22 = vmov 0.0  }
 0x413   : > { %7854 = vmatpush3.bf16.msra.mxu1 %v9101_v51  ;;  %v5584_v51 = vadd.f32 %v10147_v8, %v3689_v14 }
 0x414   : > { %5970 = vmatpush1.bf16.msra.mxu0 %v9097_v24  ;;  %7855 = vmatprep.subr.bf16.mxu1 %v9105_v27  ;;  %v9164_v24 = vld [vmem:[%s9726_s20 + $0xa98] ss:$28 sps:$4 sm:$0xff]  }
 0x415   : > { %5971 = vmatprep.subr.bf16.mxu0 %v9104_v26  ;;  %v5586_v26 = vadd.f32 %v10150_v9, %v3693_v23 }
 0x417   : > { %7856 = vmatpush3.bf16.msra.mxu1 %v9106_v29 }
 0x418   : > { %5972 = vmatpush1.bf16.msra.mxu0 %v9102_v28  ;;  %7857 = vmatprep.subr.bf16.mxu1 %v9110_v30 }
 0x419   : > { %5973 = vmatprep.subr.bf16.mxu0 %v9109_v2 }
 0x41b   : > { %7858 = vmatpush3.bf16.msra.mxu1 %v9111_v32 }
 0x41c   : > { %5974 = vmatpush1.bf16.msra.mxu0 %v9107_v31  ;;  %7859 = vmatprep.subr.bf16.mxu1 %v9115_v36  ;;  %v9165_v31 = vld [vmem:[%s9726_s20 + $0xad0] ss:$28 sps:$4 sm:$0xff]  }
 0x41d   : > { %5975 = vmatprep.subr.bf16.mxu0 %v9114_v33 }
 0x41f   : > { %7860 = vmatpush3.bf16.msra.mxu1 %v9116_v38 }
 0x420   : > { %5976 = vmatpush1.bf16.msra.mxu0 %v9112_v37  ;;  %7861 = vmatprep.subr.bf16.mxu1 %v9120_v40  ;;  %v3700_v40 = vsub.s32 3, %v10219_v12 }
 0x421   : > { %5977 = vmatprep.subr.bf16.mxu0 %v9119_v39 }
 0x423   : > { %7862 = vmatpush3.bf16.msra.mxu1 %v9121_v42  ;;  %v3701_v42 = vrot.slane %v10230_v17, %v3700_v40  ;;  %v9177_v40 = vld [vmem:[%s10447_s5 + $0xd0] sm:$0xff] (!%p7687_p0)  }
 0x424   : > { %5978 = vmatpush1.bf16.msra.mxu0 %v9117_v41  ;;  %7863 = vmatprep.subr.bf16.mxu1 %v9125_v43 }
 0x425   : > { %5979 = vmatprep.subr.bf16.mxu0 %v9124_v47 }
 0x427   : > { %7864 = vmatpush3.bf16.msra.mxu1 %v9126_v45 }
 0x428   : > { %5980 = vmatpush1.bf16.msra.mxu0 %v9122_v44  ;;  %7871 = vmatprep.subr.bf16.mxu1 %v9130_v48 }
 0x429   : > { %5981 = vmatprep.subr.bf16.mxu0 %v9129_v46 }
 0x42a   : > { %6114 = vmatmul.mubr.bf16.vlgmr.msra.gmra.mrb[12].mxu1 %v9903_v18  ;;  %v9141_v18 = vld [vmem:[%s9726_s20 + $0x788] ss:$28 sps:$4 sm:$0xff]  }
 0x42b   : > { %7872 = vmatpush3.bf16.msra.mxu1 %v9131_v34  ;;  %6153 = vmatprep.mubr.bf16.mxu1 %v9937_v7  ;;  %v9149_v7 = vld [vmem:[%s9726_s20 + $0xa5c] ss:$28 sps:$4 sm:$0xff]  }
 0x42c   : > { %5982 = vmatpush1.bf16.msra.mxu0 %v9127_v49  ;;  %7873 = vmatprep.subr.bf16.mxu1 %v9135_v54 }
 0x42d   : > { %5983 = vmatprep.subr.bf16.mxu0 %v9134_v53 }
 0x42f   : > { %7874 = vmatpush3.bf16.msra.mxu1 %v9136_v56 }
 0x430   : > { %5984 = vmatpush1.bf16.msra.mxu0 %v9132_v55  ;;  %7875 = vmatprep.subr.bf16.mxu1 %v9140_v57 }
 0x431   : > { %5985 = vmatprep.subr.bf16.mxu0 %v9139_v61 }
 0x433   : > { %7876 = vmatpush3.bf16.msra.mxu1 %v9141_v18 }
 0x434   : > { %5986 = vmatpush1.bf16.msra.mxu0 %v9137_v59  ;;  %7877 = vmatprep.subr.bf16.mxu1 %v9145_v62 }
 0x435   : > { %5987 = vmatprep.subr.bf16.mxu0 %v9144_v60  ;;  %v3712_v60 = vsub.s32 6, %v10219_v12 }
 0x437   : > { %7878 = vmatpush3.bf16.msra.mxu1 %v9146_v1  ;;  %v3713_v62 = vrot.slane %v10230_v17, %v3712_v60  ;;  %v9196_v60 = vld [vmem:[%s10447_s5 + $0x38] sm:$0xff] (!%p7687_p0)  }
 0x438   : > { %5988 = vmatpush1.bf16.msra.mxu0 %v9142_v0  ;;  %7879 = vmatprep.subr.bf16.mxu1 %v9150_v3 }
 0x439   : > { %5989 = vmatprep.subr.bf16.mxu0 %v9149_v7 }
 0x43b   : > { %7880 = vmatpush3.bf16.msra.mxu1 %v9151_v5 }
 0x43c   : > { %5990 = vmatpush1.bf16.msra.mxu0 %v9147_v4  ;;  %7881 = vmatprep.subr.bf16.mxu1 %v9155_v10  ;;  %v3708_v10 = vsub.s32 5, %v10219_v12 }
 0x43d   : > { %6000 = vmatprep.subr.bf16.mxu0 %v9154_v21  ;;  %v3704_v21 = vsub.s32 4, %v10219_v12 }
 0x43f   : > { %5992 = vmatmul.mubr.bf16.vlgmr.msra.gmra.mrb[8].mxu0 %v9981_v25  ;;  %7882 = vmatpush3.bf16.msra.mxu1 %v9156_v11  ;;  %v3709_v11 = vrot.slane %v10230_v17, %v3708_v10  ;;  %v9204_v10 = vld [vmem:[%s10447_s5 + $0x100] sm:$0xff] (!%p7687_p0)  }
 0x440   : > { %6001 = vmatpush1.bf16.msra.mxu0 %v9152_v63  ;;  %7883 = vmatprep.subr.bf16.mxu1 %v9157_v6  ;;  %v3705_v63 = vrot.slane %v10230_v17, %v3704_v21 }
 0x441   : > { %6002 = vmatprep.subr.bf16.mxu0 %v9160_v13  ;;  %6032 = vmatprep.mubr.bf16.mxu0 %v9456_v35  ;;  %v9166_v35 = vld [vmem:[#allocation2 + $0x18] ss:$0 sps:$4 sm:$0xff]  }
 0x443   : > { %7884 = vmatpush3.bf16.msra.mxu1 %v9161_v50 }
 0x444   : > { %6003 = vmatpush1.bf16.msra.mxu0 %v9158_v15  ;;  %7885 = vmatprep.subr.bf16.mxu1 %v9162_v52 }
 0x445   : > { %7971 = vmatprep.subr.bf16.mxu0 %v9457_v22 }
 0x447   : > { %7886 = vmatpush3.bf16.msra.mxu1 %v9163_v20 }
 0x44a   : > { %v5706_v27 = vpop.f32.mrb[0].mxu0  ;;  %6154 = vmatmul.mubr.bf16.vlgmr.msra.gmra.mrb[16].mxu1 %v9981_v25  ;;  %v3696_v25 = vsub.s32 2, %v10219_v12 }
 0x44b   : > { %v8026_v28 = vadd.f32 %v5706_v27, %v5584_v51  ;;  %7681 = vmatmul.mubr.msk.bf16.vlgmr.msra.gmra.mrb[8].mxu0 %vm5545_vm3, %v9166_v35  ;;  %v5708_v29 = vpop.f32.mrb[1].mxu0 }
 0x44c   : > { %v8028_v2 = vadd.f32 %v5708_v29, %v5586_v26  ;;  %7972 = vmatpush3.bf16.msra.mxu0 %v9164_v24  ;;  %v5710_v30 = vpop.f32.mrb[2].mxu0  ;;  %7975 = vmatprep.mubr.msk.bf16.mxu0 %vm9458_vm4, %v9457_v22  ;;  %v3697_v41 = vrot.slane %v10230_v17, %v3696_v25  ;;  %v9176_v25 = vld [vmem:[%s10447_s5 + $0x10] sm:$0xff] (!%p7687_p0)  }
 0x44d   : > { %v6201_v32 = vmax.f32 %v8026_v28, 0.0  ;;  %v5711_v33 = vpop.f32.mrb[3].mxu0  ;;  %7973 = vmatprep.subr.bf16.mxu0 %v9457_v22 }
 0x44e   : > { %v6202_v8 = vmax.f32 %v8028_v2, 0.0  ;;  %v9169_v33 = vld [vmem:[%s10447_s5 + $0xc0] sm:$0xff] (!%p7687_p0)  }
 0x44f   : > { %7918 = vmatprep.subr.bf16.mxu1 (!%p7687_p0), %v9169_v33 }
 0x450   : > { %v7755_v36 = vpack.c.bf16 %v6202_v8, %v6201_v32  ;;  %7974 = vmatpush3.bf16.msra.mxu0 %v9165_v31  ;;  %v9167_v31 = vld [vmem:[%s10447_s5 + $0x40] sm:$0xff] (!%p7687_p0)  }
 0x451   : > { %v9168_v32 = vld [vmem:[%s10447_s5] sm:$0xff] (!%p7687_p0)   ;;  %7896 = vmatprep.subr.bf16.mxu0 (!%p7687_p0), %v9167_v31 }
 0x452   : > { %6237 = vst [vmem:[#allocation2] sm:$0xff] %v7755_v36  ;;  %v5870_v9 = vpop.f32.mrb[4].mxu0  ;;  %v9170_v8 = vld [vmem:[%s10447_s5 + $0x80] sm:$0xff] (!%p7687_p0)   ;;  %v9171_v36 = vld [vmem:[%s10447_s5 + $0x48] sm:$0xff] (!%p7687_p0)  }
 0x453   : > { %7976 = vmatmul.mubr.msk.bf16.vlgmr.msra.gmra.mrb[12].mxu0 %vm5545_vm3, %v9166_v35  ;;  %v5872_v37 = vpop.f32.mrb[5].mxu0  ;;  %7919 = vmatpush3.bf16.msra.mxu1 (!%p7687_p0), %v9170_v8 }
 0x454   : > { %v5874_v38 = vpop.f32.mrb[6].mxu0  ;;  %7897 = vmatpush3.bf16.msra.mxu0 (!%p7687_p0), %v9168_v32 }
 0x455   : > { %v5875_v39 = vpop.f32.mrb[7].mxu0  ;;  %7898 = vmatprep.subr.bf16.mxu0 (!%p7687_p0), %v9171_v36  ;;  %v9174_v38 = vld [vmem:[%s10447_s5 + $0x88] sm:$0xff] (!%p7687_p0)  }
 0x456   : > { %v9175_v39 = vld [vmem:[%s10447_s5 + $0x50] sm:$0xff] (!%p7687_p0)  }
 0x4bd   : > { %v5829_v47 = vpop.f32.mrb[4].mxu1 }
 0x4be   : > { %v8029_v43 = vadd.f32 %v5829_v47, %v3697_v41  ;;  %v5831_v44 = vpop.f32.mrb[5].mxu1  ;;  %v9178_v41 = vld [vmem:[%s10447_s5 + $0x90] sm:$0xff] (!%p7687_p0)   ;;  %v9180_v47 = vld [vmem:[%s10447_s5 + $0x18] sm:$0xff] (!%p7687_p0)  }
 0x4bf   : > { %v8031_v45 = vadd.f32 %v5831_v44, %v3701_v42  ;;  %v5833_v46 = vpop.f32.mrb[6].mxu1  ;;  %v9179_v42 = vld [vmem:[%s10447_s5 + $0x58] sm:$0xff] (!%p7687_p0)  }
 0x4c0   : > { %v8030_v48 = vadd.f32 %v8029_v43, %v5870_v9  ;;  %v5834_v49 = vpop.f32.mrb[7].mxu1  ;;  %v9172_v9 = vld [vmem:[%s10447_s5 + $0x8] sm:$0xff] (!%p7687_p0)   ;;  %v9181_v43 = vld [vmem:[%s10447_s5 + $0xd8] sm:$0xff] (!%p7687_p0)   ;;  %v9184_v46 = vld [vmem:[%s10447_s5 + $0x20] sm:$0xff] (!%p7687_p0)  }
 0x4c1   : > { %v8032_v34 = vadd.f32 %v8031_v45, %v5872_v37  ;;  %v9173_v37 = vld [vmem:[%s10447_s5 + $0xc8] sm:$0xff] (!%p7687_p0)   ;;  %7899 = vmatpush3.bf16.msra.mxu0 (!%p7687_p0), %v9172_v9  ;;  %v9182_v44 = vld [vmem:[%s10447_s5 + $0x98] sm:$0xff] (!%p7687_p0)   ;;  %v9183_v45 = vld [vmem:[%s10447_s5 + $0x60] sm:$0xff] (!%p7687_p0)  }
 0x4c2   : > { %v6203_v53 = vmax.f32 %v8030_v48, 0.0  ;;  %7920 = vmatprep.subr.bf16.mxu1 (!%p7687_p0), %v9173_v37  ;;  %7900 = vmatprep.subr.bf16.mxu0 (!%p7687_p0), %v9175_v39  ;;  %v9185_v48 = vld [vmem:[%s10447_s5 + $0xe0] sm:$0xff] (!%p7687_p0)  }
 0x4c3   : > { %v6204_v54 = vmax.f32 %v8032_v34, 0.0  ;;  %7921 = vmatpush3.bf16.msra.mxu1 (!%p7687_p0), %v9174_v38  ;;  %v9186_v49 = vld [vmem:[%s10447_s5 + $0xa0] sm:$0xff] (!%p7687_p0)   ;;  %v9187_v34 = vld [vmem:[%s10447_s5 + $0x68] sm:$0xff] (!%p7687_p0)  }
 0x4c4   : > { %7922 = vmatprep.subr.bf16.mxu1 (!%p7687_p0), %v9177_v40 }
 0x4c5   : > { %v7756_v55 = vpack.c.bf16 %v6204_v54, %v6203_v53  ;;  %7901 = vmatpush3.bf16.msra.mxu0 (!%p7687_p0), %v9176_v25  ;;  %v9188_v53 = vld [vmem:[%s10447_s5 + $0x28] sm:$0xff] (!%p7687_p0)  }
 0x4c6   : > { %7902 = vmatprep.subr.bf16.mxu0 (!%p7687_p0), %v9179_v42  ;;  %v9189_v54 = vld [vmem:[%s10447_s5 + $0xe8] sm:$0xff] (!%p7687_p0)  }
 0x4c7   : > { %6238 = vst [vmem:[#allocation2 + $0x8] sm:$0xff] %v7756_v55  ;;  %7923 = vmatpush3.bf16.msra.mxu1 (!%p7687_p0), %v9178_v41  ;;  %v9190_v55 = vld [vmem:[%s10447_s5 + $0xa8] sm:$0xff] (!%p7687_p0)  }
 0x4c8   : > { %7924 = vmatprep.subr.bf16.mxu1 (!%p7687_p0), %v9181_v43 }
 0x4c9   : > { %7903 = vmatpush3.bf16.msra.mxu0 (!%p7687_p0), %v9180_v47 }
 0x4ca   : > { %7904 = vmatprep.subr.bf16.mxu0 (!%p7687_p0), %v9183_v45 }
 0x4cb   : > { %7925 = vmatpush3.bf16.msra.mxu1 (!%p7687_p0), %v9182_v44 }
 0x4cc   : > { %7926 = vmatprep.subr.bf16.mxu1 (!%p7687_p0), %v9185_v48 }
 0x4cd   : > { %7905 = vmatpush3.bf16.msra.mxu0 (!%p7687_p0), %v9184_v46 }
 0x4ce   : > { %7906 = vmatprep.subr.bf16.mxu0 (!%p7687_p0), %v9187_v34 }
 0x4cf   : > { %7927 = vmatpush3.bf16.msra.mxu1 (!%p7687_p0), %v9186_v49 }
 0x4d0   : > { %7928 = vmatprep.subr.bf16.mxu1 (!%p7687_p0), %v9189_v54 }
 0x4d1   : > { %7907 = vmatpush3.bf16.msra.mxu0 (!%p7687_p0), %v9188_v53 }
 0x4d3   : > { %7929 = vmatpush3.bf16.msra.mxu1 (!%p7687_p0), %v9190_v55 }
 0x4dd   : > { %v7843_v56 = vpop.f32.mrb[8].mxu1 }
 0x4de   : > { %v7844_v61 = vpop.f32.mrb[9].mxu1 }
 0x4df   : > { %v7845_v57 = vadd.f32 %v7844_v61, %v7843_v56  ;;  %v7846_v59 = vpop.f32.mrb[10].mxu1  ;;  %v9191_v56 = vld [vmem:[%s10447_s5 + $0x70] sm:$0xff] (!%p7687_p0)  }
 0x4e0   : > { %v7847_v18 = vpop.f32.mrb[11].mxu1  ;;  %v9192_v61 = vld [vmem:[%s10447_s5 + $0x30] sm:$0xff] (!%p7687_p0)   ;;  %7908 = vmatprep.subr.bf16.mxu0 (!%p7687_p0), %v9191_v56 }
 0x4e1   : > { %v6076_v7 = vadd.f32 %v7845_v57, %v3713_v62  ;;  %v9193_v57 = vld [vmem:[%s10447_s5 + $0xf0] sm:$0xff] (!%p7687_p0)   ;;  %7909 = vmatpush3.bf16.msra.mxu0 (!%p7687_p0), %v9192_v61  ;;  %v9195_v18 = vld [vmem:[%s10447_s5 + $0x78] sm:$0xff] (!%p7687_p0)  }
 0x4e2   : > { %v9194_v59 = vld [vmem:[%s10447_s5 + $0xb0] sm:$0xff] (!%p7687_p0)   ;;  %7930 = vmatprep.subr.bf16.mxu1 (!%p7687_p0), %v9193_v57  ;;  %7910 = vmatprep.subr.bf16.mxu0 (!%p7687_p0), %v9195_v18  ;;  %v9197_v62 = vld [vmem:[%s10447_s5 + $0xf8] sm:$0xff] (!%p7687_p0)  }
 0x4e3   : > { %7931 = vmatpush3.bf16.msra.mxu1 (!%p7687_p0), %v9194_v59 }
 0x4e4   : > { %7932 = vmatprep.subr.bf16.mxu1 (!%p7687_p0), %v9197_v62 }
 0x4e5   : > { %7911 = vmatpush3.bf16.msra.mxu0 (!%p7687_p0), %v9196_v60 }
 0x4fd   : > { %v7865_v0 = vpop.f32.mrb[12].mxu1 }
 0x4fe   : > { %v7866_v1 = vpop.f32.mrb[13].mxu1 }
 0x4ff   : > { %v7867_v3 = vadd.f32 %v7866_v1, %v7865_v0  ;;  %v7868_v4 = vpop.f32.mrb[14].mxu1  ;;  %v6246_v0 = vld [vmem:[#allocation2] sm:$0xff] (!%p7687_p0) }
 0x500   : > { %v7869_v5 = vpop.f32.mrb[15].mxu1  ;;  %v7689_v1 = vcombine.low (!%p7687_p0), %v6246_v0, %v6246_v0  ;;  %v9201_v4 = vld [vmem:[%s10447_s5 + $0x140] sm:$0xff] (!%p7687_p0)  }
 0x501   : > { %v6116_v58 = vadd.f32 %v7867_v3, %v6076_v7  ;;  %v7690_v7 = vcombine.high (!%p7687_p0), %v6246_v0, %v6246_v0  ;;  %v9200_v3 = vld [vmem:[%s10447_s5 + $0xb8] sm:$0xff] (!%p7687_p0)   ;;  %v6247_v5 = vld [vmem:[#allocation2 + $0x8] sm:$0xff] (!%p7687_p0)  ;;  %7940 = vmatprep.subr.bf16.mxu0 (!%p7687_p0), %v9201_v4 }
 0x502   : > { %7933 = vmatpush3.bf16.msra.mxu1 (!%p7687_p0), %v9200_v3  ;;  %v7692_v21 = vcombine.high (!%p7687_p0), %v6247_v5, %v6247_v5 }
 0x503   : > { %6716 = vmatprep.mubr.bf16.mxu0 (!%p7687_p0), %v7690_v7 }
 0x504   : > { %6717 = vmatmul.mubr.bf16.vlgmr.msra.gmra.mrb[0].mxu0 (!%p7687_p0), %v7689_v1  ;;  %6756 = vmatprep.mubr.bf16.mxu1 (!%p7687_p0), %v7692_v21 }
 0x505   : > { %7941 = vmatpush3.bf16.msra.mxu0 (!%p7687_p0), %v9204_v10 }
 0x51d   : > { %v7887_v13 = vpop.f32.mrb[16].mxu1 }
 0x51e   : > { %v6034_v6 = vpop.f32.mrb[8].mxu0  ;;  %v7888_v16 = vpop.f32.mrb[17].mxu1 }
 0x51f   : > { %v8033_v15 = vadd.f32 %v6034_v6, %v3705_v63  ;;  %v6036_v50 = vpop.f32.mrb[9].mxu0  ;;  %v7889_v20 = vadd.f32 %v7888_v16, %v7887_v13  ;;  %v7890_v14 = vpop.f32.mrb[18].mxu1  ;;  %v9205_v63 = vld [vmem:[%s10447_s5 + $0x148] sm:$0xff] (!%p7687_p0)   ;;  %v9207_v6 = vld [vmem:[%s10447_s5 + $0x150] sm:$0xff] (!%p7687_p0)   ;;  %v9459_v13 = vmov (!%p7687_p0), 0.0   ;;  %v9210_v16 = vld [vmem:[%s10447_s5 + $0x118] sm:$0xff] (!%p7687_p0)  }
 0x520   : > { %v8034_v52 = vadd.f32 %v6036_v50, %v3709_v11  ;;  %v6038_v19 = vpop.f32.mrb[10].mxu0  ;;  %v7891_v24 = vpop.f32.mrb[19].mxu1  ;;  %v9206_v11 = vld [vmem:[%s10447_s5 + $0x108] sm:$0xff] (!%p7687_p0)   ;;  %7942 = vmatprep.subr.bf16.mxu0 (!%p7687_p0), %v9205_v63  ;;  %7979 = vmatprep.subr.bf16.mxu1 (!%p7687_p0), %v9459_v13  ;;  %v9209_v50 = vld [vmem:[%s10447_s5 + $0x158] sm:$0xff] (!%p7687_p0)  }
 0x521   : > { %v6205_v22 = vmax.f32 %v8033_v15, 0.0  ;;  %v6039_v23 = vpop.f32.mrb[11].mxu0  ;;  %v6156_v26 = vadd.f32 %v7889_v20, %v6116_v58  ;;  %v7691_v58 = vcombine.low (!%p7687_p0), %v6247_v5, %v6247_v5  ;;  %7943 = vmatpush3.bf16.msra.mxu0 (!%p7687_p0), %v9206_v11  ;;  %v9208_v15 = vld [vmem:[%s10447_s5 + $0x110] sm:$0xff] (!%p7687_p0)   ;;  %v9217_v19 = vld [vmem:[%s10447_s5 + $0x180] sm:$0xff] (!%p7687_p0)   ;;  %v9213_v14 = vld [vmem:[%s10447_s5 + $0x168] sm:$0xff] (!%p7687_p0)  }
 0x522   : > { %v6206_v51 = vmax.f32 %v8034_v52, 0.0  ;;  %7944 = vmatprep.subr.bf16.mxu0 (!%p7687_p0), %v9207_v6  ;;  %v9211_v52 = vld [vmem:[%s10447_s5 + $0x160] sm:$0xff] (!%p7687_p0)   ;;  %v9222_v24 = vld [vmem:[%s10447_s5 + $0x188] sm:$0xff] (!%p7687_p0)  }
 0x523   : > { %6757 = vmatmul.mubr.bf16.vlgmr.msra.gmra.mrb[0].mxu1 (!%p7687_p0), %v7691_v58  ;;  %v9212_v20 = vld [vmem:[%s10447_s5 + $0x120] sm:$0xff] (!%p7687_p0)  }
 0x524   : > { %v7757_v27 = vpack.c.bf16 %v6206_v51, %v6205_v22  ;;  %7983 = vmatprep.mubr.msk.bf16.mxu1 (!%p7687_p0), %vm9460_vm6, %v9459_v13  ;;  %7980 = vmatpush3.bf16.msra.mxu1 (!%p7687_p0), %v9217_v19  ;;  %v9214_v51 = vld [vmem:[%s10447_s5 + $0x128] sm:$0xff] (!%p7687_p0)  }
 0x525   : > { %7945 = vmatpush3.bf16.msra.mxu0 (!%p7687_p0), %v9208_v15  ;;  %7981 = vmatprep.subr.bf16.mxu1 (!%p7687_p0), %v9459_v13 }
 0x526   : > { %6239 = vst [vmem:[#allocation2 + $0x10] sm:$0xff] %v7757_v27  ;;  %v6195_v12 = vpop.f32.mrb[12].mxu0  ;;  %7946 = vmatprep.subr.bf16.mxu0 (!%p7687_p0), %v9209_v50  ;;  %v9215_v27 = vld [vmem:[%s10447_s5 + $0x170] sm:$0xff] (!%p7687_p0)  }
 0x527   : > { %v6196_v28 = vadd.f32 %v6195_v12, %v6156_v26  ;;  %v7977_v35 = vpop.f32.mrb[13].mxu0  ;;  %6245 = sbr.rel (%p7687_p0) target bundleno = 1560 (0x618), region = 76  ;;  %v9216_v12 = vld [vmem:[%s10447_s5 + $0x130] sm:$0xff] (!%p7687_p0)  }
 0x528   : > { %v6198_v17 = vpop.f32.mrb[14].mxu0  ;;  %7982 = vmatpush3.bf16.msra.mxu1 (!%p7687_p0), %v9222_v24  ;;  %v9219_v35 = vld [vmem:[%s10447_s5 + $0x138] sm:$0xff] (!%p7687_p0)  }
 0x529   : > { %v6207_v29 = vmax.f32 %v6196_v28, 0.0  ;;  %v7978_v2 = vpop.f32.mrb[15].mxu0  ;;  %7947 = vmatpush3.bf16.msra.mxu0 (!%p7687_p0), %v9210_v16  ;;  %v9218_v28 = vld [vmem:[%s10447_s5 + $0x178] sm:$0xff] (!%p7687_p0)  }
 0x52a   : > { %7948 = vmatprep.subr.bf16.mxu0 (!%p7687_p0), %v9211_v52  ;;  %v7688_v2 = vld [vmem:[#allocation10] ss:$0 sm:$0xff] (!%p7687_p0) }
 0x52b   : > { %v7758_v30 = vpack.c.bf16 %v6207_v29, %v6207_v29 }
 0x52d   : > { %6241 = vst.msk [vmem:[#allocation2 + $0x18] sm:$0xf] %vm6240_vm5, %v7758_v30  ;;  %v6248_v22 = vld [vmem:[#allocation2 + $0x10] sm:$0xff] (!%p7687_p0)  ;;  %7949 = vmatpush3.bf16.msra.mxu0 (!%p7687_p0), %v9212_v20 }
 0x52e   : > { %v7694_v23 = vcombine.high %v6248_v22, %v6248_v22  ;;  %7950 = vmatprep.subr.bf16.mxu0 %v9213_v14  ;;  %v7693_v17 = vcombine.low %v6248_v22, %v6248_v22 }
 0x530   : > { %6796 = vmatprep.mubr.bf16.mxu0 %v7694_v23 }
 0x531   : > { %7951 = vmatpush3.bf16.msra.mxu0 %v9214_v51 }
 0x532   : > { %7952 = vmatprep.subr.bf16.mxu0 %v9215_v27 }
 0x534   : > { %v9223_v26 = vld [vmem:[#allocation2 + $0x18] ss:$0 sps:$4 sm:$0xff]  }
 0x535   : > { %7984 = vmatmul.mubr.msk.bf16.vlgmr.msra.gmra.mrb[4].mxu1 %vm5545_vm3, %v9223_v26  ;;  %7953 = vmatpush3.bf16.msra.mxu0 %v9216_v12 }
 0x536   : > { %7954 = vmatprep.subr.bf16.mxu0 %v9218_v28 }
 0x539   : > { %7955 = vmatpush3.bf16.msra.mxu0 %v9219_v35 }
 0x53c   : > { %6797 = vmatmul.mubr.bf16.vlgmr.msra.gmra.mrb[4].mxu0 %v7693_v17 }
 0x5d7   : > { %v7912_v29 = vpop.f32.mrb[0].mxu0 }
 0x5d8   : > { %v7913_v30 = vpop.f32.mrb[1].mxu0 }
 0x5d9   : > { %v7914_v31 = vadd.f32 %v7913_v30, %v7912_v29  ;;  %v7915_v32 = vpop.f32.mrb[2].mxu0 }
 0x5da   : > { %v7916_v8 = vpop.f32.mrb[3].mxu0 }
 0x5db   : > { %v6719_v9 = vadd.f32 %v7914_v31, %v7688_v2 }
 0x5f6   : > { %v7934_v33 = vpop.f32.mrb[0].mxu1 }
 0x5f7   : > { %v7935_v36 = vpop.f32.mrb[1].mxu1 }
 0x5f8   : > { %v7936_v37 = vadd.f32 %v7935_v36, %v7934_v33  ;;  %v7937_v38 = vpop.f32.mrb[2].mxu1 }
 0x5f9   : > { %v7938_v39 = vpop.f32.mrb[3].mxu1 }
 0x5fa   : > { %v6759_v25 = vadd.f32 %v7936_v37, %v6719_v9 }
 0x608   : > { %v6838_v40 = vpop.f32.mrb[4].mxu1 }
 0x609   : > { %v7985_v41 = vpop.f32.mrb[5].mxu1 }
 0x60a   : > { %v6841_v42 = vpop.f32.mrb[6].mxu1 }
 0x60b   : > { %v7986_v47 = vpop.f32.mrb[7].mxu1 }
 0x60f   : > { %v7956_v43 = vpop.f32.mrb[4].mxu0 }
 0x610   : > { %v7957_v44 = vpop.f32.mrb[5].mxu0 }
 0x611   : > { %v7958_v45 = vadd.f32 %v7957_v44, %v7956_v43  ;;  %v7959_v46 = vpop.f32.mrb[6].mxu0 }
 0x612   : > { %v7960_v48 = vpop.f32.mrb[7].mxu0 }
 0x613   : > { %v6799_v49 = vadd.f32 %v7958_v45, %v6759_v25 }
 0x615   : > { %v6839_v34 = vadd.f32 %v6838_v40, %v6799_v49 }
 0x617   : > { %6845 = vst.msk [vmem:[#allocation11] sm:$0xff] %vm6844_vm7, %v6839_v34 }
 0x618 PF: > { %p8113_p2 = scmp.eq.s32.totalorder %s9521_s28, 3  ;;  %s9461_s21 = smov [#allocation11]  }
 0x619   : > { %s6853_s19 = sshll.u32 %s9461_s21, 4  ;;  %s6854_s19 = int_to_ptr.vmem [resolvable:$true] %s6853_s19 }
 0x61a   : > { %s9368_s9 = scalar_lea.vmem %s6854_s19, 128  ;;  %p9375_p7 = scmp.lt.s32.totalorder %s6854_s19, %s6854_s19 }
 0x61b   : > { %p9369_p6 = scmp.ne.s32.totalorder %s6854_s19, %s9368_s9  ;;  %p9376_p9 = scmp.lt.s32.totalorder %s9368_s9, %s9368_s9 }
 0x61d   : > { %p9370_p11 = pnand %p9369_p6, %p8113_p2  ;;  %p9377_p5 = por %p9376_p9, %p9375_p7 }
 0x61f   : > { %p9371_p13 = pneg %p9370_p11 }
 0x621   : > { %p9378_p10 = pnand %p9377_p5, %p9371_p13 }
 0x623   : > { %9381 = shalt.err (!%p9378_p10)
}
 0x624   : > { %s9382_s23 = scalar_lea.hbm %s10449_s7, 128 }
 0x625   : > { %p9383_p1 = scmp.ne.s32.totalorder %s10449_s7, %s9382_s23  ;;  %p9388_p4 = scmp.lt.u32.totalorder %s9382_s23, %s10449_s7 }
 0x627   : > { %p9384_p8 = pnand %p9383_p1, %p8113_p2 }
 0x629   : > { %p9385_p3 = pneg %p9384_p8 }
 0x62b   : > { %p9390_p12 = pnand %p9388_p4, %p9385_p3 }
 0x62d   : > { %9393 = shalt.err (!%p9390_p12)
}
 0x62e   : > { %8086 = dma.vmem_to_hbm [thread:$0]  (%p8113_p2), %s6854_s19, 128, %s10449_s7, [#allocation5]  }
 0x62f   : > { %9427 = dma.done.wait (%p8113_p2), [#allocation5], 128  }
 0x630   : > { %9429 = vsyncadd (%p8113_p2), [#allocation5], 4294967168 }
 0x631 PF: > { %s10482_s27 = sld [smem:[#allocation17_spill]]  ;;  %s10483_s15 = sld [smem:[#allocation18_spill]] }
 0x632   : > { %s10484_s24 = smov %s9436_s25  ;;  %s10485_s25 = smov %s9440_s26 }
 0x637   : > { %p17_p0 = scmp.ge.s32.totalorder %s10482_s27, 6   ;;  %s10486_s26 = smov %s10483_s15 }
 0x639   :  { %19 = sbr.rel (!%p17_p0) target bundleno = 4 (0x4), region = 115 }
 0x640   :  { %6866 = vsyncpa [#allocation4], 1 }
 0x641   :  { %6868 = vsyncpa [#allocation4 + $0x1], 1 }
 0x642   :  { %6869 = vsyncpa [#allocation7], 1 }
 0x643   :  { %6870 = vsyncpa [#allocation5], 1 }
 0x644   :  { %6872 = vsyncpa [#allocation5 + $0x1], 1 }

</bundles_post_ra>
